<compile_context>
chip_gen: v5e
topology: v5e:2x2
jax: 0.10.0
libtpu: 0.0.40
codegen_flags: <defaults>
</compile_context>

<pallas_src>
import functools
import math

import jax
import jax.numpy as jnp
from jax.experimental import pallas as pl
from jax.experimental.pallas import tpu as pltpu


def ffn_kernel(x_ref, g_ref, beta_ref, w1_ref, b1_ref, w2_ref, b2_ref, o_ref,
               *, sub_rows, n_sub, eltwise_dtype):
    # Hoist small resident operands once.
    gamma = g_ref[...]                              # [1, d_model] f32
    beta = beta_ref[...]                            # [1, d_model] f32
    b1 = b1_ref[...].astype(eltwise_dtype)          # [1, d_ff]
    b2 = b2_ref[...]                                # [1, d_model] f32
    w1 = w1_ref[...]                                # [d_model, d_ff]  (bf16)
    w2 = w2_ref[...]                                # [d_ff, d_model]  (bf16)

    c = math.sqrt(2.0 / math.pi)

    # Independent sub-block chains: lets the LLO scheduler interleave one sub-block's
    # VPU/EUP (LN, GELU) work with another sub-block's MXU work.
    for s in range(n_sub):
        r0 = s * sub_rows
        x = x_ref[pl.ds(r0, sub_rows), :].astype(jnp.float32)   # [sub_rows, d_model]

        # LayerNorm(d_model, eps=1e-6): fused single pass (sum + sum-of-squares),
        # biased variance, affine -- all f32.
        inv_d = 1.0 / x.shape[-1]
        mean = jnp.sum(x, axis=-1, keepdims=True) * inv_d
        mean_sq = jnp.sum(x * x, axis=-1, keepdims=True) * inv_d
        var = jnp.maximum(mean_sq - mean * mean, 0.0)
        inv_std = jax.lax.rsqrt(var + 1e-6)
        xn = ((x - mean) * inv_std * gamma + beta).astype(w1.dtype)

        # w_1: Linear(d_model -> d_ff) on the MXU (bf16 operands, f32 accumulation).
        h = jnp.dot(xn, w1, preferred_element_type=jnp.float32)

        # bias + tanh-GELU in eltwise_dtype (bf16 on v6e/v7x, f32 on v5e).
        h = h.astype(eltwise_dtype) + b1
        h = 0.5 * h * (1.0 + jnp.tanh(c * (h + 0.044715 * (h * h * h))))

        # TODO(synk): dropout_1 / dropout_2 are identity here (inference semantics).

        # w_2: Linear(d_ff -> d_model), then residual with the pre-LayerNorm input (f32).
        out = jnp.dot(h.astype(w2.dtype), w2, preferred_element_type=jnp.float32) + b2
        o_ref[pl.ds(r0, sub_rows), :] = (out + x).astype(o_ref.dtype)


def _round_up(a, m):
    return (a + m - 1) // m * m


def _physical_vmem_bytes():
    try:
        return int(pltpu.get_tpu_info().vmem_capacity_bytes)
    except Exception:
        return 64 << 20          # conservative (v7x per-TensorCore)


def _default_eltwise_dtype():
    try:
        kind = jax.devices()[0].device_kind.lower()
    except Exception:
        kind = ""
    # v5e and older have no bf16 VPU/EUP: keep elementwise work in f32 there.
    if any(g in kind for g in ("v2", "v3", "v4", "v5")):
        return jnp.float32
    return jnp.bfloat16


def positionwise_ffn(x, gamma, beta, w1, b1, w2, b2, *,
                     tile_rows=None, matmul_dtype=jnp.bfloat16, eltwise_dtype=None):
    """x: [B, S, d_model]; w1: [d_model, d_ff], w2: [d_ff, d_model] (math layout).

    Pass w1/w2 already stored in `matmul_dtype` (cast once at init) to avoid a per-call
    f32->bf16 cast in the steady state; f32 weights are still accepted and cast here.
    """
    B, S, d_model = x.shape
    d_ff = w1.shape[1]
    N = B * S

    vmem_phys = _physical_vmem_bytes()
    if tile_rows is None:
        # 128-MiB VMEM parts (v5e/v6e) take a larger row tile; v7x (64 MiB) stays at 256.
        tile_rows = 512 if vmem_phys >= (100 << 20) else 256
    if eltwise_dtype is None:
        eltwise_dtype = _default_eltwise_dtype()

    # Row tile: multiple of 128 keeps the MXU M-dimension filled even for small N;
    # the ragged edge block is handled by masked stores (rows are independent).
    tm = min(tile_rows, _round_up(N, 128))
    n_sub = max(1, min(4, tm // 128))
    sub_rows = tm // n_sub
    grid = (pl.cdiv(N, tm),)

    x2 = x.reshape(N, d_model)
    gamma2 = gamma.reshape(1, d_model).astype(jnp.float32)
    beta2 = beta.reshape(1, d_model).astype(jnp.float32)
    b1_2 = b1.reshape(1, d_ff).astype(jnp.float32)
    b2_2 = b2.reshape(1, d_model).astype(jnp.float32)
    w1c = w1 if w1.dtype == matmul_dtype else w1.astype(matmul_dtype)
    w2c = w2 if w2.dtype == matmul_dtype else w2.astype(matmul_dtype)

    # VMEM budget: double-buffered x/out tiles, SINGLE-buffered resident weights,
    # the [tm, d_ff] intermediate, plus small vectors; leave headroom vs physical VMEM.
    x_bytes = jnp.dtype(x.dtype).itemsize
    w_bytes = jnp.dtype(matmul_dtype).itemsize
    est = (2 * tm * d_model * x_bytes          # x tiles (double-buffered)
           + 2 * tm * d_model * x_bytes        # out tiles (double-buffered)
           + 2 * d_model * d_ff * w_bytes      # w1 + w2 (Buffered(1) -> counted once)
           + tm * d_ff * 4                     # h intermediate (f32 upper bound)
           + 8 * (d_model + d_ff) * 4)         # gamma/beta/b1/b2 + slack
    vmem_limit = min(max(int(est * 1.5), 32 << 20), int(vmem_phys * 0.8))

    kernel = functools.partial(ffn_kernel, sub_rows=sub_rows, n_sub=n_sub,
                               eltwise_dtype=eltwise_dtype)
    out_shape = jax.ShapeDtypeStruct((N, d_model), x.dtype)

    def _call(single_buffer_weights):
        def const_spec(shape):
            if single_buffer_weights:
                return pl.BlockSpec(shape, lambda i: (0, 0),
                                    pipeline_mode=pl.Buffered(1))
            return pl.BlockSpec(shape, lambda i: (0, 0))

        return pl.pallas_call(
            kernel,
            out_shape=out_shape,
            grid=grid,
            in_specs=[
                pl.BlockSpec((tm, d_model), lambda i: (i, 0)),   # x tile
                const_spec((1, d_model)),                        # ln gamma
                const_spec((1, d_model)),                        # ln beta
                const_spec((d_model, d_ff)),                     # w1 (resident)
                const_spec((1, d_ff)),                           # b1
                const_spec((d_ff, d_model)),                     # w2 (resident)
                const_spec((1, d_model)),                        # b2
            ],
            out_specs=pl.BlockSpec((tm, d_model), lambda i: (i, 0)),
            compiler_params=pltpu.CompilerParams(
                dimension_semantics=("parallel",),
                vmem_limit_bytes=vmem_limit,
            ),
        )(x2, gamma2, beta2, w1c, b1_2, w2c, b2_2)

    try:
        out = _call(True)
    except Exception:
        # Fallback for jax versions without BlockSpec(pipeline_mode=...) support.
        out = _call(False)

    return out.reshape(B, S, d_model)


def _reference(x, gamma, beta, w1, b1, w2, b2):
    xf = x.astype(jnp.float32)
    mean = jnp.mean(xf, axis=-1, keepdims=True)
    var = jnp.mean((xf - mean) ** 2, axis=-1, keepdims=True)
    xn = (xf - mean) / jnp.sqrt(var + 1e-6) * gamma + beta
    h = xn @ w1.astype(jnp.float32) + b1
    c = math.sqrt(2.0 / math.pi)
    h = 0.5 * h * (1.0 + jnp.tanh(c * (h + 0.044715 * h ** 3)))
    out = h @ w2.astype(jnp.float32) + b2
    return (out + xf).astype(x.dtype)


def _run_case(key, B, S, d_model, d_ff):
    kx, k1, k2, k3, k4 = jax.random.split(key, 5)
    x = jax.random.normal(kx, (B, S, d_model), dtype=jnp.float32)
    w1 = jax.random.normal(k1, (d_model, d_ff), dtype=jnp.float32) * 0.05
    b1 = jax.random.normal(k2, (d_ff,), dtype=jnp.float32) * 0.05
    w2 = jax.random.normal(k3, (d_ff, d_model), dtype=jnp.float32) * 0.05
    b2 = jax.random.normal(k4, (d_model,), dtype=jnp.float32) * 0.05
    gamma = jnp.ones((d_model,), dtype=jnp.float32)
    beta = jnp.zeros((d_model,), dtype=jnp.float32)

    # Pre-cast weights once (steady-state inference stores them in bf16 already).
    w1_bf16 = w1.astype(jnp.bfloat16)
    w2_bf16 = w2.astype(jnp.bfloat16)

    out = positionwise_ffn(x, gamma, beta, w1_bf16, b1, w2_bf16, b2)
    out = jax.block_until_ready(out)

    ref = _reference(x, gamma, beta, w1, b1, w2, b2)
    assert out.shape == x.shape
    # bf16 matmul operands (f32 accumulation): loosen tolerance vs the pure-f32 reference.
    err = float(jnp.abs(out.astype(jnp.float32) - ref.astype(jnp.float32)).max())
    assert jnp.allclose(out.astype(jnp.float32), ref.astype(jnp.float32),
                        atol=2e-2, rtol=2e-2), err


if __name__ == "__main__":
    key = jax.random.PRNGKey(0)
    k_small, k_big = jax.random.split(key, 2)

    # Small shape consistent with the module (batch=2, seq=8, hidden=32, d_ff=64).
    _run_case(k_small, B=2, S=8, d_model=32, d_ff=64)

    # Second shape exercising multi-sub-block tiles and the masked ragged edge
    # (N = 320 rows is not a multiple of the 384-row tile).
    _run_case(k_big, B=2, S=160, d_model=128, d_ff=512)

    print("KERNEL_OK")
</pallas_src>

<mosaic_0001>
module attributes {stable_mosaic.version = 11 : i64} {
  func.func @ffn_kernel(%arg0: i32, %arg1: memref<128x32xf32, #tpu.memory_space<vmem>>, %arg2: memref<1x32xf32, #tpu.memory_space<vmem>>, %arg3: memref<1x32xf32, #tpu.memory_space<vmem>>, %arg4: memref<32x64xbf16, #tpu.memory_space<vmem>>, %arg5: memref<1x64xf32, #tpu.memory_space<vmem>>, %arg6: memref<64x32xbf16, #tpu.memory_space<vmem>>, %arg7: memref<1x32xf32, #tpu.memory_space<vmem>>, %arg8: memref<128x32xf32, #tpu.memory_space<vmem>>) attributes {dimension_semantics = [#tpu.dimension_semantics<parallel>], iteration_bounds = array<i64: 1>, scalar_prefetch = 0 : i64, scratch_operands = 0 : i64, tpu.core_type = #tpu.core_type<tc>, window_params = [{transform_indices = @transform_0, window_bounds = array<i64: 128, 32>}, {pipeline_mode = #tpu.pipeline_mode<synchronous>, transform_indices = @transform_1, window_bounds = array<i64: 1, 32>}, {pipeline_mode = #tpu.pipeline_mode<synchronous>, transform_indices = @transform_2, window_bounds = array<i64: 1, 32>}, {pipeline_mode = #tpu.pipeline_mode<synchronous>, transform_indices = @transform_3, window_bounds = array<i64: 32, 64>}, {pipeline_mode = #tpu.pipeline_mode<synchronous>, transform_indices = @transform_4, window_bounds = array<i64: 1, 64>}, {pipeline_mode = #tpu.pipeline_mode<synchronous>, transform_indices = @transform_5, window_bounds = array<i64: 64, 32>}, {pipeline_mode = #tpu.pipeline_mode<synchronous>, transform_indices = @transform_6, window_bounds = array<i64: 1, 32>}, {transform_indices = @transform_7, window_bounds = array<i64: 128, 32>}]} {
    %c0 = arith.constant 0 : index
    %c0_0 = arith.constant 0 : index
    %0 = vector.load %arg2[%c0, %c0_0] : memref<1x32xf32, #tpu.memory_space<vmem>>, vector<1x32xf32>
    %c0_1 = arith.constant 0 : index
    %c0_2 = arith.constant 0 : index
    %1 = vector.load %arg3[%c0_1, %c0_2] : memref<1x32xf32, #tpu.memory_space<vmem>>, vector<1x32xf32>
    %c0_3 = arith.constant 0 : index
    %c0_4 = arith.constant 0 : index
    %2 = vector.load %arg5[%c0_3, %c0_4] : memref<1x64xf32, #tpu.memory_space<vmem>>, vector<1x64xf32>
    %3 = arith.truncf %2 : vector<1x64xf32> to vector<1x64xbf16>
    %c0_5 = arith.constant 0 : index
    %c0_6 = arith.constant 0 : index
    %4 = vector.load %arg7[%c0_5, %c0_6] : memref<1x32xf32, #tpu.memory_space<vmem>>, vector<1x32xf32>
    %c0_7 = arith.constant 0 : index
    %c0_8 = arith.constant 0 : index
    %5 = vector.load %arg4[%c0_7, %c0_8] : memref<32x64xbf16, #tpu.memory_space<vmem>>, vector<32x64xbf16>
    %c0_9 = arith.constant 0 : index
    %c0_10 = arith.constant 0 : index
    %6 = vector.load %arg6[%c0_9, %c0_10] : memref<64x32xbf16, #tpu.memory_space<vmem>>, vector<64x32xbf16>
    %c0_11 = arith.constant 0 : index
    %c0_12 = arith.constant 0 : index
    %7 = vector.load %arg1[%c0_11, %c0_12] : memref<128x32xf32, #tpu.memory_space<vmem>>, vector<128x32xf32>
    %cst = arith.constant dense<0.000000e+00> : vector<128xf32>
    %8 = vector.multi_reduction <add>, %7, %cst [1] : vector<128x32xf32> to vector<128xf32>
    %9 = vector.shape_cast %8 : vector<128xf32> to vector<128x1xf32>
    %cst_13 = arith.constant 3.125000e-02 : f32
    %10 = vector.broadcast %cst_13 : f32 to vector<128x1xf32>
    %11 = arith.mulf %9, %10 : vector<128x1xf32>
    %12 = arith.mulf %7, %7 : vector<128x32xf32>
    %cst_14 = arith.constant dense<0.000000e+00> : vector<128xf32>
    %13 = vector.multi_reduction <add>, %12, %cst_14 [1] : vector<128x32xf32> to vector<128xf32>
    %14 = vector.shape_cast %13 : vector<128xf32> to vector<128x1xf32>
    %cst_15 = arith.constant 3.125000e-02 : f32
    %15 = vector.broadcast %cst_15 : f32 to vector<128x1xf32>
    %16 = arith.mulf %14, %15 : vector<128x1xf32>
    %17 = arith.mulf %11, %11 : vector<128x1xf32>
    %18 = arith.subf %16, %17 : vector<128x1xf32>
    %cst_16 = arith.constant 0.000000e+00 : f32
    %19 = vector.broadcast %cst_16 : f32 to vector<128x1xf32>
    %20 = arith.maximumf %18, %19 : vector<128x1xf32>
    %cst_17 = arith.constant 9.99999997E-7 : f32
    %21 = vector.broadcast %cst_17 : f32 to vector<128x1xf32>
    %22 = arith.addf %20, %21 : vector<128x1xf32>
    %23 = math.rsqrt %22 : vector<128x1xf32>
    %24 = vector.broadcast %11 : vector<128x1xf32> to vector<128x32xf32>
    %25 = arith.subf %7, %24 : vector<128x32xf32>
    %26 = vector.broadcast %23 : vector<128x1xf32> to vector<128x32xf32>
    %27 = arith.mulf %25, %26 : vector<128x32xf32>
    %28 = vector.broadcast %0 : vector<1x32xf32> to vector<128x32xf32>
    %29 = arith.mulf %27, %28 : vector<128x32xf32>
    %30 = vector.broadcast %1 : vector<1x32xf32> to vector<128x32xf32>
    %31 = arith.addf %29, %30 : vector<128x32xf32>
    %32 = arith.truncf %31 : vector<128x32xf32> to vector<128x32xbf16>
    %cst_18 = arith.constant dense<0.000000e+00> : vector<128x64xf32>
    %33 = tpu.matmul %32, %5, %cst_18 {dimension_numbers = #tpu.dot_dimension_numbers<[1], [0], [0], [1], [0, 0, 1, 1], [], []>} : vector<128x32xbf16>, vector<32x64xbf16>, vector<128x64xf32> -> vector<128x64xf32>
    %34 = arith.truncf %33 : vector<128x64xf32> to vector<128x64xbf16>
    %35 = vector.broadcast %3 : vector<1x64xbf16> to vector<128x64xbf16>
    %36 = arith.addf %34, %35 : vector<128x64xbf16>
    %cst_19 = arith.constant 5.000000e-01 : bf16
    %37 = vector.broadcast %cst_19 : bf16 to vector<128x64xbf16>
    %38 = arith.mulf %37, %36 : vector<128x64xbf16>
    %39 = arith.mulf %36, %36 : vector<128x64xbf16>
    %40 = arith.mulf %39, %36 : vector<128x64xbf16>
    %cst_20 = arith.constant 4.467770e-02 : bf16
    %41 = vector.broadcast %cst_20 : bf16 to vector<128x64xbf16>
    %42 = arith.mulf %41, %40 : vector<128x64xbf16>
    %43 = arith.addf %36, %42 : vector<128x64xbf16>
    %cst_21 = arith.constant 7.968750e-01 : bf16
    %44 = vector.broadcast %cst_21 : bf16 to vector<128x64xbf16>
    %45 = arith.mulf %44, %43 : vector<128x64xbf16>
    %46 = math.tanh %45 : vector<128x64xbf16>
    %cst_22 = arith.constant 1.000000e+00 : bf16
    %47 = vector.broadcast %cst_22 : bf16 to vector<128x64xbf16>
    %48 = arith.addf %47, %46 : vector<128x64xbf16>
    %49 = arith.mulf %38, %48 : vector<128x64xbf16>
    %cst_23 = arith.constant dense<0.000000e+00> : vector<128x32xf32>
    %50 = tpu.matmul %49, %6, %cst_23 {dimension_numbers = #tpu.dot_dimension_numbers<[1], [0], [0], [1], [0, 0, 1, 1], [], []>} : vector<128x64xbf16>, vector<64x32xbf16>, vector<128x32xf32> -> vector<128x32xf32>
    %51 = vector.broadcast %4 : vector<1x32xf32> to vector<128x32xf32>
    %52 = arith.addf %50, %51 : vector<128x32xf32>
    %53 = arith.addf %52, %7 : vector<128x32xf32>
    %c0_24 = arith.constant 0 : index
    %c0_25 = arith.constant 0 : index
    %54 = vector.load %arg8[%c0_24, %c0_25] : memref<128x32xf32, #tpu.memory_space<vmem>>, vector<128x32xf32>
    tpu.vector_store %arg8[%c0_24, %c0_25], %53 {strides = array<i32>} : memref<128x32xf32, #tpu.memory_space<vmem>>, vector<128x32xf32>,
    return
  }
  func.func @transform_0(%arg0: i32) -> (i32, i32) {
    %c0_i32 = arith.constant 0 : i32
    %c0_i32_0 = arith.constant 0 : i32
    return %arg0, %c0_i32 : i32, i32
  }
  func.func @transform_1(%arg0: i32) -> (i32, i32) {
    %c0_i32 = arith.constant 0 : i32
    %c0_i32_0 = arith.constant 0 : i32
    %c0_i32_1 = arith.constant 0 : i32
    return %c0_i32, %c0_i32_0 : i32, i32
  }
  func.func @transform_2(%arg0: i32) -> (i32, i32) {
    %c0_i32 = arith.constant 0 : i32
    %c0_i32_0 = arith.constant 0 : i32
    %c0_i32_1 = arith.constant 0 : i32
    return %c0_i32, %c0_i32_0 : i32, i32
  }
  func.func @transform_3(%arg0: i32) -> (i32, i32) {
    %c0_i32 = arith.constant 0 : i32
    %c0_i32_0 = arith.constant 0 : i32
    %c0_i32_1 = arith.constant 0 : i32
    return %c0_i32, %c0_i32_0 : i32, i32
  }
  func.func @transform_4(%arg0: i32) -> (i32, i32) {
    %c0_i32 = arith.constant 0 : i32
    %c0_i32_0 = arith.constant 0 : i32
    %c0_i32_1 = arith.constant 0 : i32
    return %c0_i32, %c0_i32_0 : i32, i32
  }
  func.func @transform_5(%arg0: i32) -> (i32, i32) {
    %c0_i32 = arith.constant 0 : i32
    %c0_i32_0 = arith.constant 0 : i32
    %c0_i32_1 = arith.constant 0 : i32
    return %c0_i32, %c0_i32_0 : i32, i32
  }
  func.func @transform_6(%arg0: i32) -> (i32, i32) {
    %c0_i32 = arith.constant 0 : i32
    %c0_i32_0 = arith.constant 0 : i32
    %c0_i32_1 = arith.constant 0 : i32
    return %c0_i32, %c0_i32_0 : i32, i32
  }
  func.func @transform_7(%arg0: i32) -> (i32, i32) {
    %c0_i32 = arith.constant 0 : i32
    %c0_i32_0 = arith.constant 0 : i32
    return %arg0, %c0_i32 : i32, i32
  }
}

module attributes {stable_mosaic.version = 11 : i64} {
  func.func @ffn_kernel(%arg0: i32, %arg1: memref<128x32xf32, #tpu.memory_space<vmem>>, %arg2: memref<1x32xf32, #tpu.memory_space<vmem>>, %arg3: memref<1x32xf32, #tpu.memory_space<vmem>>, %arg4: memref<32x64xbf16, #tpu.memory_space<vmem>>, %arg5: memref<1x64xf32, #tpu.memory_space<vmem>>, %arg6: memref<64x32xbf16, #tpu.memory_space<vmem>>, %arg7: memref<1x32xf32, #tpu.memory_space<vmem>>, %arg8: memref<128x32xf32, #tpu.memory_space<vmem>>) attributes {dimension_semantics = [#tpu.dimension_semantics<parallel>], iteration_bounds = array<i64: 1>, scalar_prefetch = 0 : i64, scratch_operands = 0 : i64, tpu.core_type = #tpu.core_type<tc>, window_params = [{transform_indices = @transform_0, window_bounds = array<i64: 128, 32>}, {pipeline_mode = #tpu.pipeline_mode<synchronous>, transform_indices = @transform_1, window_bounds = array<i64: 1, 32>}, {pipeline_mode = #tpu.pipeline_mode<synchronous>, transform_indices = @transform_2, window_bounds = array<i64: 1, 32>}, {pipeline_mode = #tpu.pipeline_mode<synchronous>, transform_indices = @transform_3, window_bounds = array<i64: 32, 64>}, {pipeline_mode = #tpu.pipeline_mode<synchronous>, transform_indices = @transform_4, window_bounds = array<i64: 1, 64>}, {pipeline_mode = #tpu.pipeline_mode<synchronous>, transform_indices = @transform_5, window_bounds = array<i64: 64, 32>}, {pipeline_mode = #tpu.pipeline_mode<synchronous>, transform_indices = @transform_6, window_bounds = array<i64: 1, 32>}, {transform_indices = @transform_7, window_bounds = array<i64: 128, 32>}]} {
    %c0 = arith.constant 0 : index
    %c0_0 = arith.constant 0 : index
    %0 = vector.load %arg2[%c0, %c0_0] : memref<1x32xf32, #tpu.memory_space<vmem>>, vector<1x32xf32>
    %c0_1 = arith.constant 0 : index
    %c0_2 = arith.constant 0 : index
    %1 = vector.load %arg3[%c0_1, %c0_2] : memref<1x32xf32, #tpu.memory_space<vmem>>, vector<1x32xf32>
    %c0_3 = arith.constant 0 : index
    %c0_4 = arith.constant 0 : index
    %2 = vector.load %arg5[%c0_3, %c0_4] : memref<1x64xf32, #tpu.memory_space<vmem>>, vector<1x64xf32>
    %3 = arith.truncf %2 : vector<1x64xf32> to vector<1x64xbf16>
    %c0_5 = arith.constant 0 : index
    %c0_6 = arith.constant 0 : index
    %4 = vector.load %arg7[%c0_5, %c0_6] : memref<1x32xf32, #tpu.memory_space<vmem>>, vector<1x32xf32>
    %c0_7 = arith.constant 0 : index
    %c0_8 = arith.constant 0 : index
    %5 = vector.load %arg4[%c0_7, %c0_8] : memref<32x64xbf16, #tpu.memory_space<vmem>>, vector<32x64xbf16>
    %c0_9 = arith.constant 0 : index
    %c0_10 = arith.constant 0 : index
    %6 = vector.load %arg6[%c0_9, %c0_10] : memref<64x32xbf16, #tpu.memory_space<vmem>>, vector<64x32xbf16>
    %c0_11 = arith.constant 0 : index
    %c0_12 = arith.constant 0 : index
    %7 = vector.load %arg1[%c0_11, %c0_12] : memref<128x32xf32, #tpu.memory_space<vmem>>, vector<128x32xf32>
    %cst = arith.constant dense<0.000000e+00> : vector<128xf32>
    %8 = vector.multi_reduction <add>, %7, %cst [1] : vector<128x32xf32> to vector<128xf32>
    %9 = vector.shape_cast %8 : vector<128xf32> to vector<128x1xf32>
    %cst_13 = arith.constant 3.125000e-02 : f32
    %10 = vector.broadcast %cst_13 : f32 to vector<128x1xf32>
    %11 = arith.mulf %9, %10 : vector<128x1xf32>
    %12 = arith.mulf %7, %7 : vector<128x32xf32>
    %cst_14 = arith.constant dense<0.000000e+00> : vector<128xf32>
    %13 = vector.multi_reduction <add>, %12, %cst_14 [1] : vector<128x32xf32> to vector<128xf32>
    %14 = vector.shape_cast %13 : vector<128xf32> to vector<128x1xf32>
    %cst_15 = arith.constant 3.125000e-02 : f32
    %15 = vector.broadcast %cst_15 : f32 to vector<128x1xf32>
    %16 = arith.mulf %14, %15 : vector<128x1xf32>
    %17 = arith.mulf %11, %11 : vector<128x1xf32>
    %18 = arith.subf %16, %17 : vector<128x1xf32>
    %cst_16 = arith.constant 0.000000e+00 : f32
    %19 = vector.broadcast %cst_16 : f32 to vector<128x1xf32>
    %20 = arith.maximumf %18, %19 : vector<128x1xf32>
    %cst_17 = arith.constant 9.99999997E-7 : f32
    %21 = vector.broadcast %cst_17 : f32 to vector<128x1xf32>
    %22 = arith.addf %20, %21 : vector<128x1xf32>
    %23 = math.rsqrt %22 : vector<128x1xf32>
    %24 = vector.broadcast %11 : vector<128x1xf32> to vector<128x32xf32>
    %25 = arith.subf %7, %24 : vector<128x32xf32>
    %26 = vector.broadcast %23 : vector<128x1xf32> to vector<128x32xf32>
    %27 = arith.mulf %25, %26 : vector<128x32xf32>
    %28 = vector.broadcast %0 : vector<1x32xf32> to vector<128x32xf32>
    %29 = arith.mulf %27, %28 : vector<128x32xf32>
    %30 = vector.broadcast %1 : vector<1x32xf32> to vector<128x32xf32>
    %31 = arith.addf %29, %30 : vector<128x32xf32>
    %32 = arith.truncf %31 : vector<128x32xf32> to vector<128x32xbf16>
    %cst_18 = arith.constant dense<0.000000e+00> : vector<128x64xf32>
    %33 = tpu.matmul %32, %5, %cst_18 {dimension_numbers = #tpu.dot_dimension_numbers<[1], [0], [0], [1], [0, 0, 1, 1], [], []>} : vector<128x32xbf16>, vector<32x64xbf16>, vector<128x64xf32> -> vector<128x64xf32>
    %34 = arith.truncf %33 : vector<128x64xf32> to vector<128x64xbf16>
    %35 = vector.broadcast %3 : vector<1x64xbf16> to vector<128x64xbf16>
    %36 = arith.addf %34, %35 : vector<128x64xbf16>
    %cst_19 = arith.constant 5.000000e-01 : bf16
    %37 = vector.broadcast %cst_19 : bf16 to vector<128x64xbf16>
    %38 = arith.mulf %37, %36 : vector<128x64xbf16>
    %39 = arith.mulf %36, %36 : vector<128x64xbf16>
    %40 = arith.mulf %39, %36 : vector<128x64xbf16>
    %cst_20 = arith.constant 4.467770e-02 : bf16
    %41 = vector.broadcast %cst_20 : bf16 to vector<128x64xbf16>
    %42 = arith.mulf %41, %40 : vector<128x64xbf16>
    %43 = arith.addf %36, %42 : vector<128x64xbf16>
    %cst_21 = arith.constant 7.968750e-01 : bf16
    %44 = vector.broadcast %cst_21 : bf16 to vector<128x64xbf16>
    %45 = arith.mulf %44, %43 : vector<128x64xbf16>
    %46 = math.tanh %45 : vector<128x64xbf16>
    %cst_22 = arith.constant 1.000000e+00 : bf16
    %47 = vector.broadcast %cst_22 : bf16 to vector<128x64xbf16>
    %48 = arith.addf %47, %46 : vector<128x64xbf16>
    %49 = arith.mulf %38, %48 : vector<128x64xbf16>
    %cst_23 = arith.constant dense<0.000000e+00> : vector<128x32xf32>
    %50 = tpu.matmul %49, %6, %cst_23 {dimension_numbers = #tpu.dot_dimension_numbers<[1], [0], [0], [1], [0, 0, 1, 1], [], []>} : vector<128x64xbf16>, vector<64x32xbf16>, vector<128x32xf32> -> vector<128x32xf32>
    %51 = vector.broadcast %4 : vector<1x32xf32> to vector<128x32xf32>
    %52 = arith.addf %50, %51 : vector<128x32xf32>
    %53 = arith.addf %52, %7 : vector<128x32xf32>
    %c0_24 = arith.constant 0 : index
    %c0_25 = arith.constant 0 : index
    %54 = vector.load %arg8[%c0_24, %c0_25] : memref<128x32xf32, #tpu.memory_space<vmem>>, vector<128x32xf32>
    tpu.vector_store %arg8[%c0_24, %c0_25], %53 {strides = array<i32>} : memref<128x32xf32, #tpu.memory_space<vmem>>, vector<128x32xf32>,
    return
  }
  func.func @transform_0(%arg0: i32) -> (i32, i32) {
    %c0_i32 = arith.constant 0 : i32
    %c0_i32_0 = arith.constant 0 : i32
    return %arg0, %c0_i32 : i32, i32
  }
  func.func @transform_1(%arg0: i32) -> (i32, i32) {
    %c0_i32 = arith.constant 0 : i32
    %c0_i32_0 = arith.constant 0 : i32
    %c0_i32_1 = arith.constant 0 : i32
    return %c0_i32, %c0_i32_0 : i32, i32
  }
  func.func @transform_2(%arg0: i32) -> (i32, i32) {
    %c0_i32 = arith.constant 0 : i32
    %c0_i32_0 = arith.constant 0 : i32
    %c0_i32_1 = arith.constant 0 : i32
    return %c0_i32, %c0_i32_0 : i32, i32
  }
  func.func @transform_3(%arg0: i32) -> (i32, i32) {
    %c0_i32 = arith.constant 0 : i32
    %c0_i32_0 = arith.constant 0 : i32
    %c0_i32_1 = arith.constant 0 : i32
    return %c0_i32, %c0_i32_0 : i32, i32
  }
  func.func @transform_4(%arg0: i32) -> (i32, i32) {
    %c0_i32 = arith.constant 0 : i32
    %c0_i32_0 = arith.constant 0 : i32
    %c0_i32_1 = arith.constant 0 : i32
    return %c0_i32, %c0_i32_0 : i32, i32
  }
  func.func @transform_5(%arg0: i32) -> (i32, i32) {
    %c0_i32 = arith.constant 0 : i32
    %c0_i32_0 = arith.constant 0 : i32
    %c0_i32_1 = arith.constant 0 : i32
    return %c0_i32, %c0_i32_0 : i32, i32
  }
  func.func @transform_6(%arg0: i32) -> (i32, i32) {
    %c0_i32 = arith.constant 0 : i32
    %c0_i32_0 = arith.constant 0 : i32
    %c0_i32_1 = arith.constant 0 : i32
    return %c0_i32, %c0_i32_0 : i32, i32
  }
  func.func @transform_7(%arg0: i32) -> (i32, i32) {
    %c0_i32 = arith.constant 0 : i32
    %c0_i32_0 = arith.constant 0 : i32
    return %arg0, %c0_i32 : i32, i32
  }
}

</mosaic_0001>

<bundles_post_ra>
// kernel: tpu_custom_call.1
= control target key start
LH: loop header
LB: loop body
LE: loop exit
PB: predicated region body
PF: predicated region fallthrough
CT: control target
= control target key end

     0   :  { %vm61_vm0 = vcmask 261120   ;;  %s2266_s0 = inlined_call_operand.vmem [shape: f32[16,32], index: 0, kind: input, shape index: {}]   ;;  %s2267_s1 = inlined_call_operand.vmem [shape: f32[1,32], index: 1, kind: input, shape index: {}]   ;;  %s2268_s2 = inlined_call_operand.vmem [shape: f32[1,32], index: 2, kind: input, shape index: {}]   ;;  %s2269_s3 = inlined_call_operand.vmem [shape: bf16[32,64], index: 3, kind: input, shape index: {}]   ;;  %s2270_s4 = inlined_call_operand.vmem [shape: f32[1,64], index: 4, kind: input, shape index: {}]   ;;  %s2271_s5 = inlined_call_operand.vmem [shape: bf16[64,32], index: 5, kind: input, shape index: {}]   ;;  %s2272_s6 = inlined_call_operand.vmem [shape: f32[1,32], index: 6, kind: input, shape index: {}]   ;;  %s2273_s7 = inlined_call_operand.hbm [shape: f32[16,32], index: 7, kind: output, shape index: {}]  }
   0x1   :  { %v1447_v0 = vld [vmem:[%s2266_s0] sm:$0xff]  ;;  %v1452_v1 = vld [vmem:[%s2266_s0 + $0x10] sm:$0xff]  ;;  %v1463_v5 = vld [vmem:[%s2266_s0 + $0x8] sm:$0xff] }
   0x2   :  { %v62_v2 = vsel %vm61_vm0, %v1447_v0, 0.0  ;;  %v68_v3 = vsel %vm61_vm0, %v1452_v1, 0.0  ;;  %v126_v4 = vmul.f32 %v1447_v0, %v1447_v0 }
   0x3   :  { %63 = vadd.xlane.f32.xlu0 %v62_v2  ;;  %69 = vadd.xlane.f32.xlu2 %v68_v3 }
   0x4   :  { %12 = vsyncpa [#allocation3], 0  ;;  %v142_v6 = vsel %vm61_vm0, %v126_v4, 0.0  ;;  %v1469_v7 = vld [vmem:[%s2266_s0 + $0x18] sm:$0xff]  ;;  %v127_v8 = vmul.f32 %v1463_v5, %v1463_v5  ;;  %v65_v9 = vsel %vm61_vm0, %v1463_v5, 0.0  ;;  %v128_v12 = vmul.f32 %v1452_v1, %v1452_v1  ;;  %v1483_v13 = vld [vmem:[%s2266_s0 + $0x20] sm:$0xff] }
   0x5   :  { %143 = vadd.xlane.f32.xlu1 %v142_v6  ;;  %v71_v10 = vsel %vm61_vm0, %v1469_v7, 0.0  ;;  %v129_v14 = vmul.f32 %v1469_v7, %v1469_v7  ;;  %v74_v16 = vsel %vm61_vm0, %v1483_v13, 0.0  ;;  %v1493_v17 = vld [vmem:[%s2266_s0 + $0x28] sm:$0xff]  ;;  %v130_v20 = vmul.f32 %v1483_v13, %v1483_v13  ;;  %v1506_v23 = vld [vmem:[%s2266_s0 + $0x30] sm:$0xff]  ;;  %v1514_v26 = vld [vmem:[%s2266_s0 + $0x38] sm:$0xff] }
   0x6   :  { %v145_v11 = vsel %vm61_vm0, %v127_v8, 0.0  ;;  %v148_v15 = vsel %vm61_vm0, %v128_v12, 0.0  ;;  %v131_v19 = vmul.f32 %v1493_v17, %v1493_v17  ;;  %v77_v21 = vsel %vm61_vm0, %v1493_v17, 0.0  ;;  %v1526_v31 = vld [vmem:[%s2266_s0 + $0x48] sm:$0xff]  ;;  %v1531_v32 = vld [vmem:[%s2266_s0 + $0x40] sm:$0xff]  ;;  %v1543_v37 = vld [vmem:[%s2266_s0 + $0x50] sm:$0xff] }
   0x7   :  { %v151_v18 = vsel %vm61_vm0, %v129_v14, 0.0  ;;  %v154_v24 = vsel %vm61_vm0, %v130_v20, 0.0  ;;  %v132_v25 = vmul.f32 %v1506_v23, %v1506_v23  ;;  %v80_v27 = vsel %vm61_vm0, %v1506_v23, 0.0  ;;  %v1553_v41 = vld [vmem:[%s2266_s0 + $0x58] sm:$0xff]  ;;  %v1567_v48 = vld [vmem:[%s2266_s0 + $0x60] sm:$0xff]  ;;  %v1574_v50 = vld [vmem:[%s2266_s0 + $0x68] sm:$0xff] }
   0x8   :  { %v157_v22 = vsel %vm61_vm0, %v131_v19, 0.0  ;;  %v83_v29 = vsel %vm61_vm0, %v1514_v26, 0.0  ;;  %v133_v30 = vmul.f32 %v1514_v26, %v1514_v26  ;;  %v89_v34 = vsel %vm61_vm0, %v1526_v31, 0.0  ;;  %v1586_v55 = vld [vmem:[%s2266_s0 + $0x78] sm:$0xff]  ;;  %v1591_v56 = vld [vmem:[%s2266_s0 + $0x70] sm:$0xff]  ;;  %v1277_v20 = vld [vmem:[%s2269_s3] sm:$0xff] }
   0x9   :  { %v160_v28 = vsel %vm61_vm0, %v132_v25, 0.0  ;;  %v86_v35 = vsel %vm61_vm0, %v1531_v32, 0.0  ;;  %v134_v36 = vmul.f32 %v1531_v32, %v1531_v32  ;;  %v135_v38 = vmul.f32 %v1526_v31, %v1526_v31 }
   0xa   :  { %v163_v33 = vsel %vm61_vm0, %v133_v30, 0.0  ;;  %v92_v40 = vsel %vm61_vm0, %v1543_v37, 0.0  ;;  %v137_v43 = vmul.f32 %v1553_v41, %v1553_v41  ;;  %v136_v44 = vmul.f32 %v1543_v37, %v1543_v37 }
   0xb   :  { %66 = vadd.xlane.f32.xlu0 %v65_v9  ;;  %72 = vadd.xlane.f32.xlu2 %v71_v10  ;;  %v166_v39 = vsel %vm61_vm0, %v134_v36, 0.0  ;;  %v169_v42 = vsel %vm61_vm0, %v135_v38, 0.0  ;;  %v95_v45 = vsel %vm61_vm0, %v1553_v41, 0.0  ;;  %v138_v49 = vmul.f32 %v1567_v48, %v1567_v48 }
   0xc   :  { %v175_v46 = vsel %vm61_vm0, %v137_v43, 0.0  ;;  %v172_v47 = vsel %vm61_vm0, %v136_v44, 0.0  ;;  %v98_v51 = vsel %vm61_vm0, %v1567_v48, 0.0  ;;  %v101_v53 = vsel %vm61_vm0, %v1574_v50, 0.0 }
   0xd   :  { %146 = vadd.xlane.f32.xlu1 %v145_v11  ;;  %v178_v52 = vsel %vm61_vm0, %v138_v49, 0.0  ;;  %v139_v54 = vmul.f32 %v1574_v50, %v1574_v50  ;;  %v107_v58 = vsel %vm61_vm0, %v1586_v55, 0.0  ;;  %v104_v59 = vsel %vm61_vm0, %v1591_v56, 0.0  ;;  %v1278_v11 = vld [vmem:[%s2269_s3 + $0x8] sm:$0xff] }
   0xe   :  { %v140_v60 = vmul.f32 %v1591_v56, %v1591_v56  ;;  %v141_v61 = vmul.f32 %v1586_v55, %v1586_v55  ;;  %550 = vmatpush.bf16.msra.mxu0 %v1278_v11  ;;  %1283 = vmatpush.bf16.msra.mxu3 %v1278_v11 }
   0xf   :  { %v181_v57 = vsel %vm61_vm0, %v139_v54, 0.0 }
  0x10   :  { %v184_v62 = vsel %vm61_vm0, %v140_v60, 0.0  ;;  %v187_v63 = vsel %vm61_vm0, %v141_v61, 0.0 }
  0x12   :  { %551 = vmatpush.bf16.msra.mxu0 %v1277_v20  ;;  %1284 = vmatpush.bf16.msra.mxu3 %v1277_v20 }
  0x13   :  { %149 = vadd.xlane.f32.xlu0 %v148_v15  ;;  %75 = vadd.xlane.f32.xlu2 %v74_v16 }
  0x15   :  { %152 = vadd.xlane.f32.xlu1 %v151_v18 }
  0x1b   :  { %78 = vadd.xlane.f32.xlu0 %v77_v21  ;;  %158 = vadd.xlane.f32.xlu2 %v157_v22 }
  0x1d   :  { %155 = vadd.xlane.f32.xlu1 %v154_v24 }
  0x23   :  { %81 = vadd.xlane.f32.xlu0 %v80_v27  ;;  %161 = vadd.xlane.f32.xlu2 %v160_v28 }
  0x25   :  { %84 = vadd.xlane.f32.xlu1 %v83_v29 }
  0x2b   :  { %164 = vadd.xlane.f32.xlu0 %v163_v33  ;;  %90 = vadd.xlane.f32.xlu2 %v89_v34 }
  0x2d   :  { %87 = vadd.xlane.f32.xlu1 %v86_v35 }
  0x33   :  { %167 = vadd.xlane.f32.xlu0 %v166_v39  ;;  %93 = vadd.xlane.f32.xlu2 %v92_v40 }
  0x35   :  { %170 = vadd.xlane.f32.xlu1 %v169_v42 }
  0x3b   :  { %96 = vadd.xlane.f32.xlu0 %v95_v45  ;;  %176 = vadd.xlane.f32.xlu2 %v175_v46 }
  0x3d   :  { %173 = vadd.xlane.f32.xlu1 %v172_v47 }
  0x43   :  { %99 = vadd.xlane.f32.xlu0 %v98_v51  ;;  %179 = vadd.xlane.f32.xlu2 %v178_v52 }
  0x45   :  { %102 = vadd.xlane.f32.xlu1 %v101_v53 }
  0x4b   :  { %182 = vadd.xlane.f32.xlu0 %v181_v57  ;;  %108 = vadd.xlane.f32.xlu2 %v107_v58 }
  0x4d   :  { %105 = vadd.xlane.f32.xlu1 %v104_v59 }
  0x53   :  { %185 = vadd.xlane.f32.xlu0 %v184_v62 }
  0x55   :  { %188 = vadd.xlane.f32.xlu1 %v187_v63 }
  0x76   :  { %v64_v2 = vpop.xlane.xlu0 %63  ;;  %v70_v3 = vpop.xlane.xlu2 %69 }
  0x77   :  { %v1604_v4 = vmul.f32 0.03125, %v64_v2  ;;  %v1616_v21 = vmul.f32 0.03125, %v70_v3 }
  0x78   :  { %v144_v6 = vpop.xlane.xlu1 %143 }
  0x79   :  { %v206_v8 = vmul.f32 %v1604_v4, %v1604_v4  ;;  %v190_v9 = vmul.f32 0.03125, %v144_v6  ;;  %v208_v28 = vmul.f32 %v1616_v21, %v1616_v21 }
  0x7b   :  { %v222_v10 = vsub.f32 %v190_v9, %v206_v8 }
  0x7d   :  { %v238_v12 = vmax.f32 %v222_v10, 0.0 }
  0x7e   :  { %v67_v14 = vpop.xlane.xlu0 %66  ;;  %v73_v15 = vpop.xlane.xlu2 %72 }
  0x7f   :  { %v1611_v16 = vmul.f32 0.03125, %v67_v14  ;;  %v254_v18 = vadd.f32 1e-06, %v238_v12  ;;  %v1620_v25 = vmul.f32 0.03125, %v73_v15 }
  0x80   :  { %v147_v19 = vpop.xlane.xlu1 %146 }
  0x81   :  { %v207_v22 = vmul.f32 %v1611_v16, %v1611_v16  ;;  %1295 = vrsqrt.f32 %v254_v18  ;;  %v191_v24 = vmul.f32 0.03125, %v147_v19  ;;  %v209_v36 = vmul.f32 %v1620_v25, %v1620_v25 }
  0x82   :  { %vm276_vm2 = vweird.f32 %v254_v18 }
  0x83   :  { %v223_v27 = vsub.f32 %v191_v24, %v207_v22 }
  0x85   :  { %v239_v29 = vmax.f32 %v223_v27, 0.0 }
  0x86   :  { %v150_v30 = vpop.xlane.xlu0 %149  ;;  %v76_v33 = vpop.xlane.xlu2 %75 }
  0x87   :  { %v192_v34 = vmul.f32 0.03125, %v150_v30  ;;  %v1296_v35 = vpop.eup %1295  ;;  %v255_v38 = vadd.f32 1e-06, %v239_v29  ;;  %v1626_v46 = vmul.f32 0.03125, %v76_v33 }
  0x88   :  { %v153_v39 = vpop.xlane.xlu1 %152  ;;  %v271_v40 = vmul.f32 %v1296_v35, %v254_v18  ;;  %vm277_vm1 = vweird.f32 %v1296_v35 }
  0x89   :  { %v224_v42 = vsub.f32 %v192_v34, %v208_v28  ;;  %1297 = vrsqrt.f32 %v255_v38  ;;  %v193_v43 = vmul.f32 0.03125, %v153_v39  ;;  %v210_v60 = vmul.f32 %v1626_v46, %v1626_v46  ;;  %vm1642_vm3 = vmor %vm276_vm2, %vm277_vm1 }
  0x8a   :  { %v272_v44 = vmul.f32 %v1296_v35, %v271_v40  ;;  %v430_v34 = vsub.f32 %v1447_v0, %v1604_v4  ;;  %vm286_vm5 = vweird.f32 %v255_v38  ;;  %v1668_v0 = vld [vmem:[%s2267_s1] ss:$0 sm:$0xff] }
  0x8b   :  { %v240_v45 = vmax.f32 %v224_v42, 0.0  ;;  %v225_v47 = vsub.f32 %v193_v43, %v209_v36 }
  0x8c   :  { %v273_v49 = vmul.f32 0.5, %v272_v44 }
  0x8d   :  { %v1628_v51 = vadd.f32 1e-06, %v240_v45  ;;  %v241_v52 = vmax.f32 %v225_v47, 0.0 }
  0x8e   :  { %v79_v53 = vpop.xlane.xlu0 %78  ;;  %v159_v54 = vpop.xlane.xlu2 %158  ;;  %v274_v57 = vsub.f32 1.5, %v273_v49 }
  0x8f   :  { %1299 = vrsqrt.f32 %v1628_v51  ;;  %v1631_v58 = vmul.f32 0.03125, %v79_v53  ;;  %v1298_v59 = vpop.eup %1297  ;;  %v1635_v61 = vadd.f32 1e-06, %v241_v52  ;;  %v195_v62 = vmul.f32 0.03125, %v159_v54 }
  0x90   :  { %v156_v63 = vpop.xlane.xlu1 %155  ;;  %v281_v2 = vmul.f32 %v1298_v59, %v255_v38  ;;  %v275_v8 = vmul.f32 %v1296_v35, %v274_v57  ;;  %vm287_vm4 = vweird.f32 %v1298_v59  ;;  %v431_v38 = vsub.f32 %v1463_v5, %v1611_v16 }
  0x91   :  { %v211_v3 = vmul.f32 %v1631_v58, %v1631_v58  ;;  %1301 = vrsqrt.f32 %v1635_v61  ;;  %v194_v6 = vmul.f32 0.03125, %v156_v63  ;;  %vm288_vm6 = vmor %vm286_vm5, %vm287_vm4  ;;  %vm296_vm7 = vweird.f32 %v1628_v51 }
  0x92   :  { %v282_v9 = vmul.f32 %v1298_v59, %v281_v2  ;;  %v279_v18 = vsel %vm1642_vm3, %v1296_v35, %v275_v8  ;;  %vm306_vm8 = vweird.f32 %v1635_v61 }
  0x93   :  { %v227_v10 = vsub.f32 %v195_v62, %v211_v3  ;;  %v226_v11 = vsub.f32 %v194_v6, %v210_v60  ;;  %v446_v35 = vmul.f32 %v430_v34, %v279_v18  ;;  %v1683_v3 = vld [vmem:[%s2268_s2] ss:$0 sm:$0xff] }
  0x94   :  { %v283_v14 = vmul.f32 0.5, %v282_v9 }
  0x95   :  { %v1640_v12 = vpop.eup %1299  ;;  %v243_v15 = vmax.f32 %v227_v10, 0.0  ;;  %v242_v22 = vmax.f32 %v226_v11, 0.0  ;;  %v465_v2 = vmul.f32 %v1668_v0, %v446_v35 }
  0x96   :  { %v291_v20 = vmul.f32 %v1640_v12, %v1628_v51  ;;  %v82_v24 = vpop.xlane.xlu0 %81  ;;  %v162_v27 = vpop.xlane.xlu2 %161  ;;  %v284_v28 = vsub.f32 1.5, %v283_v14  ;;  %vm297_vm9 = vweird.f32 %v1640_v12  ;;  %v433_v51 = vsub.f32 %v1469_v7, %v1620_v25 }
  0x97   :  { %v1648_v29 = vadd.f32 1e-06, %v243_v15  ;;  %v1650_v30 = vmul.f32 0.03125, %v82_v24  ;;  %v1654_v33 = vpop.eup %1301  ;;  %v1659_v39 = vadd.f32 1e-06, %v242_v22  ;;  %v196_v44 = vmul.f32 0.03125, %v162_v27  ;;  %vm1712_vm11 = vmor %vm296_vm7, %vm297_vm9 }
  0x98   :  { %v292_v36 = vmul.f32 %v1640_v12, %v291_v20  ;;  %v85_v40 = vpop.xlane.xlu1 %84  ;;  %v285_v42 = vmul.f32 %v1298_v59, %v284_v28  ;;  %v301_v43 = vmul.f32 %v1654_v33, %v1635_v61  ;;  %vm307_vm10 = vweird.f32 %v1654_v33 }
  0x99   :  { %1303 = vrsqrt.f32 %v1648_v29  ;;  %v212_v47 = vmul.f32 %v1650_v30, %v1650_v30  ;;  %v1673_v49 = vmul.f32 0.03125, %v85_v40  ;;  %v484_v22 = vadd.f32 %v1683_v3, %v465_v2  ;;  %vm1719_vm12 = vmor %vm306_vm8, %vm307_vm10 }
  0x9a   :  { %1305 = vrsqrt.f32 %v1659_v39  ;;  %v293_v4 = vmul.f32 0.5, %v292_v36  ;;  %v302_v45 = vmul.f32 %v1654_v33, %v301_v43  ;;  %v289_v52 = vsel %vm288_vm6, %v1298_v59, %v285_v42 }
  0x9b   :  { %v228_v54 = vsub.f32 %v196_v44, %v212_v47  ;;  %v213_v57 = vmul.f32 %v1673_v49, %v1673_v49  ;;  %v447_v63 = vmul.f32 %v431_v38, %v289_v52  ;;  %vm326_vm13 = vweird.f32 %v1648_v29 }
  0x9c   :  { %v303_v53 = vmul.f32 0.5, %v302_v45  ;;  %v294_v8 = vsub.f32 1.5, %v293_v4  ;;  %vm316_vm15 = vweird.f32 %v1659_v39 }
  0x9d   :  { %v244_v16 = vmax.f32 %v228_v54, 0.0  ;;  %v466_v11 = vmul.f32 %v1668_v0, %v447_v63 }
  0x9e   :  { %v165_v60 = vpop.xlane.xlu0 %164  ;;  %v91_v62 = vpop.xlane.xlu2 %90  ;;  %v304_v5 = vsub.f32 1.5, %v303_v53  ;;  %v295_v24 = vmul.f32 %v1640_v12, %v294_v8 }
  0x9f   :  { %v1685_v6 = vpop.eup %1303  ;;  %v197_v59 = vmul.f32 0.03125, %v165_v60  ;;  %v1696_v19 = vadd.f32 1e-06, %v244_v16  ;;  %v1704_v18 = vmul.f32 0.03125, %v91_v62  ;;  %v485_v40 = vadd.f32 %v1683_v3, %v466_v11 }
  0xa0   :  { %v1687_v9 = vpop.eup %1305  ;;  %v88_v10 = vpop.xlane.xlu1 %87  ;;  %v321_v14 = vmul.f32 %v1685_v6, %v1648_v29  ;;  %v305_v27 = vmul.f32 %v1654_v33, %v304_v5  ;;  %v299_v52 = vsel %vm1712_vm11, %v1640_v12, %v295_v24  ;;  %vm327_vm14 = vweird.f32 %v1685_v6 }
  0xa1   :  { %v311_v15 = vmul.f32 %v1687_v9, %v1659_v39  ;;  %v229_v20 = vsub.f32 %v197_v59, %v213_v57  ;;  %1307 = vrsqrt.f32 %v1696_v19  ;;  %v1707_v36 = vmul.f32 0.03125, %v88_v10  ;;  %vm1768_vm2 = vmor %vm326_vm13, %vm327_vm14 }
  0xa2   :  { %v322_v43 = vmul.f32 %v1685_v6, %v321_v14  ;;  %v500_v4 = vpack.c.bf16 %v485_v40, %v484_v22  ;;  %v215_v38 = vmul.f32 %v1704_v18, %v1704_v18  ;;  %v309_v61 = vsel %vm1719_vm12, %v1654_v33, %v305_v27 }
  0xa3   :  { %v312_v28 = vmul.f32 %v1687_v9, %v311_v15  ;;  %v245_v34 = vmax.f32 %v229_v20, 0.0  ;;  %v214_v54 = vmul.f32 %v1707_v36, %v1707_v36  ;;  %v432_v57 = vsub.f32 %v1452_v1, %v1616_v21 }
  0xa4   :  { %1245 = vmatmul.msk.bf16.vlgmr.msra.gmra.mxu0 %vm61_vm0, %v500_v4  ;;  %v323_v60 = vmul.f32 0.5, %v322_v43  ;;  %v449_v63 = vmul.f32 %v433_v51, %v309_v61  ;;  %vm317_vm1 = vweird.f32 %v1687_v9  ;;  %vm336_vm4 = vweird.f32 %v1696_v19 }
  0xa5   :  { %v1723_v35 = vadd.f32 1e-06, %v245_v34  ;;  %v313_v53 = vmul.f32 0.5, %v312_v28  ;;  %v448_v33 = vmul.f32 %v432_v57, %v299_v52  ;;  %vm1781_vm3 = vmor %vm316_vm15, %vm317_vm1 }
  0xa6   :  { %v168_v45 = vpop.xlane.xlu0 %167  ;;  %v94_v47 = vpop.xlane.xlu2 %93  ;;  %v324_v59 = vsub.f32 1.5, %v323_v60  ;;  %v468_v14 = vmul.f32 %v1668_v0, %v449_v63  ;;  %v435_v60 = vsub.f32 %v1493_v17, %v1631_v58 }
  0xa7   :  { %1309 = vrsqrt.f32 %v1723_v35  ;;  %v198_v7 = vmul.f32 0.03125, %v168_v45  ;;  %v1741_v62 = vpop.eup %1307  ;;  %v1743_v2 = vmul.f32 0.03125, %v94_v47  ;;  %v314_v8 = vsub.f32 1.5, %v313_v53 }
  0xa8   :  { %v171_v25 = vpop.xlane.xlu1 %170  ;;  %v331_v10 = vmul.f32 %v1741_v62, %v1696_v19  ;;  %v467_v22 = vmul.f32 %v1668_v0, %v448_v33  ;;  %v325_v42 = vmul.f32 %v1685_v6, %v324_v59  ;;  %v487_v51 = vadd.f32 %v1683_v3, %v468_v14 }
  0xa9   :  { %v199_v12 = vmul.f32 0.03125, %v171_v25  ;;  %v230_v5 = vsub.f32 %v198_v7, %v214_v54  ;;  %v216_v15 = vmul.f32 %v1743_v2, %v1743_v2  ;;  %v315_v24 = vmul.f32 %v1687_v9, %v314_v8 }
  0xaa   :  { %v332_v43 = vmul.f32 %v1741_v62, %v331_v10  ;;  %v486_v7 = vadd.f32 %v1683_v3, %v467_v22  ;;  %v329_v57 = vsel %vm1768_vm2, %v1685_v6, %v325_v42  ;;  %vm337_vm5 = vweird.f32 %v1741_v62 }
  0xab   :  { %v231_v16 = vsub.f32 %v199_v12, %v215_v38  ;;  %v246_v27 = vmax.f32 %v230_v5, 0.0  ;;  %v434_v38 = vsub.f32 %v1483_v13, %v1626_v46  ;;  %v319_v13 = vsel %vm1781_vm3, %v1687_v9, %v315_v24  ;;  %vm1827_vm6 = vmor %vm336_vm4, %vm337_vm5 }
  0xac   :  { %v333_v46 = vmul.f32 0.5, %v332_v43  ;;  %v501_v63 = vpack.c.bf16 %v487_v51, %v486_v7  ;;  %v451_v17 = vmul.f32 %v435_v60, %v329_v57  ;;  %v436_v19 = vsub.f32 %v1506_v23, %v1650_v30 }
  0xad   :  { %v1747_v11 = vpop.eup %1309  ;;  %v247_v20 = vmax.f32 %v231_v16, 0.0  ;;  %v1787_v53 = vadd.f32 1e-06, %v246_v27  ;;  %v450_v16 = vmul.f32 %v434_v38, %v319_v13  ;;  %vm346_vm7 = vweird.f32 %v1723_v35 }
  0xae   :  { %v97_v1 = vpop.xlane.xlu0 %96  ;;  %v177_v21 = vpop.xlane.xlu2 %176  ;;  %v341_v44 = vmul.f32 %v1747_v11, %v1723_v35  ;;  %v334_v58 = vsub.f32 1.5, %v333_v46  ;;  %v470_v22 = vmul.f32 %v1668_v0, %v451_v17  ;;  %vm347_vm8 = vweird.f32 %v1747_v11 }
  0xaf   :  { %v1758_v28 = vmul.f32 0.03125, %v97_v1  ;;  %v201_v34 = vmul.f32 0.03125, %v177_v21  ;;  %v1785_v29 = vadd.f32 1e-06, %v247_v20  ;;  %v440_v51 = vsub.f32 %v1543_v37, %v1743_v2  ;;  %vm1859_vm9 = vmor %vm346_vm7, %vm347_vm8 }
  0xb0   :  { %v174_v40 = vpop.xlane.xlu1 %173  ;;  %v342_v25 = vmul.f32 %v1747_v11, %v341_v44  ;;  %v335_v27 = vmul.f32 %v1741_v62, %v334_v58  ;;  %v437_v44 = vsub.f32 %v1514_v26, %v1673_v49  ;;  %vm356_vm15 = vweird.f32 %v1787_v53 }
  0xb1   :  { %v200_v4 = vmul.f32 0.03125, %v174_v40  ;;  %v217_v47 = vmul.f32 %v1758_v28, %v1758_v28  ;;  %1311 = vrsqrt.f32 %v1785_v29  ;;  %vm366_vm2 = vweird.f32 %v1785_v29 }
  0xb2   :  { %1313 = vrsqrt.f32 %v1787_v53  ;;  %v343_v1 = vmul.f32 0.5, %v342_v25 }
  0xb3   :  { %v232_v61 = vsub.f32 %v200_v4, %v216_v15  ;;  %v233_v54 = vsub.f32 %v201_v34, %v217_v47  ;;  %v469_v15 = vmul.f32 %v1668_v0, %v450_v16 }
  0xb4   :  { %1246 = vmatmul.msk.bf16.gmra.mxu0 %vm61_vm0, %v501_v63  ;;  %v344_v34 = vsub.f32 1.5, %v343_v1 }
  0xb5   :  { %v248_v39 = vmax.f32 %v232_v61, 0.0  ;;  %v249_v12 = vmax.f32 %v233_v54, 0.0  ;;  %v488_v23 = vadd.f32 %v1683_v3, %v469_v15  ;;  %v489_v61 = vadd.f32 %v1683_v3, %v470_v22 }
  0xb6   :  { %v100_v33 = vpop.xlane.xlu0 %99  ;;  %v180_v8 = vpop.xlane.xlu2 %179  ;;  %v345_v13 = vmul.f32 %v1747_v11, %v344_v34 }
  0xb7   :  { %v1800_v5 = vadd.f32 1e-06, %v248_v39  ;;  %v1802_v9 = vmul.f32 0.03125, %v100_v33  ;;  %v1805_v59 = vadd.f32 1e-06, %v249_v12  ;;  %v202_v6 = vmul.f32 0.03125, %v180_v8  ;;  %v1818_v24 = vpop.eup %1311 }
  0xb8   :  { %v103_v10 = vpop.xlane.xlu1 %102  ;;  %v1823_v42 = vpop.eup %1313  ;;  %v361_v52 = vmul.f32 %v1818_v24, %v1785_v29  ;;  %v339_v39 = vsel %vm1827_vm6, %v1741_v62, %v335_v27  ;;  %v349_v17 = vsel %vm1859_vm9, %v1747_v11, %v345_v13  ;;  %v502_v1 = vpack.c.bf16 %v489_v61, %v488_v23 }
  0xb9   :  { %1315 = vrsqrt.f32 %v1800_v5  ;;  %v218_v21 = vmul.f32 %v1802_v9, %v1802_v9  ;;  %v1814_v14 = vmul.f32 0.03125, %v103_v10  ;;  %v351_v60 = vmul.f32 %v1823_v42, %v1787_v53 }
  0xba   :  { %1317 = vrsqrt.f32 %v1805_v59  ;;  %vm376_vm10 = vweird.f32 %v1800_v5  ;;  %v362_v35 = vmul.f32 %v1818_v24, %v361_v52  ;;  %vm386_vm11 = vweird.f32 %v1805_v59 }
  0xbb   :  { %v234_v20 = vsub.f32 %v202_v6, %v218_v21  ;;  %v219_v40 = vmul.f32 %v1814_v14, %v1814_v14  ;;  %v352_v43 = vmul.f32 %v1823_v42, %v351_v60  ;;  %vm357_vm3 = vweird.f32 %v1823_v42 }
  0xbc   :  { %v363_v23 = vmul.f32 0.5, %v362_v35  ;;  %vm367_vm6 = vweird.f32 %v1818_v24 }
  0xbd   :  { %v250_v4 = vmax.f32 %v234_v20, 0.0  ;;  %v452_v20 = vmul.f32 %v436_v19, %v339_v39  ;;  %v441_v19 = vsub.f32 %v1553_v41, %v1758_v28 }
  0xbe   :  { %v183_v45 = vpop.xlane.xlu0 %182  ;;  %v109_v7 = vpop.xlane.xlu2 %108 }
  0xbf   :  { %v1834_v47 = vpop.eup %1315  ;;  %v203_v38 = vmul.f32 0.03125, %v183_v45  ;;  %v1846_v49 = vadd.f32 1e-06, %v250_v4  ;;  %v1871_v8 = vmul.f32 0.03125, %v109_v7 }
  0xc0   :  { %v1840_v30 = vpop.eup %1317  ;;  %v371_v26 = vmul.f32 %v1834_v47, %v1800_v5  ;;  %v106_v54 = vpop.xlane.xlu1 %105  ;;  %vm377_vm12 = vweird.f32 %v1834_v47 }
  0xc1   :  { %v381_v46 = vmul.f32 %v1840_v30, %v1805_v59  ;;  %v235_v25 = vsub.f32 %v203_v38, %v219_v40  ;;  %1319 = vrsqrt.f32 %v1846_v49  ;;  %v1867_v63 = vmul.f32 0.03125, %v106_v54  ;;  %vm1886_vm14 = vmor %vm376_vm10, %vm377_vm12 }
  0xc2   :  { %v372_v12 = vmul.f32 %v1834_v47, %v371_v26  ;;  %vm387_vm13 = vweird.f32 %v1840_v30  ;;  %v221_v34 = vmul.f32 %v1871_v8, %v1871_v8  ;;  %v453_v38 = vmul.f32 %v437_v44, %v349_v17  ;;  %vm1947_vm10 = vmor %vm356_vm15, %vm357_vm3 }
  0xc3   :  { %v382_v33 = vmul.f32 %v1840_v30, %v381_v46  ;;  %v251_v62 = vmax.f32 %v235_v25, 0.0  ;;  %v220_v21 = vmul.f32 %v1867_v63, %v1867_v63  ;;  %vm1903_vm1 = vmor %vm386_vm11, %vm387_vm13  ;;  %v471_v26 = vmul.f32 %v1668_v0, %v452_v20 }
  0xc4   :  { %v373_v16 = vmul.f32 0.5, %v372_v12  ;;  %1247 = vmatmul.msk.bf16.gmra.mxu0 %vm61_vm0, %v502_v1  ;;  %v353_v46 = vmul.f32 0.5, %v352_v43  ;;  %v472_v39 = vmul.f32 %v1668_v0, %v453_v38  ;;  %v364_v12 = vsub.f32 1.5, %v363_v23  ;;  %vm1955_vm11 = vmor %vm366_vm2, %vm367_vm6 }
  0xc5   :  { %v383_v6 = vmul.f32 0.5, %v382_v33  ;;  %v1877_v10 = vadd.f32 1e-06, %v251_v62  ;;  %vm396_vm4 = vweird.f32 %v1846_v49  ;;  %v490_v53 = vadd.f32 %v1683_v3, %v471_v26 }
  0xc6   :  { %v374_v58 = vsub.f32 1.5, %v373_v16  ;;  %v186_v15 = vpop.xlane.xlu0 %185 }
  0xc7   :  { %v384_v22 = vsub.f32 1.5, %v383_v6  ;;  %1321 = vrsqrt.f32 %v1877_v10  ;;  %v204_v11 = vmul.f32 0.03125, %v186_v15  ;;  %v1893_v40 = vpop.eup %1319  ;;  %v354_v6 = vsub.f32 1.5, %v353_v46 }
  0xc8   :  { %v375_v4 = vmul.f32 %v1834_v47, %v374_v58  ;;  %v189_v45 = vpop.xlane.xlu1 %188  ;;  %v391_v41 = vmul.f32 %v1893_v40, %v1846_v49  ;;  %vm397_vm5 = vweird.f32 %v1893_v40  ;;  %vm406_vm8 = vweird.f32 %v1877_v10 }
  0xc9   :  { %v385_v52 = vmul.f32 %v1840_v30, %v384_v22  ;;  %v205_v28 = vmul.f32 0.03125, %v189_v45  ;;  %v236_v59 = vsub.f32 %v204_v11, %v220_v21  ;;  %v491_v21 = vadd.f32 %v1683_v3, %v472_v39  ;;  %vm1938_vm7 = vmor %vm396_vm4, %vm397_vm5 }
  0xca   :  { %v379_v61 = vsel %vm1886_vm14, %v1834_v47, %v375_v4  ;;  %v392_v44 = vmul.f32 %v1893_v40, %v391_v41  ;;  %v355_v49 = vmul.f32 %v1823_v42, %v354_v6  ;;  %v30_v6 = vld [vmem:[%s2270_s4] sm:$0x1]  ;;  %vm1113_vm4 = vcmask 523264  }
  0xcb   :  { %v237_v54 = vsub.f32 %v205_v28, %v221_v34  ;;  %v389_v7 = vsel %vm1903_vm1, %v1840_v30, %v385_v52  ;;  %v456_v13 = vmul.f32 %v440_v51, %v379_v61  ;;  %v252_v25 = vmax.f32 %v236_v59, 0.0 }
  0xcc   :  { %v457_v57 = vmul.f32 %v441_v19, %v389_v7  ;;  %v393_v33 = vmul.f32 0.5, %v392_v44  ;;  %v365_v34 = vmul.f32 %v1818_v24, %v364_v12  ;;  %v443_v19 = vsub.f32 %v1574_v50, %v1814_v14 }
  0xcd   :  { %v1322_v60 = vpop.eup %1321  ;;  %v253_v47 = vmax.f32 %v237_v54, 0.0  ;;  %v475_v62 = vmul.f32 %v1668_v0, %v456_v13  ;;  %v268_v30 = vadd.f32 1e-06, %v252_v25  ;;  %v503_v38 = vpack.c.bf16 %v491_v21, %v490_v53 }
  0xce   :  { %v401_v35 = vmul.f32 %v1322_v60, %v1877_v10  ;;  %v476_v16 = vmul.f32 %v1668_v0, %v457_v57  ;;  %v394_v37 = vsub.f32 1.5, %v393_v33  ;;  %vm407_vm9 = vweird.f32 %v1322_v60 }
  0xcf   :  { %v269_v2 = vadd.f32 1e-06, %v253_v47  ;;  %v494_v51 = vadd.f32 %v1683_v3, %v475_v62  ;;  %1323 = vrsqrt.f32 %v268_v30  ;;  %v442_v10 = vsub.f32 %v1567_v48, %v1802_v9  ;;  %vm1965_vm12 = vmor %vm406_vm8, %vm407_vm9 }
  0xd0   :  { %v402_v17 = vmul.f32 %v1322_v60, %v401_v35  ;;  %v495_v58 = vadd.f32 %v1683_v3, %v476_v16  ;;  %v395_v1 = vmul.f32 %v1893_v40, %v394_v37  ;;  %v439_v9 = vsub.f32 %v1526_v31, %v1704_v18 }
  0xd1   :  { %1325 = vrsqrt.f32 %v269_v2  ;;  %v369_v50 = vsel %vm1955_vm11, %v1818_v24, %v365_v34  ;;  %v359_v52 = vsel %vm1947_vm10, %v1823_v42, %v355_v49  ;;  %v438_v28 = vsub.f32 %v1531_v32, %v1707_v36 }
  0xd2   :  { %v403_v20 = vmul.f32 0.5, %v402_v17  ;;  %v505_v22 = vpack.c.bf16 %v495_v58, %v494_v51  ;;  %v399_v29 = vsel %vm1938_vm7, %v1893_v40, %v395_v1  ;;  %v455_v26 = vmul.f32 %v439_v9, %v369_v50 }
  0xd3   :  { %v458_v41 = vmul.f32 %v442_v10, %v399_v29  ;;  %v454_v24 = vmul.f32 %v438_v28, %v359_v52  ;;  %vm416_vm13 = vweird.f32 %v268_v30  ;;  %vm426_vm15 = vweird.f32 %v269_v2 }
  0xd4   :  { %v404_v43 = vsub.f32 1.5, %v403_v20  ;;  %1250 = vmatmul.msk.bf16.vlgmr.msra.gmra.mxu3 %vm61_vm0, %v505_v22  ;;  %1248 = vmatmul.msk.bf16.gmra.mxu0 %vm61_vm0, %v503_v38  ;;  %v474_v46 = vmul.f32 %v1668_v0, %v455_v26  ;;  %v445_v12 = vsub.f32 %v1586_v55, %v1871_v8  ;;  %v31_v17 = vpack.c.bf16 %v30_v6, %v30_v6 }
  0xd5   :  { %v1324_v4 = vpop.eup %1323  ;;  %v477_v42 = vmul.f32 %v1668_v0, %v458_v41  ;;  %v473_v39 = vmul.f32 %v1668_v0, %v454_v24 }
  0xd6   :  { %v405_v45 = vmul.f32 %v1322_v60, %v404_v43  ;;  %v411_v23 = vmul.f32 %v1324_v4, %v268_v30  ;;  %vm417_vm14 = vweird.f32 %v1324_v4  ;;  %v493_v33 = vadd.f32 %v1683_v3, %v474_v46 }
  0xd7   :  { %v1326_v48 = vpop.eup %1325  ;;  %vm418_vm2 = vmor %vm416_vm13, %vm417_vm14  ;;  %v496_v57 = vadd.f32 %v1683_v3, %v477_v42  ;;  %v492_v30 = vadd.f32 %v1683_v3, %v473_v39  ;;  %v610_v58 = vpack.i.b16 %v31_v17, %v31_v17  ;;  %v1280_v39 = vld [vmem:[%s2271_s5 + $0x8] sm:$0xff] }
  0xd8   :  { %v421_v14 = vmul.f32 %v1326_v48, %v269_v2  ;;  %v409_v40 = vsel %vm1965_vm12, %v1322_v60, %v405_v45  ;;  %v412_v31 = vmul.f32 %v1324_v4, %v411_v23  ;;  %vm427_vm1 = vweird.f32 %v1326_v48 }
  0xd9   :  { %v459_v18 = vmul.f32 %v443_v19, %v409_v40  ;;  %vm428_vm3 = vmor %vm426_vm15, %vm427_vm1  ;;  %v444_v60 = vsub.f32 %v1591_v56, %v1867_v63  ;;  %v504_v16 = vpack.c.bf16 %v493_v33, %v492_v30  ;;  %v612_v1 = vperm.slane %v610_v58, 0  ;;  %v1282_v40 = vld [vmem:[%s2271_s5 + $0x18] sm:$0xff] }
  0xda   :  { %v422_v59 = vmul.f32 %v1326_v48, %v421_v14  ;;  %v413_v61 = vmul.f32 0.5, %v412_v31  ;;  %1142 = vmatpush.bf16.msra.mxu1 %v1282_v40  ;;  %1285 = vmatpush.bf16.msra.mxu2 %v1282_v40 }
  0xdb   :  { %v478_v44 = vmul.f32 %v1668_v0, %v459_v18  ;;  %v2007_v20 = vunpack.c.l.bf16 %v612_v1 }
  0xdc   :  { %v423_v54 = vmul.f32 0.5, %v422_v59  ;;  %v414_v7 = vsub.f32 1.5, %v413_v61 }
  0xdd   :  { %v497_v32 = vadd.f32 %v1683_v3, %v478_v44  ;;  %v1281_v44 = vld [vmem:[%s2271_s5 + $0x10] sm:$0xff] }
  0xde   :  { %v424_v13 = vsub.f32 1.5, %v423_v54  ;;  %v415_v36 = vmul.f32 %v1324_v4, %v414_v7  ;;  %1143 = vmatpush.bf16.msra.mxu1 %v1281_v44  ;;  %1286 = vmatpush.bf16.msra.mxu2 %v1281_v44 }
  0xdf   :  { %v506_v47 = vpack.c.bf16 %v497_v32, %v496_v57 }
  0xe0   :  { %v425_v25 = vmul.f32 %v1326_v48, %v424_v13  ;;  %v419_v35 = vsel %vm418_vm2, %v1324_v4, %v415_v36 }
  0xe1   :  { %v460_v37 = vmul.f32 %v444_v60, %v419_v35 }
  0xe2   :  { %v429_v62 = vsel %vm428_vm3, %v1326_v48, %v425_v25  ;;  %1144 = vmatpush.bf16.msra.mxu1 %v1280_v39  ;;  %1287 = vmatpush.bf16.msra.mxu2 %v1280_v39 }
  0xe3   :  { %v461_v2 = vmul.f32 %v445_v12, %v429_v62  ;;  %v479_v51 = vmul.f32 %v1668_v0, %v460_v37 }
  0xe4   :  { %1251 = vmatmul.msk.bf16.gmra.mxu3 %vm61_vm0, %v506_v47  ;;  %1249 = vmatmul.msk.bf16.gmra.mxu0 %vm61_vm0, %v504_v16 }
  0xe5   :  { %v480_v56 = vmul.f32 %v1668_v0, %v461_v2  ;;  %v498_v55 = vadd.f32 %v1683_v3, %v479_v51  ;;  %v1279_v2 = vld [vmem:[%s2271_s5] sm:$0xff] }
  0xe6   :  { %1145 = vmatpush.bf16.msra.mxu1 %v1279_v2  ;;  %1288 = vmatpush.bf16.msra.mxu2 %v1279_v2 }
  0xe7   :  { %v499_v63 = vadd.f32 %v1683_v3, %v480_v56 }
  0xe9   :  { %v507_v8 = vpack.c.bf16 %v499_v63, %v498_v55 }
  0xf4   :  { %1252 = vmatmul.msk.bf16.gmra.mxu3 %vm61_vm0, %v507_v8 }
 0x121   :  { %v553_v21 = vpop.f32.mrf.mxu0 }
 0x122   :  { %v593_v15 = vpack.c.bf16 %v553_v21, %v553_v21 }
 0x124   :  { %v613_v22 = vunpack.c.l.bf16 %v593_v15 }
 0x126   :  { %v630_v0 = vadd.f32 %v2007_v20, %v613_v22 }
 0x128   :  { %v646_v27 = vpack.c.bf16 %v630_v0, %v630_v0 }
 0x129   :  { %v555_v34 = vpop.f32.mrf.mxu0 }
 0x12a   :  { %v2010_v3 = vunpack.c.l.bf16 %v646_v27  ;;  %v594_v49 = vpack.c.bf16 %v555_v34, %v555_v34 }
 0x12c   :  { %v710_v11 = vmul.f32 %v2010_v3, %v2010_v3  ;;  %v614_v10 = vunpack.c.l.bf16 %v594_v49 }
 0x12e   :  { %v726_v43 = vpack.c.bf16 %v710_v11, %v710_v11  ;;  %v631_v53 = vadd.f32 %v2007_v20, %v614_v10 }
 0x130   :  { %v742_v19 = vunpack.c.l.bf16 %v726_v43  ;;  %v647_v5 = vpack.c.bf16 %v631_v53, %v631_v53 }
 0x131   :  { %v558_v29 = vpop.f32.mrf.mxu0 }
 0x132   :  { %v758_v4 = vmul.f32 %v742_v19, %v2010_v3  ;;  %v2016_v45 = vunpack.c.l.bf16 %v647_v5  ;;  %v595_v38 = vpack.c.bf16 %v558_v29, %v558_v29 }
 0x134   :  { %v774_v48 = vpack.c.bf16 %v758_v4, %v758_v4  ;;  %v711_v9 = vmul.f32 %v2016_v45, %v2016_v45  ;;  %v615_v23 = vunpack.c.l.bf16 %v595_v38  ;;  %v679_v40 = vmul.f32 0.5, %v2016_v45 }
 0x136   :  { %v790_v50 = vunpack.c.l.bf16 %v774_v48  ;;  %v727_v14 = vpack.c.bf16 %v711_v9, %v711_v9  ;;  %v632_v52 = vadd.f32 %v2007_v20, %v615_v23 }
 0x138   :  { %v806_v41 = vmul.f32 0.044677734, %v790_v50  ;;  %v743_v28 = vunpack.c.l.bf16 %v727_v14  ;;  %v648_v31 = vpack.c.bf16 %v632_v52, %v632_v52  ;;  %v678_v14 = vmul.f32 0.5, %v2010_v3 }
 0x139   :  { %v560_v18 = vpop.f32.mrf.mxu0 }
 0x13a   :  { %v822_v59 = vpack.c.bf16 %v806_v41, %v806_v41  ;;  %v759_v26 = vmul.f32 %v743_v28, %v2016_v45  ;;  %v2025_v61 = vunpack.c.l.bf16 %v648_v31  ;;  %v596_v24 = vpack.c.bf16 %v560_v18, %v560_v18 }
 0x13c   :  { %v838_v54 = vunpack.c.l.bf16 %v822_v59  ;;  %v775_v42 = vpack.c.bf16 %v759_v26, %v759_v26  ;;  %v712_v7 = vmul.f32 %v2025_v61, %v2025_v61  ;;  %v616_v13 = vunpack.c.l.bf16 %v596_v24 }
 0x13d   :  { %v680_v26 = vmul.f32 0.5, %v2025_v61 }
 0x13e   :  { %v854_v46 = vadd.f32 %v838_v54, %v2010_v3  ;;  %v791_v32 = vunpack.c.l.bf16 %v775_v42  ;;  %v728_v36 = vpack.c.bf16 %v712_v7, %v712_v7  ;;  %v633_v25 = vadd.f32 %v2007_v20, %v616_v13 }
 0x13f   :  { %v694_v7 = vpack.c.bf16 %v678_v14, %v678_v14 }
 0x140   :  { %v870_v57 = vpack.c.bf16 %v854_v46, %v854_v46  ;;  %v807_v60 = vmul.f32 0.044677734, %v791_v32  ;;  %v744_v12 = vunpack.c.l.bf16 %v728_v36  ;;  %v649_v33 = vpack.c.bf16 %v633_v25, %v633_v25 }
 0x141   :  { %v563_v47 = vpop.f32.mrf.mxu0  ;;  %v695_v32 = vpack.c.bf16 %v679_v40, %v679_v40 }
 0x142   :  { %v886_v62 = vunpack.c.l.bf16 %v870_v57  ;;  %v823_v35 = vpack.c.bf16 %v807_v60, %v807_v60  ;;  %v760_v30 = vmul.f32 %v744_v12, %v2025_v61  ;;  %v2038_v16 = vunpack.c.l.bf16 %v649_v33 }
 0x143   :  { %v597_v37 = vpack.c.bf16 %v563_v47, %v563_v47  ;;  %v696_v57 = vpack.c.bf16 %v680_v26, %v680_v26 }
 0x144   :  { %v839_v51 = vunpack.c.l.bf16 %v823_v35  ;;  %v776_v56 = vpack.c.bf16 %v760_v30, %v760_v30  ;;  %v713_v55 = vmul.f32 %v2038_v16, %v2038_v16  ;;  %v902_v63 = vmul.f32 0.796875, %v886_v62 }
 0x145   :  { %v617_v8 = vunpack.c.l.bf16 %v597_v37 }
 0x146   :  { %v855_v6 = vadd.f32 %v839_v51, %v2016_v45  ;;  %v792_v17 = vunpack.c.l.bf16 %v776_v56  ;;  %v729_v58 = vpack.c.bf16 %v713_v55, %v713_v55  ;;  %v918_v1 = vpack.c.bf16 %v902_v63, %v902_v63 }
 0x147   :  { %v634_v21 = vadd.f32 %v2007_v20, %v617_v8  ;;  %v1030_v63 = vunpack.c.l.bf16 %v694_v7 }
 0x148   :  { %v871_v15 = vpack.c.bf16 %v855_v6, %v855_v6  ;;  %v745_v22 = vunpack.c.l.bf16 %v729_v58  ;;  %v934_v0 = vunpack.c.l.bf16 %v918_v1  ;;  %v808_v27 = vmul.f32 0.044677734, %v792_v17 }
 0x149   :  { %v650_v34 = vpack.c.bf16 %v634_v21, %v634_v21  ;;  %v565_v49 = vpop.f32.mrf.mxu0  ;;  %v2066_v58 = vunpack.c.l.bf16 %v696_v57 }
 0x14a   :  { %v887_v11 = vunpack.c.l.bf16 %v871_v15  ;;  %v761_v10 = vmul.f32 %v745_v22, %v2038_v16  ;;  %v598_v43 = vpack.c.bf16 %v565_v49, %v565_v49  ;;  %1327 = vtanh.f32 %v934_v0 }
 0x14b   :  { %v2048_v53 = vunpack.c.l.bf16 %v650_v34  ;;  %v824_v4 = vpack.c.bf16 %v808_v27, %v808_v27  ;;  %v2069_v0 = vmul.f32 0.5, %v2038_v16 }
 0x14c   :  { %v777_v19 = vpack.c.bf16 %v761_v10, %v761_v10  ;;  %v618_v5 = vunpack.c.l.bf16 %v598_v43  ;;  %v903_v29 = vmul.f32 0.796875, %v887_v11 }
 0x14d   :  { %v714_v38 = vmul.f32 %v2048_v53, %v2048_v53  ;;  %v840_v31 = vunpack.c.l.bf16 %v824_v4 }
 0x14e   :  { %v793_v48 = vunpack.c.l.bf16 %v777_v19  ;;  %v635_v9 = vadd.f32 %v2007_v20, %v618_v5  ;;  %v919_v23 = vpack.c.bf16 %v903_v29, %v903_v29 }
 0x14f   :  { %v730_v50 = vpack.c.bf16 %v714_v38, %v714_v38  ;;  %v856_v36 = vadd.f32 %v840_v31, %v2025_v61  ;;  %v1031_v61 = vunpack.c.l.bf16 %v695_v32 }
 0x150   :  { %v651_v52 = vpack.c.bf16 %v635_v9, %v635_v9  ;;  %v935_v41 = vunpack.c.l.bf16 %v919_v23  ;;  %v1328_v28 = vpop.eup %1327  ;;  %v809_v18 = vmul.f32 0.044677734, %v793_v48 }
 0x151   :  { %v568_v59 = vpop.f32.mrf.mxu0  ;;  %v746_v24 = vunpack.c.l.bf16 %v730_v50  ;;  %v966_v13 = vpack.c.bf16 %v1328_v28, %v1328_v28  ;;  %v872_v51 = vpack.c.bf16 %v856_v36, %v856_v36 }
 0x152   :  { %v2056_v44 = vunpack.c.l.bf16 %v651_v52  ;;  %v599_v54 = vpack.c.bf16 %v568_v59, %v568_v59  ;;  %1329 = vtanh.f32 %v935_v41  ;;  %v825_v25 = vpack.c.bf16 %v809_v18, %v809_v18 }
 0x153   :  { %v982_v39 = vunpack.c.l.bf16 %v966_v13  ;;  %v762_v60 = vmul.f32 %v746_v24, %v2048_v53  ;;  %v888_v10 = vunpack.c.l.bf16 %v872_v51 }
 0x154   :  { %v715_v3 = vmul.f32 %v2056_v44, %v2056_v44  ;;  %v619_v46 = vunpack.c.l.bf16 %v599_v54  ;;  %v841_v56 = vunpack.c.l.bf16 %v825_v25 }
 0x155   :  { %v998_v62 = vadd.f32 1.0, %v982_v39  ;;  %v778_v8 = vpack.c.bf16 %v762_v60, %v762_v60  ;;  %v2081_v59 = vmul.f32 0.796875, %v888_v10 }
 0x156   :  { %v731_v12 = vpack.c.bf16 %v715_v3, %v715_v3  ;;  %v636_v33 = vadd.f32 %v2007_v20, %v619_v46  ;;  %v857_v43 = vadd.f32 %v841_v56, %v2038_v16 }
 0x157   :  { %v578_v42 = vpop.f32.mrf.mxu3  ;;  %v1014_v22 = vpack.c.bf16 %v998_v62, %v998_v62  ;;  %v794_v29 = vunpack.c.l.bf16 %v778_v8 }
 0x158   :  { %v603_v45 = vpack.c.bf16 %v578_v42, %v578_v42  ;;  %v747_v35 = vunpack.c.l.bf16 %v731_v12  ;;  %v652_v30 = vpack.c.bf16 %v636_v33, %v636_v33  ;;  %v1330_v2 = vpop.eup %1329  ;;  %v873_v28 = vpack.c.bf16 %v857_v43, %v857_v43 }
 0x159   :  { %v570_v55 = vpop.f32.mrf.mxu0  ;;  %v967_v15 = vpack.c.bf16 %v1330_v2, %v1330_v2  ;;  %v1046_v50 = vunpack.c.l.bf16 %v1014_v22  ;;  %v810_v26 = vmul.f32 0.044677734, %v794_v29  ;;  %v920_v22 = vpack.c.bf16 %v2081_v59, %v2081_v59 }
 0x15a   :  { %v623_v47 = vunpack.c.l.bf16 %v603_v45  ;;  %v2064_v6 = vunpack.c.l.bf16 %v652_v30  ;;  %v600_v1 = vpack.c.bf16 %v570_v55, %v570_v55  ;;  %v763_v27 = vmul.f32 %v747_v35, %v2056_v44 }
 0x15b   :  { %v983_v5 = vunpack.c.l.bf16 %v967_v15  ;;  %v1062_v45 = vmul.f32 %v1046_v50, %v1030_v63  ;;  %v826_v62 = vpack.c.bf16 %v810_v26, %v810_v26 }
 0x15c   :  { %v640_v37 = vadd.f32 %v2007_v20, %v623_v47  ;;  %v716_v34 = vmul.f32 %v2064_v6, %v2064_v6  ;;  %v620_v19 = vunpack.c.l.bf16 %v600_v1  ;;  %v779_v14 = vpack.c.bf16 %v763_v27, %v763_v27 }
 0x15d   :  { %v999_v23 = vadd.f32 1.0, %v983_v5  ;;  %v889_v47 = vunpack.c.l.bf16 %v873_v28  ;;  %v842_v27 = vunpack.c.l.bf16 %v826_v62 }
 0x15e   :  { %v656_v17 = vpack.c.bf16 %v640_v37, %v640_v37  ;;  %v732_v4 = vpack.c.bf16 %v716_v34, %v716_v34  ;;  %v637_v9 = vadd.f32 %v2007_v20, %v620_v19  ;;  %v795_v32 = vunpack.c.l.bf16 %v779_v14 }
 0x15f   :  { %v580_v21 = vpop.f32.mrf.mxu3  ;;  %v1015_v18 = vpack.c.bf16 %v999_v23, %v999_v23  ;;  %v905_v10 = vmul.f32 0.796875, %v889_v47 }
 0x160   :  { %v2074_v49 = vunpack.c.l.bf16 %v656_v17  ;;  %v604_v11 = vpack.c.bf16 %v580_v21, %v580_v21  ;;  %v748_v52 = vunpack.c.l.bf16 %v732_v4  ;;  %v653_v16 = vpack.c.bf16 %v637_v9, %v637_v9 }
 0x161   :  { %v573_v31 = vpop.f32.mrf.mxu0  ;;  %v1047_v46 = vunpack.c.l.bf16 %v1015_v18  ;;  %v811_v55 = vmul.f32 0.044677734, %v795_v32  ;;  %v697_v17 = vpack.c.bf16 %v2069_v0, %v2069_v0 }
 0x162   :  { %v720_v38 = vmul.f32 %v2074_v49, %v2074_v49  ;;  %v624_v48 = vunpack.c.l.bf16 %v604_v11  ;;  %v764_v24 = vmul.f32 %v748_v52, %v2064_v6  ;;  %v2084_v7 = vunpack.c.l.bf16 %v653_v16 }
 0x163   :  { %v601_v13 = vpack.c.bf16 %v573_v31, %v573_v31  ;;  %v1063_v33 = vmul.f32 %v1047_v46, %v1031_v61 }
 0x164   :  { %v736_v40 = vpack.c.bf16 %v720_v38, %v720_v38  ;;  %v641_v41 = vadd.f32 %v2007_v20, %v624_v48  ;;  %v780_v36 = vpack.c.bf16 %v764_v24, %v764_v24  ;;  %v717_v57 = vmul.f32 %v2084_v7, %v2084_v7 }
 0x165   :  { %v621_v60 = vunpack.c.l.bf16 %v601_v13  ;;  %v1078_v56 = vpack.c.bf16 %v1063_v33, %v1062_v45  ;;  %v827_v38 = vpack.c.bf16 %v811_v55, %v811_v55 }
 0x166   :  { %v752_v54 = vunpack.c.l.bf16 %v736_v40  ;;  %v657_v42 = vpack.c.bf16 %v641_v41, %v641_v41  ;;  %v796_v35 = vunpack.c.l.bf16 %v780_v36  ;;  %v733_v37 = vpack.c.bf16 %v717_v57, %v717_v57 }
 0x167   :  { %v583_v3 = vpop.f32.mrf.mxu3  ;;  %v638_v2 = vadd.f32 %v2007_v20, %v621_v60  ;;  %1269 = vmatmul.msk.bf16.vlgmr.msra.gmra.mxu1 %vm1113_vm4, %v1078_v56  ;;  %v858_v41 = vadd.f32 %v842_v27, %v2048_v53 }
 0x168   :  { %v768_v25 = vmul.f32 %v752_v54, %v2074_v49  ;;  %v2087_v39 = vunpack.c.l.bf16 %v657_v42  ;;  %v605_v12 = vpack.c.bf16 %v583_v3, %v583_v3  ;;  %v749_v1 = vunpack.c.l.bf16 %v733_v37 }
 0x169   :  { %v654_v21 = vpack.c.bf16 %v638_v2, %v638_v2  ;;  %v575_v15 = vpop.f32.mrf.mxu0  ;;  %v812_v34 = vmul.f32 0.044677734, %v796_v35  ;;  %v843_v54 = vunpack.c.l.bf16 %v827_v38  ;;  %v921_v3 = vpack.c.bf16 %v905_v10, %v905_v10 }
 0x16a   :  { %v721_v30 = vmul.f32 %v2087_v39, %v2087_v39  ;;  %v625_v51 = vunpack.c.l.bf16 %v605_v12  ;;  %v784_v63 = vpack.c.bf16 %v768_v25, %v768_v25  ;;  %v765_v43 = vmul.f32 %v749_v1, %v2084_v7 }
 0x16b   :  { %v2101_v19 = vunpack.c.l.bf16 %v654_v21  ;;  %v602_v29 = vpack.c.bf16 %v575_v15, %v575_v15  ;;  %v828_v28 = vpack.c.bf16 %v812_v34, %v812_v34  ;;  %v874_v25 = vpack.c.bf16 %v858_v41, %v858_v41 }
 0x16c   :  { %v737_v8 = vpack.c.bf16 %v721_v30, %v721_v30  ;;  %v642_v61 = vadd.f32 %v2007_v20, %v625_v51  ;;  %v800_v48 = vunpack.c.l.bf16 %v784_v63  ;;  %v781_v50 = vpack.c.bf16 %v765_v43, %v765_v43 }
 0x16d   :  { %v718_v14 = vmul.f32 %v2101_v19, %v2101_v19  ;;  %v622_v40 = vunpack.c.l.bf16 %v602_v29  ;;  %v844_v57 = vunpack.c.l.bf16 %v828_v28  ;;  %v936_v12 = vunpack.c.l.bf16 %v920_v22 }
 0x16e   :  { %v753_v11 = vunpack.c.l.bf16 %v737_v8  ;;  %v658_v5 = vpack.c.bf16 %v642_v61, %v642_v61  ;;  %v797_v18 = vunpack.c.l.bf16 %v781_v50  ;;  %v816_v42 = vmul.f32 0.044677734, %v800_v48 }
 0x16f   :  { %v585_v4 = vpop.f32.mrf.mxu3  ;;  %v734_v59 = vpack.c.bf16 %v718_v14, %v718_v14  ;;  %v639_v24 = vadd.f32 %v2007_v20, %v622_v40  ;;  %v859_v37 = vadd.f32 %v843_v54, %v2056_v44  ;;  %v937_v56 = vunpack.c.l.bf16 %v921_v3 }
 0x170   :  { %v769_v9 = vmul.f32 %v753_v11, %v2087_v39  ;;  %v606_v23 = vpack.c.bf16 %v585_v4, %v585_v4  ;;  %v2106_v52 = vunpack.c.l.bf16 %v658_v5  ;;  %v813_v46 = vmul.f32 0.044677734, %v797_v18 }
 0x171   :  { %v750_v45 = vunpack.c.l.bf16 %v734_v59  ;;  %v655_v36 = vpack.c.bf16 %v639_v24, %v639_v24  ;;  %v832_v55 = vpack.c.bf16 %v816_v42, %v816_v42  ;;  %v860_v21 = vadd.f32 %v844_v57, %v2064_v6 }
 0x172   :  { %v785_v16 = vpack.c.bf16 %v769_v9, %v769_v9  ;;  %v626_v31 = vunpack.c.l.bf16 %v606_v23  ;;  %v722_v26 = vmul.f32 %v2106_v52, %v2106_v52  ;;  %v829_v63 = vpack.c.bf16 %v813_v46, %v813_v46 }
 0x173   :  { %v766_v47 = vmul.f32 %v750_v45, %v2101_v19  ;;  %v2114_v35 = vunpack.c.l.bf16 %v655_v36  ;;  %1331 = vtanh.f32 %v936_v12  ;;  %v2129_v5 = vunpack.c.l.bf16 %v697_v17 }
 0x174   :  { %v643_v13 = vadd.f32 %v2007_v20, %v626_v31  ;;  %v738_v32 = vpack.c.bf16 %v722_v26, %v722_v26  ;;  %v801_v33 = vunpack.c.l.bf16 %v785_v16  ;;  %1333 = vtanh.f32 %v937_v56 }
 0x175   :  { %v782_v8 = vpack.c.bf16 %v766_v47, %v766_v47  ;;  %v719_v1 = vmul.f32 %v2114_v35, %v2114_v35  ;;  %v875_v29 = vpack.c.bf16 %v859_v37, %v859_v37  ;;  %v845_v4 = vunpack.c.l.bf16 %v829_v63 }
 0x176   :  { %v659_v60 = vpack.c.bf16 %v643_v13, %v643_v13  ;;  %v754_v62 = vunpack.c.l.bf16 %v738_v32  ;;  %v817_v22 = vmul.f32 0.044677734, %v801_v33  ;;  %v890_v9 = vunpack.c.l.bf16 %v874_v25 }
 0x177   :  { %v588_v30 = vpop.f32.mrf.mxu3  ;;  %v798_v27 = vunpack.c.l.bf16 %v782_v8  ;;  %v735_v11 = vpack.c.bf16 %v719_v1, %v719_v1  ;;  %v848_v23 = vunpack.c.l.bf16 %v832_v55  ;;  %v876_v40 = vpack.c.bf16 %v860_v21, %v860_v21 }
 0x178   :  { %v2117_v2 = vunpack.c.l.bf16 %v659_v60  ;;  %v607_v51 = vpack.c.bf16 %v588_v30, %v588_v30  ;;  %v770_v34 = vmul.f32 %v754_v62, %v2106_v52  ;;  %v833_v41 = vpack.c.bf16 %v817_v22, %v817_v22 }
 0x179   :  { %v814_v38 = vmul.f32 0.044677734, %v798_v27  ;;  %v751_v48 = vunpack.c.l.bf16 %v735_v11  ;;  %v1332_v18 = vpop.eup %1331  ;;  %v891_v24 = vunpack.c.l.bf16 %v875_v29  ;;  %v861_v54 = vadd.f32 %v845_v4, %v2084_v7 }
 0x17a   :  { %v723_v61 = vmul.f32 %v2117_v2, %v2117_v2  ;;  %v627_v15 = vunpack.c.l.bf16 %v607_v51  ;;  %v786_v28 = vpack.c.bf16 %v770_v34, %v770_v34  ;;  %v968_v13 = vpack.c.bf16 %v1332_v18, %v1332_v18  ;;  %v1334_v3 = vpop.eup %1333 }
 0x17b   :  { %v767_v16 = vmul.f32 %v751_v48, %v2114_v35  ;;  %v830_v59 = vpack.c.bf16 %v814_v38, %v814_v38  ;;  %v2137_v46 = vadd.f32 %v848_v23, %v2074_v49  ;;  %v892_v25 = vunpack.c.l.bf16 %v876_v40 }
 0x17c   :  { %v739_v10 = vpack.c.bf16 %v723_v61, %v723_v61  ;;  %v644_v43 = vadd.f32 %v2007_v20, %v627_v15  ;;  %v849_v57 = vunpack.c.l.bf16 %v833_v41  ;;  %v969_v12 = vpack.c.bf16 %v1334_v3, %v1334_v3 }
 0x17d   :  { %v783_v42 = vpack.c.bf16 %v767_v16, %v767_v16  ;;  %v846_v33 = vunpack.c.l.bf16 %v830_v59  ;;  %v802_v47 = vunpack.c.l.bf16 %v786_v28  ;;  %v984_v62 = vunpack.c.l.bf16 %v968_v13 }
 0x17e   :  { %v755_v50 = vunpack.c.l.bf16 %v739_v10  ;;  %v660_v14 = vpack.c.bf16 %v644_v43, %v644_v43  ;;  %v877_v37 = vpack.c.bf16 %v861_v54, %v861_v54  ;;  %v985_v56 = vunpack.c.l.bf16 %v969_v12 }
 0x17f   :  { %v590_v31 = vpop.f32.mrf.mxu3  ;;  %v799_v60 = vunpack.c.l.bf16 %v783_v42  ;;  %v906_v55 = vmul.f32 0.796875, %v890_v9  ;;  %v1000_v1 = vadd.f32 1.0, %v984_v62  ;;  %v865_v61 = vadd.f32 %v849_v57, %v2087_v39 }
 0x180   :  { %v771_v0 = vmul.f32 %v755_v50, %v2117_v2  ;;  %v2133_v17 = vunpack.c.l.bf16 %v660_v14  ;;  %v608_v26 = vpack.c.bf16 %v590_v31, %v590_v31  ;;  %v1001_v22 = vadd.f32 1.0, %v985_v56 }
 0x181   :  { %v815_v51 = vmul.f32 0.044677734, %v799_v60  ;;  %v907_v27 = vmul.f32 0.796875, %v891_v24  ;;  %v862_v34 = vadd.f32 %v846_v33, %v2101_v19  ;;  %v818_v11 = vmul.f32 0.044677734, %v802_v47 }
 0x182   :  { %v787_v45 = vpack.c.bf16 %v771_v0, %v771_v0  ;;  %v724_v32 = vmul.f32 %v2133_v17, %v2133_v17  ;;  %v628_v36 = vunpack.c.l.bf16 %v608_v26  ;;  %v1016_v10 = vpack.c.bf16 %v1000_v1, %v1000_v1 }
 0x183   :  { %v831_v15 = vpack.c.bf16 %v815_v51, %v815_v51  ;;  %v1017_v4 = vpack.c.bf16 %v1001_v22, %v1001_v22  ;;  %v922_v38 = vpack.c.bf16 %v906_v55, %v906_v55  ;;  %v923_v41 = vpack.c.bf16 %v907_v27, %v907_v27 }
 0x184   :  { %v645_v30 = vadd.f32 %v2007_v20, %v628_v36  ;;  %v803_v63 = vunpack.c.l.bf16 %v787_v45  ;;  %v740_v8 = vpack.c.bf16 %v724_v32, %v724_v32  ;;  %v893_v20 = vunpack.c.l.bf16 %v877_v37 }
 0x185   :  { %v847_v29 = vunpack.c.l.bf16 %v831_v15  ;;  %v1048_v23 = vunpack.c.l.bf16 %v1016_v10  ;;  %v1049_v40 = vunpack.c.l.bf16 %v1017_v4  ;;  %v938_v28 = vunpack.c.l.bf16 %v922_v38 }
 0x186   :  { %v661_v21 = vpack.c.bf16 %v645_v30, %v645_v30  ;;  %v819_v48 = vmul.f32 0.044677734, %v803_v63  ;;  %v756_v9 = vunpack.c.l.bf16 %v740_v8  ;;  %v878_v16 = vpack.c.bf16 %v862_v34, %v862_v34 }
 0x187   :  { %v863_v14 = vadd.f32 %v847_v29, %v2114_v35  ;;  %v834_v31 = vpack.c.bf16 %v818_v11, %v818_v11  ;;  %v1064_v18 = vmul.f32 %v1048_v23, %v2066_v58  ;;  %v1065_v26 = vmul.f32 %v1049_v40, %v2129_v5 }
 0x188   :  { %v2144_v43 = vunpack.c.l.bf16 %v661_v21  ;;  %v939_v24 = vunpack.c.l.bf16 %v923_v41  ;;  %1335 = vtanh.f32 %v938_v28  ;;  %v835_v54 = vpack.c.bf16 %v819_v48, %v819_v48 }
 0x189   :  { %v879_v0 = vpack.c.bf16 %v863_v14, %v863_v14  ;;  %v772_v3 = vmul.f32 %v756_v9, %v2133_v17  ;;  %v1079_v45 = vpack.c.bf16 %v1065_v26, %v1064_v18  ;;  %v880_v32 = vpack.c.bf16 %v2137_v46, %v2137_v46 }
 0x18a   :  { %v725_v50 = vmul.f32 %v2144_v43, %v2144_v43  ;;  %1337 = vtanh.f32 %v939_v24  ;;  %v881_v36 = vpack.c.bf16 %v865_v61, %v865_v61  ;;  %v894_v58 = vunpack.c.l.bf16 %v878_v16 }
 0x18b   :  { %v895_v13 = vunpack.c.l.bf16 %v879_v0  ;;  %v850_v60 = vunpack.c.l.bf16 %v834_v31  ;;  %1270 = vmatmul.msk.bf16.gmra.mxu1 %vm1113_vm4, %v1079_v45  ;;  %v908_v5 = vmul.f32 0.796875, %v892_v25  ;;  %v909_v12 = vmul.f32 0.796875, %v893_v20 }
 0x18c   :  { %v741_v59 = vpack.c.bf16 %v725_v50, %v725_v50  ;;  %v851_v33 = vunpack.c.l.bf16 %v835_v54  ;;  %v682_v62 = vmul.f32 0.5, %v2048_v53  ;;  %v788_v51 = vpack.c.bf16 %v772_v3, %v772_v3 }
 0x18d   :  { %v911_v37 = vmul.f32 0.796875, %v895_v13  ;;  %v924_v56 = vpack.c.bf16 %v908_v5, %v908_v5  ;;  %v925_v55 = vpack.c.bf16 %v909_v12, %v909_v12  ;;  %v896_v63 = vunpack.c.l.bf16 %v880_v32 }
 0x18e   :  { %v757_v42 = vunpack.c.l.bf16 %v741_v59  ;;  %v1336_v30 = vpop.eup %1335  ;;  %v897_v46 = vunpack.c.l.bf16 %v881_v36  ;;  %v683_v8 = vmul.f32 0.5, %v2056_v44  ;;  %v866_v61 = vadd.f32 %v850_v60, %v2106_v52 }
 0x18f   :  { %v970_v1 = vpack.c.bf16 %v1336_v30, %v1336_v30  ;;  %v940_v15 = vunpack.c.l.bf16 %v924_v56  ;;  %v941_v25 = vunpack.c.l.bf16 %v925_v55  ;;  %v910_v22 = vmul.f32 0.796875, %v894_v58 }
 0x190   :  { %v773_v57 = vmul.f32 %v757_v42, %v2144_v43  ;;  %v1338_v21 = vpop.eup %1337  ;;  %v867_v27 = vadd.f32 %v851_v33, %v2117_v2  ;;  %v804_v10 = vunpack.c.l.bf16 %v788_v51  ;;  %v927_v29 = vpack.c.bf16 %v911_v37, %v911_v37 }
 0x191   :  { %v971_v53 = vpack.c.bf16 %v1338_v21, %v1338_v21  ;;  %v986_v11 = vunpack.c.l.bf16 %v970_v1  ;;  %1339 = vtanh.f32 %v940_v15  ;;  %v926_v20 = vpack.c.bf16 %v910_v22, %v910_v22 }
 0x192   :  { %v789_v47 = vpack.c.bf16 %v773_v57, %v773_v57  ;;  %v698_v4 = vpack.c.bf16 %v682_v62, %v682_v62  ;;  %v699_v38 = vpack.c.bf16 %v683_v8, %v683_v8  ;;  %v882_v9 = vpack.c.bf16 %v866_v61, %v866_v61 }
 0x193   :  { %v987_v48 = vunpack.c.l.bf16 %v971_v53  ;;  %v1002_v44 = vadd.f32 1.0, %v986_v11  ;;  %1341 = vtanh.f32 %v941_v25  ;;  %v942_v23 = vunpack.c.l.bf16 %v926_v20 }
 0x194   :  { %v805_v34 = vunpack.c.l.bf16 %v789_v47  ;;  %v943_v50 = vunpack.c.l.bf16 %v927_v29  ;;  %v883_v14 = vpack.c.bf16 %v867_v27, %v867_v27  ;;  %v820_v16 = vmul.f32 0.044677734, %v804_v10 }
 0x195   :  { %v1003_v41 = vadd.f32 1.0, %v987_v48  ;;  %v1018_v28 = vpack.c.bf16 %v1002_v44, %v1002_v44  ;;  %1343 = vtanh.f32 %v942_v23  ;;  %v912_v31 = vmul.f32 0.796875, %v896_v63 }
 0x196   :  { %v821_v40 = vmul.f32 0.044677734, %v805_v34  ;;  %v913_v18 = vmul.f32 0.796875, %v897_v46  ;;  %v1034_v0 = vunpack.c.l.bf16 %v698_v4  ;;  %1345 = vtanh.f32 %v943_v50 }
 0x197   :  { %v1019_v59 = vpack.c.bf16 %v1003_v41, %v1003_v41  ;;  %v1050_v26 = vunpack.c.l.bf16 %v1018_v28  ;;  %v1340_v24 = vpop.eup %1339  ;;  %v1035_v54 = vunpack.c.l.bf16 %v699_v38  ;;  %v684_v42 = vmul.f32 0.5, %v2064_v6 }
 0x198   :  { %v928_v13 = vpack.c.bf16 %v912_v31, %v912_v31  ;;  %v929_v3 = vpack.c.bf16 %v913_v18, %v913_v18  ;;  %v898_v45 = vunpack.c.l.bf16 %v882_v9  ;;  %v837_v32 = vpack.c.bf16 %v821_v40, %v821_v40 }
 0x199   :  { %v1051_v36 = vunpack.c.l.bf16 %v1019_v59  ;;  %v972_v57 = vpack.c.bf16 %v1340_v24, %v1340_v24  ;;  %v1342_v58 = vpop.eup %1341  ;;  %v899_v60 = vunpack.c.l.bf16 %v883_v14  ;;  %v836_v5 = vpack.c.bf16 %v820_v16, %v820_v16 }
 0x19a   :  { %v944_v12 = vunpack.c.l.bf16 %v928_v13  ;;  %v945_v33 = vunpack.c.l.bf16 %v929_v3  ;;  %v1066_v47 = vmul.f32 %v1050_v26, %v1034_v0  ;;  %v973_v30 = vpack.c.bf16 %v1342_v58, %v1342_v58 }
 0x19b   :  { %v1067_v62 = vmul.f32 %v1051_v36, %v1035_v54  ;;  %v988_v37 = vunpack.c.l.bf16 %v972_v57  ;;  %v1344_v51 = vpop.eup %1343  ;;  %v685_v56 = vmul.f32 0.5, %v2084_v7  ;;  %v700_v55 = vpack.c.bf16 %v684_v42, %v684_v42 }
 0x19c   :  { %v686_v6 = vmul.f32 0.5, %v2101_v19  ;;  %1347 = vtanh.f32 %v944_v12  ;;  %v1346_v63 = vpop.eup %1345  ;;  %v853_v46 = vunpack.c.l.bf16 %v837_v32  ;;  %v989_v1 = vunpack.c.l.bf16 %v973_v30 }
 0x19d   :  { %v1080_v8 = vpack.c.bf16 %v1067_v62, %v1066_v47  ;;  %v1004_v21 = vadd.f32 1.0, %v988_v37  ;;  %v687_v61 = vmul.f32 0.5, %v2114_v35  ;;  %v974_v15 = vpack.c.bf16 %v1344_v51, %v1344_v51 }
 0x19e   :  { %v975_v25 = vpack.c.bf16 %v1346_v63, %v1346_v63  ;;  %1349 = vtanh.f32 %v945_v33  ;;  %v852_v22 = vunpack.c.l.bf16 %v836_v5  ;;  %v1005_v27 = vadd.f32 1.0, %v989_v1 }
 0x19f   :  { %1271 = vmatmul.msk.bf16.gmra.mxu1 %vm1113_vm4, %v1080_v8  ;;  %v914_v34 = vmul.f32 0.796875, %v898_v45  ;;  %v915_v7 = vmul.f32 0.796875, %v899_v60  ;;  %v701_v53 = vpack.c.bf16 %v685_v56, %v685_v56  ;;  %v990_v11 = vunpack.c.l.bf16 %v974_v15 }
 0x1a0   :  { %v991_v19 = vunpack.c.l.bf16 %v975_v25  ;;  %v869_v10 = vadd.f32 %v853_v46, %v2144_v43  ;;  %v1020_v20 = vpack.c.bf16 %v1004_v21, %v1004_v21  ;;  %v1021_v29 = vpack.c.bf16 %v1005_v27, %v1005_v27 }
 0x1a1   :  { %v931_v4 = vpack.c.bf16 %v915_v7, %v915_v7  ;;  %v702_v48 = vpack.c.bf16 %v686_v6, %v686_v6  ;;  %v703_v35 = vpack.c.bf16 %v687_v61, %v687_v61  ;;  %v1006_v44 = vadd.f32 1.0, %v990_v11 }
 0x1a2   :  { %v1348_v38 = vpop.eup %1347  ;;  %v1007_v9 = vadd.f32 1.0, %v991_v19  ;;  %v868_v23 = vadd.f32 %v852_v22, %v2133_v17  ;;  %v1036_v50 = vunpack.c.l.bf16 %v700_v55  ;;  %v1053_v14 = vunpack.c.l.bf16 %v1021_v29 }
 0x1a3   :  { %v930_v40 = vpack.c.bf16 %v914_v34, %v914_v34  ;;  %v1037_v28 = vunpack.c.l.bf16 %v701_v53  ;;  %v1022_v16 = vpack.c.bf16 %v1006_v44, %v1006_v44  ;;  %v976_v18 = vpack.c.bf16 %v1348_v38, %v1348_v38 }
 0x1a4   :  { %v1350_v41 = vpop.eup %1349  ;;  %v1023_v31 = vpack.c.bf16 %v1007_v9, %v1007_v9  ;;  %v885_v59 = vpack.c.bf16 %v869_v10, %v869_v10  ;;  %v1052_v0 = vunpack.c.l.bf16 %v1020_v20  ;;  %v947_v24 = vunpack.c.l.bf16 %v931_v4 }
 0x1a5   :  { %v977_v26 = vpack.c.bf16 %v1350_v41, %v1350_v41  ;;  %v1038_v54 = vunpack.c.l.bf16 %v702_v48  ;;  %v1039_v42 = vunpack.c.l.bf16 %v703_v35  ;;  %v1054_v13 = vunpack.c.l.bf16 %v1022_v16 }
 0x1a6   :  { %v1055_v3 = vunpack.c.l.bf16 %v1023_v31  ;;  %v884_v45 = vpack.c.bf16 %v868_v23, %v868_v23  ;;  %v1069_v32 = vmul.f32 %v1053_v14, %v1037_v28  ;;  %v946_v57 = vunpack.c.l.bf16 %v930_v40 }
 0x1a7   :  { %v993_v36 = vunpack.c.l.bf16 %v977_v26  ;;  %v1070_v58 = vmul.f32 %v1054_v13, %v1038_v54  ;;  %v992_v5 = vunpack.c.l.bf16 %v976_v18  ;;  %v901_v12 = vunpack.c.l.bf16 %v885_v59 }
 0x1a8   :  { %v1071_v60 = vmul.f32 %v1055_v3, %v1039_v42  ;;  %v1068_v33 = vmul.f32 %v1052_v0, %v1036_v50  ;;  %1351 = vtanh.f32 %v947_v24  ;;  %v900_v30 = vunpack.c.l.bf16 %v884_v45 }
 0x1a9   :  { %v1009_v62 = vadd.f32 1.0, %v993_v36  ;;  %1353 = vtanh.f32 %v946_v57  ;;  %v689_v51 = vmul.f32 0.5, %v2087_v39  ;;  %v1008_v56 = vadd.f32 1.0, %v992_v5 }
 0x1aa   :  { %v1082_v47 = vpack.c.bf16 %v1071_v60, %v1070_v58  ;;  %v1081_v37 = vpack.c.bf16 %v1069_v32, %v1068_v33  ;;  %v917_v55 = vmul.f32 0.796875, %v901_v12  ;;  %v688_v6 = vmul.f32 0.5, %v2074_v49 }
 0x1ab   :  { %v1025_v63 = vpack.c.bf16 %v1009_v62, %v1009_v62  ;;  %v916_v8 = vmul.f32 0.796875, %v900_v30  ;;  %v705_v1 = vpack.c.bf16 %v689_v51, %v689_v51  ;;  %v1024_v21 = vpack.c.bf16 %v1008_v56, %v1008_v56  ;;  %v1359_v56 = vld [vmem:[%s2266_s0] sm:$0xff] }
 0x1ac   :  { %1273 = vmatmul.msk.bf16.vlgmr.msra.gmra.mxu2 %vm1113_vm4, %v1082_v47  ;;  %v933_v15 = vpack.c.bf16 %v917_v55, %v917_v55  ;;  %v704_v25 = vpack.c.bf16 %v688_v6, %v688_v6  ;;  %v691_v35 = vmul.f32 0.5, %v2117_v2  ;;  %v690_v9 = vmul.f32 0.5, %v2106_v52 }
 0x1ad   :  { %v1057_v22 = vunpack.c.l.bf16 %v1025_v63  ;;  %v932_v34 = vpack.c.bf16 %v916_v8, %v916_v8  ;;  %v1041_v7 = vunpack.c.l.bf16 %v705_v1  ;;  %v1056_v53 = vunpack.c.l.bf16 %v1024_v21 }
 0x1ae   :  { %v1352_v46 = vpop.eup %1351  ;;  %v949_v11 = vunpack.c.l.bf16 %v933_v15  ;;  %v1040_v19 = vunpack.c.l.bf16 %v704_v25  ;;  %v707_v14 = vpack.c.bf16 %v691_v35, %v691_v35  ;;  %v706_v28 = vpack.c.bf16 %v690_v9, %v690_v9  ;;  %v1366_v9 = vld [vmem:[%s2266_s0 + $0x40] sm:$0xff] }
 0x1af   :  { %1272 = vmatmul.msk.bf16.gmra.mxu1 %vm1113_vm4, %v1081_v37  ;;  %v1354_v61 = vpop.eup %1353  ;;  %v979_v27 = vpack.c.bf16 %v1352_v46, %v1352_v46  ;;  %v1073_v10 = vmul.f32 %v1057_v22, %v1041_v7  ;;  %v948_v20 = vunpack.c.l.bf16 %v932_v34  ;;  %v693_v52 = vmul.f32 0.5, %v2144_v43  ;;  %v2181_v43 = vld [vmem:[%s2272_s6] ss:$0 sm:$0xff]  ;;  %v1360_v46 = vld [vmem:[%s2266_s0 + $0x8] sm:$0xff] }
 0x1b0   :  { %v978_v39 = vpack.c.bf16 %v1354_v61, %v1354_v61  ;;  %v1072_v29 = vmul.f32 %v1056_v53, %v1040_v19  ;;  %1355 = vtanh.f32 %v949_v11  ;;  %v1043_v18 = vunpack.c.l.bf16 %v707_v14  ;;  %v1361_v61 = vld [vmem:[%s2266_s0 + $0x10] sm:$0xff] }
 0x1b1   :  { %v995_v49 = vunpack.c.l.bf16 %v979_v27  ;;  %1357 = vtanh.f32 %v948_v20  ;;  %v1042_v26 = vunpack.c.l.bf16 %v706_v28  ;;  %v692_v32 = vmul.f32 0.5, %v2133_v17  ;;  %v1362_v27 = vld [vmem:[%s2266_s0 + $0x18] sm:$0xff] }
 0x1b2   :  { %v994_v4 = vunpack.c.l.bf16 %v978_v39  ;;  %v1083_v38 = vpack.c.bf16 %v1073_v10, %v1072_v29  ;;  %v709_v57 = vpack.c.bf16 %v693_v52, %v693_v52  ;;  %v1363_v39 = vld [vmem:[%s2266_s0 + $0x20] sm:$0xff] }
 0x1b3   :  { %v1011_v48 = vadd.f32 1.0, %v995_v49  ;;  %v708_v60 = vpack.c.bf16 %v692_v32, %v692_v32  ;;  %v1364_v49 = vld [vmem:[%s2266_s0 + $0x28] sm:$0xff] }
 0x1b4   :  { %v1010_v44 = vadd.f32 1.0, %v994_v4  ;;  %v1045_v12 = vunpack.c.l.bf16 %v709_v57 }
 0x1b5   :  { %v1027_v23 = vpack.c.bf16 %v1011_v48, %v1011_v48  ;;  %v1044_v47 = vunpack.c.l.bf16 %v708_v60 }
 0x1b6   :  { %v1356_v50 = vpop.eup %1355  ;;  %v1026_v40 = vpack.c.bf16 %v1010_v44, %v1010_v44 }
 0x1b7   :  { %v1358_v41 = vpop.eup %1357  ;;  %v1059_v16 = vunpack.c.l.bf16 %v1027_v23  ;;  %v981_v31 = vpack.c.bf16 %v1356_v50, %v1356_v50 }
 0x1b8   :  { %v1058_v59 = vunpack.c.l.bf16 %v1026_v40  ;;  %v980_v0 = vpack.c.bf16 %v1358_v41, %v1358_v41  ;;  %v1367_v40 = vld [vmem:[%s2266_s0 + $0x38] sm:$0xff] }
 0x1b9   :  { %v1075_v24 = vmul.f32 %v1059_v16, %v1043_v18  ;;  %v997_v54 = vunpack.c.l.bf16 %v981_v31  ;;  %v1368_v31 = vld [vmem:[%s2266_s0 + $0x48] sm:$0xff] }
 0x1ba   :  { %v1074_v42 = vmul.f32 %v1058_v59, %v1042_v26  ;;  %v996_v13 = vunpack.c.l.bf16 %v980_v0  ;;  %v1369_v26 = vld [vmem:[%s2266_s0 + $0x50] sm:$0xff] }
 0x1bb   :  { %v1013_v3 = vadd.f32 1.0, %v997_v54 }
 0x1bc   :  { %1274 = vmatmul.msk.bf16.gmra.mxu2 %vm1113_vm4, %v1083_v38  ;;  %v1084_v2 = vpack.c.bf16 %v1075_v24, %v1074_v42  ;;  %v1012_v45 = vadd.f32 1.0, %v996_v13  ;;  %v1365_v38 = vld [vmem:[%s2266_s0 + $0x30] sm:$0xff]  ;;  %v1370_v13 = vld [vmem:[%s2266_s0 + $0x58] sm:$0xff] }
 0x1bd   :  { %v1029_v36 = vpack.c.bf16 %v1013_v3, %v1013_v3 }
 0x1be   :  { %v1028_v58 = vpack.c.bf16 %v1012_v45, %v1012_v45  ;;  %v1371_v45 = vld [vmem:[%s2266_s0 + $0x60] sm:$0xff] }
 0x1bf   :  { %v1061_v5 = vunpack.c.l.bf16 %v1029_v36 }
 0x1c0   :  { %v1060_v33 = vunpack.c.l.bf16 %v1028_v58  ;;  %v1372_v58 = vld [vmem:[%s2266_s0 + $0x68] sm:$0xff] }
 0x1c1   :  { %v1077_v62 = vmul.f32 %v1061_v5, %v1045_v12 }
 0x1c2   :  { %v1076_v30 = vmul.f32 %v1060_v33, %v1044_v47  ;;  %v1373_v33 = vld [vmem:[%s2266_s0 + $0x70] sm:$0xff] }
 0x1c4   :  { %v1085_v37 = vpack.c.bf16 %v1077_v62, %v1076_v30 }
 0x1cc   :  { %1275 = vmatmul.msk.bf16.gmra.mxu2 %vm1113_vm4, %v1084_v2 }
 0x1dc   :  { %1276 = vmatmul.msk.bf16.gmra.mxu2 %vm1113_vm4, %v1085_v37  ;;  %v1374_v37 = vld [vmem:[%s2266_s0 + $0x78] sm:$0xff] }
 0x1e4   :  { %v1147_v51 = vpop.f32.mrf.mxu1 }
 0x1e5   :  { %v1148_v17 = vadd.f32 %v2181_v43, %v1147_v51 }
 0x1e7   :  { %v1187_v55 = vadd.f32 %v1359_v56, %v1148_v17 }
 0x1e9   :  { %1203 = vst.msk [vmem:[#allocation2] sm:$0xff] %vm61_vm0, %v1187_v55 }
 0x1ec   :  { %v1149_v6 = vpop.f32.mrf.mxu1 }
 0x1ed   :  { %v1150_v63 = vadd.f32 %v2181_v43, %v1149_v6 }
 0x1ef   :  { %v1188_v8 = vadd.f32 %v1360_v46, %v1150_v63 }
 0x1f1   :  { %1204 = vst.msk [vmem:[#allocation2 + $0x8] sm:$0xff] %vm61_vm0, %v1188_v8 }
 0x208   :  { %v1152_v1 = vpop.f32.mrf.mxu1 }
 0x209   :  { %v1153_v21 = vadd.f32 %v2181_v43, %v1152_v1 }
 0x20b   :  { %v1189_v15 = vadd.f32 %v1361_v61, %v1153_v21 }
 0x20d   :  { %1205 = vst.msk [vmem:[#allocation2 + $0x10] sm:$0xff] %vm61_vm0, %v1189_v15 }
 0x210   :  { %v1154_v25 = vpop.f32.mrf.mxu1 }
 0x211   :  { %v1155_v22 = vadd.f32 %v2181_v43, %v1154_v25 }
 0x213   :  { %v1190_v34 = vadd.f32 %v1362_v27, %v1155_v22 }
 0x215   :  { %1206 = vst.msk [vmem:[#allocation2 + $0x18] sm:$0xff] %vm61_vm0, %v1190_v34 }
 0x21c   :  { %v1157_v7 = vpop.f32.mrf.mxu1 }
 0x21d   :  { %v1158_v53 = vadd.f32 %v2181_v43, %v1157_v7 }
 0x21f   :  { %v1191_v11 = vadd.f32 %v1363_v39, %v1158_v53 }
 0x221   :  { %1207 = vst.msk [vmem:[#allocation2 + $0x20] sm:$0xff] %vm61_vm0, %v1191_v11 }
 0x224   :  { %v1159_v19 = vpop.f32.mrf.mxu1 }
 0x225   :  { %v1160_v10 = vadd.f32 %v2181_v43, %v1159_v19 }
 0x227   :  { %v1192_v20 = vadd.f32 %v1364_v49, %v1160_v10 }
 0x229   :  { %1208 = vst.msk [vmem:[#allocation2 + $0x28] sm:$0xff] %vm61_vm0, %v1192_v20 }
 0x22c   :  { %v1162_v29 = vpop.f32.mrf.mxu1 }
 0x22d   :  { %v1163_v4 = vadd.f32 %v2181_v43, %v1162_v29 }
 0x22f   :  { %v1193_v48 = vadd.f32 %v1365_v38, %v1163_v4  ;;  %v1167_v35 = vpop.f32.mrf.mxu2 }
 0x230   :  { %v1168_v44 = vadd.f32 %v2181_v43, %v1167_v35 }
 0x231   :  { %1209 = vst.msk [vmem:[#allocation2 + $0x30] sm:$0xff] %vm61_vm0, %v1193_v48 }
 0x232   :  { %v1195_v23 = vadd.f32 %v1366_v9, %v1168_v44 }
 0x234   :  { %v1164_v50 = vpop.f32.mrf.mxu1  ;;  %1211 = vst.msk [vmem:[#allocation2 + $0x40] sm:$0xff] %vm61_vm0, %v1195_v23 }
 0x235   :  { %v1165_v14 = vadd.f32 %v2181_v43, %v1164_v50 }
 0x237   :  { %v1194_v41 = vadd.f32 %v1367_v40, %v1165_v14  ;;  %v1169_v28 = vpop.f32.mrf.mxu2 }
 0x238   :  { %v1170_v16 = vadd.f32 %v2181_v43, %v1169_v28 }
 0x239   :  { %1210 = vst.msk [vmem:[#allocation2 + $0x38] sm:$0xff] %vm61_vm0, %v1194_v41 }
 0x23a   :  { %v1196_v18 = vadd.f32 %v1368_v31, %v1170_v16 }
 0x23c   :  { %1212 = vst.msk [vmem:[#allocation2 + $0x48] sm:$0xff] %vm61_vm0, %v1196_v18 }
 0x23f   :  { %v1172_v59 = vpop.f32.mrf.mxu2 }
 0x240   :  { %v1173_v0 = vadd.f32 %v2181_v43, %v1172_v59 }
 0x242   :  { %v1197_v24 = vadd.f32 %v1369_v26, %v1173_v0 }
 0x244   :  { %1213 = vst.msk [vmem:[#allocation2 + $0x50] sm:$0xff] %vm61_vm0, %v1197_v24 }
 0x247   :  { %v1174_v54 = vpop.f32.mrf.mxu2 }
 0x248   :  { %v1175_v42 = vadd.f32 %v2181_v43, %v1174_v54 }
 0x24a   :  { %v1198_v2 = vadd.f32 %v1370_v13, %v1175_v42 }
 0x24c   :  { %1214 = vst.msk [vmem:[#allocation2 + $0x58] sm:$0xff] %vm61_vm0, %v1198_v2 }
 0x24f   :  { %v1177_v3 = vpop.f32.mrf.mxu2 }
 0x250   :  { %v1178_v52 = vadd.f32 %v2181_v43, %v1177_v3 }
 0x252   :  { %v1199_v32 = vadd.f32 %v1371_v45, %v1178_v52 }
 0x254   :  { %1215 = vst.msk [vmem:[#allocation2 + $0x60] sm:$0xff] %vm61_vm0, %v1199_v32 }
 0x257   :  { %v1179_v36 = vpop.f32.mrf.mxu2 }
 0x258   :  { %v1180_v57 = vadd.f32 %v2181_v43, %v1179_v36 }
 0x25a   :  { %v1200_v60 = vadd.f32 %v1372_v58, %v1180_v57 }
 0x25c   :  { %1216 = vst.msk [vmem:[#allocation2 + $0x68] sm:$0xff] %vm61_vm0, %v1200_v60 }
 0x25f   :  { %v1182_v5 = vpop.f32.mrf.mxu2 }
 0x260   :  { %v1183_v12 = vadd.f32 %v2181_v43, %v1182_v5 }
 0x262   :  { %v1201_v47 = vadd.f32 %v1373_v33, %v1183_v12 }
 0x264   :  { %1217 = vst.msk [vmem:[#allocation2 + $0x70] sm:$0xff] %vm61_vm0, %v1201_v47 }
 0x267   :  { %v1184_v62 = vpop.f32.mrf.mxu2 }
 0x268   :  { %v1185_v30 = vadd.f32 %v2181_v43, %v1184_v62 }
 0x26a   :  { %v1202_v51 = vadd.f32 %v1374_v37, %v1185_v30 }
 0x26c   :  { %1218 = vst.msk [vmem:[#allocation2 + $0x78] sm:$0xff] %vm61_vm0, %v1202_v51 }
 0x26d   :  { %1222 = vsyncadd [#allocation3], 1792  ;;  %s1225_s29 = sshll.u32 %s2273_s7, 4  ;;  %s1401_s30 = smov [#allocation2]   ;;  %s1226_s29 = int_to_ptr.hbm [resolvable:$true] %s1225_s29 }
 0x26e   :  { %s1223_s8 = sshll.u32 %s1401_s30, 4  ;;  %s1402_s9 = smov 128   ;;  %s1224_s8 = int_to_ptr.vmem [resolvable:$true] %s1223_s8 }
 0x26f   :  { %s1403_s10 = smov 8  }
 0x270   :  { %1231 = dma.vmem_to_hbm [thread:$0]  %s1224_s8, 256, %s1226_s29, [#allocation3], %s1402_s9, %s1402_s9, %s1403_s10  }
 0x271   :  { %1399 = dma.done.wait [#allocation3], 2048  }
 0x272   :  { %1400 = vsyncadd [#allocation3], 4294965248 }
 0x273   :  { %1236 = vsyncpa [#allocation3], 1 }

// kernel: tpu_custom_call.1
= control target key start
LH: loop header
LB: loop body
LE: loop exit
PB: predicated region body
PF: predicated region fallthrough
CT: control target
= control target key end

     0   :  { %vm61_vm0 = vcmask 261120   ;;  %s2266_s0 = inlined_call_operand.vmem [shape: f32[16,32], index: 0, kind: input, shape index: {}]   ;;  %s2267_s1 = inlined_call_operand.vmem [shape: f32[1,32], index: 1, kind: input, shape index: {}]   ;;  %s2268_s2 = inlined_call_operand.vmem [shape: f32[1,32], index: 2, kind: input, shape index: {}]   ;;  %s2269_s3 = inlined_call_operand.vmem [shape: bf16[32,64], index: 3, kind: input, shape index: {}]   ;;  %s2270_s4 = inlined_call_operand.vmem [shape: f32[1,64], index: 4, kind: input, shape index: {}]   ;;  %s2271_s5 = inlined_call_operand.vmem [shape: bf16[64,32], index: 5, kind: input, shape index: {}]   ;;  %s2272_s6 = inlined_call_operand.vmem [shape: f32[1,32], index: 6, kind: input, shape index: {}]   ;;  %s2273_s7 = inlined_call_operand.hbm [shape: f32[16,32], index: 7, kind: output, shape index: {}]  }
   0x1   :  { %v1447_v0 = vld [vmem:[%s2266_s0] sm:$0xff]  ;;  %v1452_v1 = vld [vmem:[%s2266_s0 + $0x10] sm:$0xff]  ;;  %v1463_v5 = vld [vmem:[%s2266_s0 + $0x8] sm:$0xff] }
   0x2   :  { %v62_v2 = vsel %vm61_vm0, %v1447_v0, 0.0  ;;  %v68_v3 = vsel %vm61_vm0, %v1452_v1, 0.0  ;;  %v126_v4 = vmul.f32 %v1447_v0, %v1447_v0 }
   0x3   :  { %63 = vadd.xlane.f32.xlu0 %v62_v2  ;;  %69 = vadd.xlane.f32.xlu2 %v68_v3 }
   0x4   :  { %12 = vsyncpa [#allocation3], 0  ;;  %v142_v6 = vsel %vm61_vm0, %v126_v4, 0.0  ;;  %v1469_v7 = vld [vmem:[%s2266_s0 + $0x18] sm:$0xff]  ;;  %v127_v8 = vmul.f32 %v1463_v5, %v1463_v5  ;;  %v65_v9 = vsel %vm61_vm0, %v1463_v5, 0.0  ;;  %v128_v12 = vmul.f32 %v1452_v1, %v1452_v1  ;;  %v1483_v13 = vld [vmem:[%s2266_s0 + $0x20] sm:$0xff] }
   0x5   :  { %143 = vadd.xlane.f32.xlu1 %v142_v6  ;;  %v71_v10 = vsel %vm61_vm0, %v1469_v7, 0.0  ;;  %v129_v14 = vmul.f32 %v1469_v7, %v1469_v7  ;;  %v74_v16 = vsel %vm61_vm0, %v1483_v13, 0.0  ;;  %v1493_v17 = vld [vmem:[%s2266_s0 + $0x28] sm:$0xff]  ;;  %v130_v20 = vmul.f32 %v1483_v13, %v1483_v13  ;;  %v1506_v23 = vld [vmem:[%s2266_s0 + $0x30] sm:$0xff]  ;;  %v1514_v26 = vld [vmem:[%s2266_s0 + $0x38] sm:$0xff] }
   0x6   :  { %v145_v11 = vsel %vm61_vm0, %v127_v8, 0.0  ;;  %v148_v15 = vsel %vm61_vm0, %v128_v12, 0.0  ;;  %v131_v19 = vmul.f32 %v1493_v17, %v1493_v17  ;;  %v77_v21 = vsel %vm61_vm0, %v1493_v17, 0.0  ;;  %v1526_v31 = vld [vmem:[%s2266_s0 + $0x48] sm:$0xff]  ;;  %v1531_v32 = vld [vmem:[%s2266_s0 + $0x40] sm:$0xff]  ;;  %v1543_v37 = vld [vmem:[%s2266_s0 + $0x50] sm:$0xff] }
   0x7   :  { %v151_v18 = vsel %vm61_vm0, %v129_v14, 0.0  ;;  %v154_v24 = vsel %vm61_vm0, %v130_v20, 0.0  ;;  %v132_v25 = vmul.f32 %v1506_v23, %v1506_v23  ;;  %v80_v27 = vsel %vm61_vm0, %v1506_v23, 0.0  ;;  %v1553_v41 = vld [vmem:[%s2266_s0 + $0x58] sm:$0xff]  ;;  %v1567_v48 = vld [vmem:[%s2266_s0 + $0x60] sm:$0xff]  ;;  %v1574_v50 = vld [vmem:[%s2266_s0 + $0x68] sm:$0xff] }
   0x8   :  { %v157_v22 = vsel %vm61_vm0, %v131_v19, 0.0  ;;  %v83_v29 = vsel %vm61_vm0, %v1514_v26, 0.0  ;;  %v133_v30 = vmul.f32 %v1514_v26, %v1514_v26  ;;  %v89_v34 = vsel %vm61_vm0, %v1526_v31, 0.0  ;;  %v1586_v55 = vld [vmem:[%s2266_s0 + $0x78] sm:$0xff]  ;;  %v1591_v56 = vld [vmem:[%s2266_s0 + $0x70] sm:$0xff]  ;;  %v1277_v20 = vld [vmem:[%s2269_s3] sm:$0xff] }
   0x9   :  { %v160_v28 = vsel %vm61_vm0, %v132_v25, 0.0  ;;  %v86_v35 = vsel %vm61_vm0, %v1531_v32, 0.0  ;;  %v134_v36 = vmul.f32 %v1531_v32, %v1531_v32  ;;  %v135_v38 = vmul.f32 %v1526_v31, %v1526_v31 }
   0xa   :  { %v163_v33 = vsel %vm61_vm0, %v133_v30, 0.0  ;;  %v92_v40 = vsel %vm61_vm0, %v1543_v37, 0.0  ;;  %v137_v43 = vmul.f32 %v1553_v41, %v1553_v41  ;;  %v136_v44 = vmul.f32 %v1543_v37, %v1543_v37 }
   0xb   :  { %66 = vadd.xlane.f32.xlu0 %v65_v9  ;;  %72 = vadd.xlane.f32.xlu2 %v71_v10  ;;  %v166_v39 = vsel %vm61_vm0, %v134_v36, 0.0  ;;  %v169_v42 = vsel %vm61_vm0, %v135_v38, 0.0  ;;  %v95_v45 = vsel %vm61_vm0, %v1553_v41, 0.0  ;;  %v138_v49 = vmul.f32 %v1567_v48, %v1567_v48 }
   0xc   :  { %v175_v46 = vsel %vm61_vm0, %v137_v43, 0.0  ;;  %v172_v47 = vsel %vm61_vm0, %v136_v44, 0.0  ;;  %v98_v51 = vsel %vm61_vm0, %v1567_v48, 0.0  ;;  %v101_v53 = vsel %vm61_vm0, %v1574_v50, 0.0 }
   0xd   :  { %146 = vadd.xlane.f32.xlu1 %v145_v11  ;;  %v178_v52 = vsel %vm61_vm0, %v138_v49, 0.0  ;;  %v139_v54 = vmul.f32 %v1574_v50, %v1574_v50  ;;  %v107_v58 = vsel %vm61_vm0, %v1586_v55, 0.0  ;;  %v104_v59 = vsel %vm61_vm0, %v1591_v56, 0.0  ;;  %v1278_v11 = vld [vmem:[%s2269_s3 + $0x8] sm:$0xff] }
   0xe   :  { %v140_v60 = vmul.f32 %v1591_v56, %v1591_v56  ;;  %v141_v61 = vmul.f32 %v1586_v55, %v1586_v55  ;;  %550 = vmatpush.bf16.msra.mxu0 %v1278_v11  ;;  %1283 = vmatpush.bf16.msra.mxu3 %v1278_v11 }
   0xf   :  { %v181_v57 = vsel %vm61_vm0, %v139_v54, 0.0 }
  0x10   :  { %v184_v62 = vsel %vm61_vm0, %v140_v60, 0.0  ;;  %v187_v63 = vsel %vm61_vm0, %v141_v61, 0.0 }
  0x12   :  { %551 = vmatpush.bf16.msra.mxu0 %v1277_v20  ;;  %1284 = vmatpush.bf16.msra.mxu3 %v1277_v20 }
  0x13   :  { %149 = vadd.xlane.f32.xlu0 %v148_v15  ;;  %75 = vadd.xlane.f32.xlu2 %v74_v16 }
  0x15   :  { %152 = vadd.xlane.f32.xlu1 %v151_v18 }
  0x1b   :  { %78 = vadd.xlane.f32.xlu0 %v77_v21  ;;  %158 = vadd.xlane.f32.xlu2 %v157_v22 }
  0x1d   :  { %155 = vadd.xlane.f32.xlu1 %v154_v24 }
  0x23   :  { %81 = vadd.xlane.f32.xlu0 %v80_v27  ;;  %161 = vadd.xlane.f32.xlu2 %v160_v28 }
  0x25   :  { %84 = vadd.xlane.f32.xlu1 %v83_v29 }
  0x2b   :  { %164 = vadd.xlane.f32.xlu0 %v163_v33  ;;  %90 = vadd.xlane.f32.xlu2 %v89_v34 }
  0x2d   :  { %87 = vadd.xlane.f32.xlu1 %v86_v35 }
  0x33   :  { %167 = vadd.xlane.f32.xlu0 %v166_v39  ;;  %93 = vadd.xlane.f32.xlu2 %v92_v40 }
  0x35   :  { %170 = vadd.xlane.f32.xlu1 %v169_v42 }
  0x3b   :  { %96 = vadd.xlane.f32.xlu0 %v95_v45  ;;  %176 = vadd.xlane.f32.xlu2 %v175_v46 }
  0x3d   :  { %173 = vadd.xlane.f32.xlu1 %v172_v47 }
  0x43   :  { %99 = vadd.xlane.f32.xlu0 %v98_v51  ;;  %179 = vadd.xlane.f32.xlu2 %v178_v52 }
  0x45   :  { %102 = vadd.xlane.f32.xlu1 %v101_v53 }
  0x4b   :  { %182 = vadd.xlane.f32.xlu0 %v181_v57  ;;  %108 = vadd.xlane.f32.xlu2 %v107_v58 }
  0x4d   :  { %105 = vadd.xlane.f32.xlu1 %v104_v59 }
  0x53   :  { %185 = vadd.xlane.f32.xlu0 %v184_v62 }
  0x55   :  { %188 = vadd.xlane.f32.xlu1 %v187_v63 }
  0x76   :  { %v64_v2 = vpop.xlane.xlu0 %63  ;;  %v70_v3 = vpop.xlane.xlu2 %69 }
  0x77   :  { %v1604_v4 = vmul.f32 0.03125, %v64_v2  ;;  %v1616_v21 = vmul.f32 0.03125, %v70_v3 }
  0x78   :  { %v144_v6 = vpop.xlane.xlu1 %143 }
  0x79   :  { %v206_v8 = vmul.f32 %v1604_v4, %v1604_v4  ;;  %v190_v9 = vmul.f32 0.03125, %v144_v6  ;;  %v208_v28 = vmul.f32 %v1616_v21, %v1616_v21 }
  0x7b   :  { %v222_v10 = vsub.f32 %v190_v9, %v206_v8 }
  0x7d   :  { %v238_v12 = vmax.f32 %v222_v10, 0.0 }
  0x7e   :  { %v67_v14 = vpop.xlane.xlu0 %66  ;;  %v73_v15 = vpop.xlane.xlu2 %72 }
  0x7f   :  { %v1611_v16 = vmul.f32 0.03125, %v67_v14  ;;  %v254_v18 = vadd.f32 1e-06, %v238_v12  ;;  %v1620_v25 = vmul.f32 0.03125, %v73_v15 }
  0x80   :  { %v147_v19 = vpop.xlane.xlu1 %146 }
  0x81   :  { %v207_v22 = vmul.f32 %v1611_v16, %v1611_v16  ;;  %1295 = vrsqrt.f32 %v254_v18  ;;  %v191_v24 = vmul.f32 0.03125, %v147_v19  ;;  %v209_v36 = vmul.f32 %v1620_v25, %v1620_v25 }
  0x82   :  { %vm276_vm2 = vweird.f32 %v254_v18 }
  0x83   :  { %v223_v27 = vsub.f32 %v191_v24, %v207_v22 }
  0x85   :  { %v239_v29 = vmax.f32 %v223_v27, 0.0 }
  0x86   :  { %v150_v30 = vpop.xlane.xlu0 %149  ;;  %v76_v33 = vpop.xlane.xlu2 %75 }
  0x87   :  { %v192_v34 = vmul.f32 0.03125, %v150_v30  ;;  %v1296_v35 = vpop.eup %1295  ;;  %v255_v38 = vadd.f32 1e-06, %v239_v29  ;;  %v1626_v46 = vmul.f32 0.03125, %v76_v33 }
  0x88   :  { %v153_v39 = vpop.xlane.xlu1 %152  ;;  %v271_v40 = vmul.f32 %v1296_v35, %v254_v18  ;;  %vm277_vm1 = vweird.f32 %v1296_v35 }
  0x89   :  { %v224_v42 = vsub.f32 %v192_v34, %v208_v28  ;;  %1297 = vrsqrt.f32 %v255_v38  ;;  %v193_v43 = vmul.f32 0.03125, %v153_v39  ;;  %v210_v60 = vmul.f32 %v1626_v46, %v1626_v46  ;;  %vm1642_vm3 = vmor %vm276_vm2, %vm277_vm1 }
  0x8a   :  { %v272_v44 = vmul.f32 %v1296_v35, %v271_v40  ;;  %v430_v34 = vsub.f32 %v1447_v0, %v1604_v4  ;;  %vm286_vm5 = vweird.f32 %v255_v38  ;;  %v1668_v0 = vld [vmem:[%s2267_s1] ss:$0 sm:$0xff] }
  0x8b   :  { %v240_v45 = vmax.f32 %v224_v42, 0.0  ;;  %v225_v47 = vsub.f32 %v193_v43, %v209_v36 }
  0x8c   :  { %v273_v49 = vmul.f32 0.5, %v272_v44 }
  0x8d   :  { %v1628_v51 = vadd.f32 1e-06, %v240_v45  ;;  %v241_v52 = vmax.f32 %v225_v47, 0.0 }
  0x8e   :  { %v79_v53 = vpop.xlane.xlu0 %78  ;;  %v159_v54 = vpop.xlane.xlu2 %158  ;;  %v274_v57 = vsub.f32 1.5, %v273_v49 }
  0x8f   :  { %1299 = vrsqrt.f32 %v1628_v51  ;;  %v1631_v58 = vmul.f32 0.03125, %v79_v53  ;;  %v1298_v59 = vpop.eup %1297  ;;  %v1635_v61 = vadd.f32 1e-06, %v241_v52  ;;  %v195_v62 = vmul.f32 0.03125, %v159_v54 }
  0x90   :  { %v156_v63 = vpop.xlane.xlu1 %155  ;;  %v281_v2 = vmul.f32 %v1298_v59, %v255_v38  ;;  %v275_v8 = vmul.f32 %v1296_v35, %v274_v57  ;;  %vm287_vm4 = vweird.f32 %v1298_v59  ;;  %v431_v38 = vsub.f32 %v1463_v5, %v1611_v16 }
  0x91   :  { %v211_v3 = vmul.f32 %v1631_v58, %v1631_v58  ;;  %1301 = vrsqrt.f32 %v1635_v61  ;;  %v194_v6 = vmul.f32 0.03125, %v156_v63  ;;  %vm288_vm6 = vmor %vm286_vm5, %vm287_vm4  ;;  %vm296_vm7 = vweird.f32 %v1628_v51 }
  0x92   :  { %v282_v9 = vmul.f32 %v1298_v59, %v281_v2  ;;  %v279_v18 = vsel %vm1642_vm3, %v1296_v35, %v275_v8  ;;  %vm306_vm8 = vweird.f32 %v1635_v61 }
  0x93   :  { %v227_v10 = vsub.f32 %v195_v62, %v211_v3  ;;  %v226_v11 = vsub.f32 %v194_v6, %v210_v60  ;;  %v446_v35 = vmul.f32 %v430_v34, %v279_v18  ;;  %v1683_v3 = vld [vmem:[%s2268_s2] ss:$0 sm:$0xff] }
  0x94   :  { %v283_v14 = vmul.f32 0.5, %v282_v9 }
  0x95   :  { %v1640_v12 = vpop.eup %1299  ;;  %v243_v15 = vmax.f32 %v227_v10, 0.0  ;;  %v242_v22 = vmax.f32 %v226_v11, 0.0  ;;  %v465_v2 = vmul.f32 %v1668_v0, %v446_v35 }
  0x96   :  { %v291_v20 = vmul.f32 %v1640_v12, %v1628_v51  ;;  %v82_v24 = vpop.xlane.xlu0 %81  ;;  %v162_v27 = vpop.xlane.xlu2 %161  ;;  %v284_v28 = vsub.f32 1.5, %v283_v14  ;;  %vm297_vm9 = vweird.f32 %v1640_v12  ;;  %v433_v51 = vsub.f32 %v1469_v7, %v1620_v25 }
  0x97   :  { %v1648_v29 = vadd.f32 1e-06, %v243_v15  ;;  %v1650_v30 = vmul.f32 0.03125, %v82_v24  ;;  %v1654_v33 = vpop.eup %1301  ;;  %v1659_v39 = vadd.f32 1e-06, %v242_v22  ;;  %v196_v44 = vmul.f32 0.03125, %v162_v27  ;;  %vm1712_vm11 = vmor %vm296_vm7, %vm297_vm9 }
  0x98   :  { %v292_v36 = vmul.f32 %v1640_v12, %v291_v20  ;;  %v85_v40 = vpop.xlane.xlu1 %84  ;;  %v285_v42 = vmul.f32 %v1298_v59, %v284_v28  ;;  %v301_v43 = vmul.f32 %v1654_v33, %v1635_v61  ;;  %vm307_vm10 = vweird.f32 %v1654_v33 }
  0x99   :  { %1303 = vrsqrt.f32 %v1648_v29  ;;  %v212_v47 = vmul.f32 %v1650_v30, %v1650_v30  ;;  %v1673_v49 = vmul.f32 0.03125, %v85_v40  ;;  %v484_v22 = vadd.f32 %v1683_v3, %v465_v2  ;;  %vm1719_vm12 = vmor %vm306_vm8, %vm307_vm10 }
  0x9a   :  { %1305 = vrsqrt.f32 %v1659_v39  ;;  %v293_v4 = vmul.f32 0.5, %v292_v36  ;;  %v302_v45 = vmul.f32 %v1654_v33, %v301_v43  ;;  %v289_v52 = vsel %vm288_vm6, %v1298_v59, %v285_v42 }
  0x9b   :  { %v228_v54 = vsub.f32 %v196_v44, %v212_v47  ;;  %v213_v57 = vmul.f32 %v1673_v49, %v1673_v49  ;;  %v447_v63 = vmul.f32 %v431_v38, %v289_v52  ;;  %vm326_vm13 = vweird.f32 %v1648_v29 }
  0x9c   :  { %v303_v53 = vmul.f32 0.5, %v302_v45  ;;  %v294_v8 = vsub.f32 1.5, %v293_v4  ;;  %vm316_vm15 = vweird.f32 %v1659_v39 }
  0x9d   :  { %v244_v16 = vmax.f32 %v228_v54, 0.0  ;;  %v466_v11 = vmul.f32 %v1668_v0, %v447_v63 }
  0x9e   :  { %v165_v60 = vpop.xlane.xlu0 %164  ;;  %v91_v62 = vpop.xlane.xlu2 %90  ;;  %v304_v5 = vsub.f32 1.5, %v303_v53  ;;  %v295_v24 = vmul.f32 %v1640_v12, %v294_v8 }
  0x9f   :  { %v1685_v6 = vpop.eup %1303  ;;  %v197_v59 = vmul.f32 0.03125, %v165_v60  ;;  %v1696_v19 = vadd.f32 1e-06, %v244_v16  ;;  %v1704_v18 = vmul.f32 0.03125, %v91_v62  ;;  %v485_v40 = vadd.f32 %v1683_v3, %v466_v11 }
  0xa0   :  { %v1687_v9 = vpop.eup %1305  ;;  %v88_v10 = vpop.xlane.xlu1 %87  ;;  %v321_v14 = vmul.f32 %v1685_v6, %v1648_v29  ;;  %v305_v27 = vmul.f32 %v1654_v33, %v304_v5  ;;  %v299_v52 = vsel %vm1712_vm11, %v1640_v12, %v295_v24  ;;  %vm327_vm14 = vweird.f32 %v1685_v6 }
  0xa1   :  { %v311_v15 = vmul.f32 %v1687_v9, %v1659_v39  ;;  %v229_v20 = vsub.f32 %v197_v59, %v213_v57  ;;  %1307 = vrsqrt.f32 %v1696_v19  ;;  %v1707_v36 = vmul.f32 0.03125, %v88_v10  ;;  %vm1768_vm2 = vmor %vm326_vm13, %vm327_vm14 }
  0xa2   :  { %v322_v43 = vmul.f32 %v1685_v6, %v321_v14  ;;  %v500_v4 = vpack.c.bf16 %v485_v40, %v484_v22  ;;  %v215_v38 = vmul.f32 %v1704_v18, %v1704_v18  ;;  %v309_v61 = vsel %vm1719_vm12, %v1654_v33, %v305_v27 }
  0xa3   :  { %v312_v28 = vmul.f32 %v1687_v9, %v311_v15  ;;  %v245_v34 = vmax.f32 %v229_v20, 0.0  ;;  %v214_v54 = vmul.f32 %v1707_v36, %v1707_v36  ;;  %v432_v57 = vsub.f32 %v1452_v1, %v1616_v21 }
  0xa4   :  { %1245 = vmatmul.msk.bf16.vlgmr.msra.gmra.mxu0 %vm61_vm0, %v500_v4  ;;  %v323_v60 = vmul.f32 0.5, %v322_v43  ;;  %v449_v63 = vmul.f32 %v433_v51, %v309_v61  ;;  %vm317_vm1 = vweird.f32 %v1687_v9  ;;  %vm336_vm4 = vweird.f32 %v1696_v19 }
  0xa5   :  { %v1723_v35 = vadd.f32 1e-06, %v245_v34  ;;  %v313_v53 = vmul.f32 0.5, %v312_v28  ;;  %v448_v33 = vmul.f32 %v432_v57, %v299_v52  ;;  %vm1781_vm3 = vmor %vm316_vm15, %vm317_vm1 }
  0xa6   :  { %v168_v45 = vpop.xlane.xlu0 %167  ;;  %v94_v47 = vpop.xlane.xlu2 %93  ;;  %v324_v59 = vsub.f32 1.5, %v323_v60  ;;  %v468_v14 = vmul.f32 %v1668_v0, %v449_v63  ;;  %v435_v60 = vsub.f32 %v1493_v17, %v1631_v58 }
  0xa7   :  { %1309 = vrsqrt.f32 %v1723_v35  ;;  %v198_v7 = vmul.f32 0.03125, %v168_v45  ;;  %v1741_v62 = vpop.eup %1307  ;;  %v1743_v2 = vmul.f32 0.03125, %v94_v47  ;;  %v314_v8 = vsub.f32 1.5, %v313_v53 }
  0xa8   :  { %v171_v25 = vpop.xlane.xlu1 %170  ;;  %v331_v10 = vmul.f32 %v1741_v62, %v1696_v19  ;;  %v467_v22 = vmul.f32 %v1668_v0, %v448_v33  ;;  %v325_v42 = vmul.f32 %v1685_v6, %v324_v59  ;;  %v487_v51 = vadd.f32 %v1683_v3, %v468_v14 }
  0xa9   :  { %v199_v12 = vmul.f32 0.03125, %v171_v25  ;;  %v230_v5 = vsub.f32 %v198_v7, %v214_v54  ;;  %v216_v15 = vmul.f32 %v1743_v2, %v1743_v2  ;;  %v315_v24 = vmul.f32 %v1687_v9, %v314_v8 }
  0xaa   :  { %v332_v43 = vmul.f32 %v1741_v62, %v331_v10  ;;  %v486_v7 = vadd.f32 %v1683_v3, %v467_v22  ;;  %v329_v57 = vsel %vm1768_vm2, %v1685_v6, %v325_v42  ;;  %vm337_vm5 = vweird.f32 %v1741_v62 }
  0xab   :  { %v231_v16 = vsub.f32 %v199_v12, %v215_v38  ;;  %v246_v27 = vmax.f32 %v230_v5, 0.0  ;;  %v434_v38 = vsub.f32 %v1483_v13, %v1626_v46  ;;  %v319_v13 = vsel %vm1781_vm3, %v1687_v9, %v315_v24  ;;  %vm1827_vm6 = vmor %vm336_vm4, %vm337_vm5 }
  0xac   :  { %v333_v46 = vmul.f32 0.5, %v332_v43  ;;  %v501_v63 = vpack.c.bf16 %v487_v51, %v486_v7  ;;  %v451_v17 = vmul.f32 %v435_v60, %v329_v57  ;;  %v436_v19 = vsub.f32 %v1506_v23, %v1650_v30 }
  0xad   :  { %v1747_v11 = vpop.eup %1309  ;;  %v247_v20 = vmax.f32 %v231_v16, 0.0  ;;  %v1787_v53 = vadd.f32 1e-06, %v246_v27  ;;  %v450_v16 = vmul.f32 %v434_v38, %v319_v13  ;;  %vm346_vm7 = vweird.f32 %v1723_v35 }
  0xae   :  { %v97_v1 = vpop.xlane.xlu0 %96  ;;  %v177_v21 = vpop.xlane.xlu2 %176  ;;  %v341_v44 = vmul.f32 %v1747_v11, %v1723_v35  ;;  %v334_v58 = vsub.f32 1.5, %v333_v46  ;;  %v470_v22 = vmul.f32 %v1668_v0, %v451_v17  ;;  %vm347_vm8 = vweird.f32 %v1747_v11 }
  0xaf   :  { %v1758_v28 = vmul.f32 0.03125, %v97_v1  ;;  %v201_v34 = vmul.f32 0.03125, %v177_v21  ;;  %v1785_v29 = vadd.f32 1e-06, %v247_v20  ;;  %v440_v51 = vsub.f32 %v1543_v37, %v1743_v2  ;;  %vm1859_vm9 = vmor %vm346_vm7, %vm347_vm8 }
  0xb0   :  { %v174_v40 = vpop.xlane.xlu1 %173  ;;  %v342_v25 = vmul.f32 %v1747_v11, %v341_v44  ;;  %v335_v27 = vmul.f32 %v1741_v62, %v334_v58  ;;  %v437_v44 = vsub.f32 %v1514_v26, %v1673_v49  ;;  %vm356_vm15 = vweird.f32 %v1787_v53 }
  0xb1   :  { %v200_v4 = vmul.f32 0.03125, %v174_v40  ;;  %v217_v47 = vmul.f32 %v1758_v28, %v1758_v28  ;;  %1311 = vrsqrt.f32 %v1785_v29  ;;  %vm366_vm2 = vweird.f32 %v1785_v29 }
  0xb2   :  { %1313 = vrsqrt.f32 %v1787_v53  ;;  %v343_v1 = vmul.f32 0.5, %v342_v25 }
  0xb3   :  { %v232_v61 = vsub.f32 %v200_v4, %v216_v15  ;;  %v233_v54 = vsub.f32 %v201_v34, %v217_v47  ;;  %v469_v15 = vmul.f32 %v1668_v0, %v450_v16 }
  0xb4   :  { %1246 = vmatmul.msk.bf16.gmra.mxu0 %vm61_vm0, %v501_v63  ;;  %v344_v34 = vsub.f32 1.5, %v343_v1 }
  0xb5   :  { %v248_v39 = vmax.f32 %v232_v61, 0.0  ;;  %v249_v12 = vmax.f32 %v233_v54, 0.0  ;;  %v488_v23 = vadd.f32 %v1683_v3, %v469_v15  ;;  %v489_v61 = vadd.f32 %v1683_v3, %v470_v22 }
  0xb6   :  { %v100_v33 = vpop.xlane.xlu0 %99  ;;  %v180_v8 = vpop.xlane.xlu2 %179  ;;  %v345_v13 = vmul.f32 %v1747_v11, %v344_v34 }
  0xb7   :  { %v1800_v5 = vadd.f32 1e-06, %v248_v39  ;;  %v1802_v9 = vmul.f32 0.03125, %v100_v33  ;;  %v1805_v59 = vadd.f32 1e-06, %v249_v12  ;;  %v202_v6 = vmul.f32 0.03125, %v180_v8  ;;  %v1818_v24 = vpop.eup %1311 }
  0xb8   :  { %v103_v10 = vpop.xlane.xlu1 %102  ;;  %v1823_v42 = vpop.eup %1313  ;;  %v361_v52 = vmul.f32 %v1818_v24, %v1785_v29  ;;  %v339_v39 = vsel %vm1827_vm6, %v1741_v62, %v335_v27  ;;  %v349_v17 = vsel %vm1859_vm9, %v1747_v11, %v345_v13  ;;  %v502_v1 = vpack.c.bf16 %v489_v61, %v488_v23 }
  0xb9   :  { %1315 = vrsqrt.f32 %v1800_v5  ;;  %v218_v21 = vmul.f32 %v1802_v9, %v1802_v9  ;;  %v1814_v14 = vmul.f32 0.03125, %v103_v10  ;;  %v351_v60 = vmul.f32 %v1823_v42, %v1787_v53 }
  0xba   :  { %1317 = vrsqrt.f32 %v1805_v59  ;;  %vm376_vm10 = vweird.f32 %v1800_v5  ;;  %v362_v35 = vmul.f32 %v1818_v24, %v361_v52  ;;  %vm386_vm11 = vweird.f32 %v1805_v59 }
  0xbb   :  { %v234_v20 = vsub.f32 %v202_v6, %v218_v21  ;;  %v219_v40 = vmul.f32 %v1814_v14, %v1814_v14  ;;  %v352_v43 = vmul.f32 %v1823_v42, %v351_v60  ;;  %vm357_vm3 = vweird.f32 %v1823_v42 }
  0xbc   :  { %v363_v23 = vmul.f32 0.5, %v362_v35  ;;  %vm367_vm6 = vweird.f32 %v1818_v24 }
  0xbd   :  { %v250_v4 = vmax.f32 %v234_v20, 0.0  ;;  %v452_v20 = vmul.f32 %v436_v19, %v339_v39  ;;  %v441_v19 = vsub.f32 %v1553_v41, %v1758_v28 }
  0xbe   :  { %v183_v45 = vpop.xlane.xlu0 %182  ;;  %v109_v7 = vpop.xlane.xlu2 %108 }
  0xbf   :  { %v1834_v47 = vpop.eup %1315  ;;  %v203_v38 = vmul.f32 0.03125, %v183_v45  ;;  %v1846_v49 = vadd.f32 1e-06, %v250_v4  ;;  %v1871_v8 = vmul.f32 0.03125, %v109_v7 }
  0xc0   :  { %v1840_v30 = vpop.eup %1317  ;;  %v371_v26 = vmul.f32 %v1834_v47, %v1800_v5  ;;  %v106_v54 = vpop.xlane.xlu1 %105  ;;  %vm377_vm12 = vweird.f32 %v1834_v47 }
  0xc1   :  { %v381_v46 = vmul.f32 %v1840_v30, %v1805_v59  ;;  %v235_v25 = vsub.f32 %v203_v38, %v219_v40  ;;  %1319 = vrsqrt.f32 %v1846_v49  ;;  %v1867_v63 = vmul.f32 0.03125, %v106_v54  ;;  %vm1886_vm14 = vmor %vm376_vm10, %vm377_vm12 }
  0xc2   :  { %v372_v12 = vmul.f32 %v1834_v47, %v371_v26  ;;  %vm387_vm13 = vweird.f32 %v1840_v30  ;;  %v221_v34 = vmul.f32 %v1871_v8, %v1871_v8  ;;  %v453_v38 = vmul.f32 %v437_v44, %v349_v17  ;;  %vm1947_vm10 = vmor %vm356_vm15, %vm357_vm3 }
  0xc3   :  { %v382_v33 = vmul.f32 %v1840_v30, %v381_v46  ;;  %v251_v62 = vmax.f32 %v235_v25, 0.0  ;;  %v220_v21 = vmul.f32 %v1867_v63, %v1867_v63  ;;  %vm1903_vm1 = vmor %vm386_vm11, %vm387_vm13  ;;  %v471_v26 = vmul.f32 %v1668_v0, %v452_v20 }
  0xc4   :  { %v373_v16 = vmul.f32 0.5, %v372_v12  ;;  %1247 = vmatmul.msk.bf16.gmra.mxu0 %vm61_vm0, %v502_v1  ;;  %v353_v46 = vmul.f32 0.5, %v352_v43  ;;  %v472_v39 = vmul.f32 %v1668_v0, %v453_v38  ;;  %v364_v12 = vsub.f32 1.5, %v363_v23  ;;  %vm1955_vm11 = vmor %vm366_vm2, %vm367_vm6 }
  0xc5   :  { %v383_v6 = vmul.f32 0.5, %v382_v33  ;;  %v1877_v10 = vadd.f32 1e-06, %v251_v62  ;;  %vm396_vm4 = vweird.f32 %v1846_v49  ;;  %v490_v53 = vadd.f32 %v1683_v3, %v471_v26 }
  0xc6   :  { %v374_v58 = vsub.f32 1.5, %v373_v16  ;;  %v186_v15 = vpop.xlane.xlu0 %185 }
  0xc7   :  { %v384_v22 = vsub.f32 1.5, %v383_v6  ;;  %1321 = vrsqrt.f32 %v1877_v10  ;;  %v204_v11 = vmul.f32 0.03125, %v186_v15  ;;  %v1893_v40 = vpop.eup %1319  ;;  %v354_v6 = vsub.f32 1.5, %v353_v46 }
  0xc8   :  { %v375_v4 = vmul.f32 %v1834_v47, %v374_v58  ;;  %v189_v45 = vpop.xlane.xlu1 %188  ;;  %v391_v41 = vmul.f32 %v1893_v40, %v1846_v49  ;;  %vm397_vm5 = vweird.f32 %v1893_v40  ;;  %vm406_vm8 = vweird.f32 %v1877_v10 }
  0xc9   :  { %v385_v52 = vmul.f32 %v1840_v30, %v384_v22  ;;  %v205_v28 = vmul.f32 0.03125, %v189_v45  ;;  %v236_v59 = vsub.f32 %v204_v11, %v220_v21  ;;  %v491_v21 = vadd.f32 %v1683_v3, %v472_v39  ;;  %vm1938_vm7 = vmor %vm396_vm4, %vm397_vm5 }
  0xca   :  { %v379_v61 = vsel %vm1886_vm14, %v1834_v47, %v375_v4  ;;  %v392_v44 = vmul.f32 %v1893_v40, %v391_v41  ;;  %v355_v49 = vmul.f32 %v1823_v42, %v354_v6  ;;  %v30_v6 = vld [vmem:[%s2270_s4] sm:$0x1]  ;;  %vm1113_vm4 = vcmask 523264  }
  0xcb   :  { %v237_v54 = vsub.f32 %v205_v28, %v221_v34  ;;  %v389_v7 = vsel %vm1903_vm1, %v1840_v30, %v385_v52  ;;  %v456_v13 = vmul.f32 %v440_v51, %v379_v61  ;;  %v252_v25 = vmax.f32 %v236_v59, 0.0 }
  0xcc   :  { %v457_v57 = vmul.f32 %v441_v19, %v389_v7  ;;  %v393_v33 = vmul.f32 0.5, %v392_v44  ;;  %v365_v34 = vmul.f32 %v1818_v24, %v364_v12  ;;  %v443_v19 = vsub.f32 %v1574_v50, %v1814_v14 }
  0xcd   :  { %v1322_v60 = vpop.eup %1321  ;;  %v253_v47 = vmax.f32 %v237_v54, 0.0  ;;  %v475_v62 = vmul.f32 %v1668_v0, %v456_v13  ;;  %v268_v30 = vadd.f32 1e-06, %v252_v25  ;;  %v503_v38 = vpack.c.bf16 %v491_v21, %v490_v53 }
  0xce   :  { %v401_v35 = vmul.f32 %v1322_v60, %v1877_v10  ;;  %v476_v16 = vmul.f32 %v1668_v0, %v457_v57  ;;  %v394_v37 = vsub.f32 1.5, %v393_v33  ;;  %vm407_vm9 = vweird.f32 %v1322_v60 }
  0xcf   :  { %v269_v2 = vadd.f32 1e-06, %v253_v47  ;;  %v494_v51 = vadd.f32 %v1683_v3, %v475_v62  ;;  %1323 = vrsqrt.f32 %v268_v30  ;;  %v442_v10 = vsub.f32 %v1567_v48, %v1802_v9  ;;  %vm1965_vm12 = vmor %vm406_vm8, %vm407_vm9 }
  0xd0   :  { %v402_v17 = vmul.f32 %v1322_v60, %v401_v35  ;;  %v495_v58 = vadd.f32 %v1683_v3, %v476_v16  ;;  %v395_v1 = vmul.f32 %v1893_v40, %v394_v37  ;;  %v439_v9 = vsub.f32 %v1526_v31, %v1704_v18 }
  0xd1   :  { %1325 = vrsqrt.f32 %v269_v2  ;;  %v369_v50 = vsel %vm1955_vm11, %v1818_v24, %v365_v34  ;;  %v359_v52 = vsel %vm1947_vm10, %v1823_v42, %v355_v49  ;;  %v438_v28 = vsub.f32 %v1531_v32, %v1707_v36 }
  0xd2   :  { %v403_v20 = vmul.f32 0.5, %v402_v17  ;;  %v505_v22 = vpack.c.bf16 %v495_v58, %v494_v51  ;;  %v399_v29 = vsel %vm1938_vm7, %v1893_v40, %v395_v1  ;;  %v455_v26 = vmul.f32 %v439_v9, %v369_v50 }
  0xd3   :  { %v458_v41 = vmul.f32 %v442_v10, %v399_v29  ;;  %v454_v24 = vmul.f32 %v438_v28, %v359_v52  ;;  %vm416_vm13 = vweird.f32 %v268_v30  ;;  %vm426_vm15 = vweird.f32 %v269_v2 }
  0xd4   :  { %v404_v43 = vsub.f32 1.5, %v403_v20  ;;  %1250 = vmatmul.msk.bf16.vlgmr.msra.gmra.mxu3 %vm61_vm0, %v505_v22  ;;  %1248 = vmatmul.msk.bf16.gmra.mxu0 %vm61_vm0, %v503_v38  ;;  %v474_v46 = vmul.f32 %v1668_v0, %v455_v26  ;;  %v445_v12 = vsub.f32 %v1586_v55, %v1871_v8  ;;  %v31_v17 = vpack.c.bf16 %v30_v6, %v30_v6 }
  0xd5   :  { %v1324_v4 = vpop.eup %1323  ;;  %v477_v42 = vmul.f32 %v1668_v0, %v458_v41  ;;  %v473_v39 = vmul.f32 %v1668_v0, %v454_v24 }
  0xd6   :  { %v405_v45 = vmul.f32 %v1322_v60, %v404_v43  ;;  %v411_v23 = vmul.f32 %v1324_v4, %v268_v30  ;;  %vm417_vm14 = vweird.f32 %v1324_v4  ;;  %v493_v33 = vadd.f32 %v1683_v3, %v474_v46 }
  0xd7   :  { %v1326_v48 = vpop.eup %1325  ;;  %vm418_vm2 = vmor %vm416_vm13, %vm417_vm14  ;;  %v496_v57 = vadd.f32 %v1683_v3, %v477_v42  ;;  %v492_v30 = vadd.f32 %v1683_v3, %v473_v39  ;;  %v610_v58 = vpack.i.b16 %v31_v17, %v31_v17  ;;  %v1280_v39 = vld [vmem:[%s2271_s5 + $0x8] sm:$0xff] }
  0xd8   :  { %v421_v14 = vmul.f32 %v1326_v48, %v269_v2  ;;  %v409_v40 = vsel %vm1965_vm12, %v1322_v60, %v405_v45  ;;  %v412_v31 = vmul.f32 %v1324_v4, %v411_v23  ;;  %vm427_vm1 = vweird.f32 %v1326_v48 }
  0xd9   :  { %v459_v18 = vmul.f32 %v443_v19, %v409_v40  ;;  %vm428_vm3 = vmor %vm426_vm15, %vm427_vm1  ;;  %v444_v60 = vsub.f32 %v1591_v56, %v1867_v63  ;;  %v504_v16 = vpack.c.bf16 %v493_v33, %v492_v30  ;;  %v612_v1 = vperm.slane %v610_v58, 0  ;;  %v1282_v40 = vld [vmem:[%s2271_s5 + $0x18] sm:$0xff] }
  0xda   :  { %v422_v59 = vmul.f32 %v1326_v48, %v421_v14  ;;  %v413_v61 = vmul.f32 0.5, %v412_v31  ;;  %1142 = vmatpush.bf16.msra.mxu1 %v1282_v40  ;;  %1285 = vmatpush.bf16.msra.mxu2 %v1282_v40 }
  0xdb   :  { %v478_v44 = vmul.f32 %v1668_v0, %v459_v18  ;;  %v2007_v20 = vunpack.c.l.bf16 %v612_v1 }
  0xdc   :  { %v423_v54 = vmul.f32 0.5, %v422_v59  ;;  %v414_v7 = vsub.f32 1.5, %v413_v61 }
  0xdd   :  { %v497_v32 = vadd.f32 %v1683_v3, %v478_v44  ;;  %v1281_v44 = vld [vmem:[%s2271_s5 + $0x10] sm:$0xff] }
  0xde   :  { %v424_v13 = vsub.f32 1.5, %v423_v54  ;;  %v415_v36 = vmul.f32 %v1324_v4, %v414_v7  ;;  %1143 = vmatpush.bf16.msra.mxu1 %v1281_v44  ;;  %1286 = vmatpush.bf16.msra.mxu2 %v1281_v44 }
  0xdf   :  { %v506_v47 = vpack.c.bf16 %v497_v32, %v496_v57 }
  0xe0   :  { %v425_v25 = vmul.f32 %v1326_v48, %v424_v13  ;;  %v419_v35 = vsel %vm418_vm2, %v1324_v4, %v415_v36 }
  0xe1   :  { %v460_v37 = vmul.f32 %v444_v60, %v419_v35 }
  0xe2   :  { %v429_v62 = vsel %vm428_vm3, %v1326_v48, %v425_v25  ;;  %1144 = vmatpush.bf16.msra.mxu1 %v1280_v39  ;;  %1287 = vmatpush.bf16.msra.mxu2 %v1280_v39 }
  0xe3   :  { %v461_v2 = vmul.f32 %v445_v12, %v429_v62  ;;  %v479_v51 = vmul.f32 %v1668_v0, %v460_v37 }
  0xe4   :  { %1251 = vmatmul.msk.bf16.gmra.mxu3 %vm61_vm0, %v506_v47  ;;  %1249 = vmatmul.msk.bf16.gmra.mxu0 %vm61_vm0, %v504_v16 }
  0xe5   :  { %v480_v56 = vmul.f32 %v1668_v0, %v461_v2  ;;  %v498_v55 = vadd.f32 %v1683_v3, %v479_v51  ;;  %v1279_v2 = vld [vmem:[%s2271_s5] sm:$0xff] }
  0xe6   :  { %1145 = vmatpush.bf16.msra.mxu1 %v1279_v2  ;;  %1288 = vmatpush.bf16.msra.mxu2 %v1279_v2 }
  0xe7   :  { %v499_v63 = vadd.f32 %v1683_v3, %v480_v56 }
  0xe9   :  { %v507_v8 = vpack.c.bf16 %v499_v63, %v498_v55 }
  0xf4   :  { %1252 = vmatmul.msk.bf16.gmra.mxu3 %vm61_vm0, %v507_v8 }
 0x121   :  { %v553_v21 = vpop.f32.mrf.mxu0 }
 0x122   :  { %v593_v15 = vpack.c.bf16 %v553_v21, %v553_v21 }
 0x124   :  { %v613_v22 = vunpack.c.l.bf16 %v593_v15 }
 0x126   :  { %v630_v0 = vadd.f32 %v2007_v20, %v613_v22 }
 0x128   :  { %v646_v27 = vpack.c.bf16 %v630_v0, %v630_v0 }
 0x129   :  { %v555_v34 = vpop.f32.mrf.mxu0 }
 0x12a   :  { %v2010_v3 = vunpack.c.l.bf16 %v646_v27  ;;  %v594_v49 = vpack.c.bf16 %v555_v34, %v555_v34 }
 0x12c   :  { %v710_v11 = vmul.f32 %v2010_v3, %v2010_v3  ;;  %v614_v10 = vunpack.c.l.bf16 %v594_v49 }
 0x12e   :  { %v726_v43 = vpack.c.bf16 %v710_v11, %v710_v11  ;;  %v631_v53 = vadd.f32 %v2007_v20, %v614_v10 }
 0x130   :  { %v742_v19 = vunpack.c.l.bf16 %v726_v43  ;;  %v647_v5 = vpack.c.bf16 %v631_v53, %v631_v53 }
 0x131   :  { %v558_v29 = vpop.f32.mrf.mxu0 }
 0x132   :  { %v758_v4 = vmul.f32 %v742_v19, %v2010_v3  ;;  %v2016_v45 = vunpack.c.l.bf16 %v647_v5  ;;  %v595_v38 = vpack.c.bf16 %v558_v29, %v558_v29 }
 0x134   :  { %v774_v48 = vpack.c.bf16 %v758_v4, %v758_v4  ;;  %v711_v9 = vmul.f32 %v2016_v45, %v2016_v45  ;;  %v615_v23 = vunpack.c.l.bf16 %v595_v38  ;;  %v679_v40 = vmul.f32 0.5, %v2016_v45 }
 0x136   :  { %v790_v50 = vunpack.c.l.bf16 %v774_v48  ;;  %v727_v14 = vpack.c.bf16 %v711_v9, %v711_v9  ;;  %v632_v52 = vadd.f32 %v2007_v20, %v615_v23 }
 0x138   :  { %v806_v41 = vmul.f32 0.044677734, %v790_v50  ;;  %v743_v28 = vunpack.c.l.bf16 %v727_v14  ;;  %v648_v31 = vpack.c.bf16 %v632_v52, %v632_v52  ;;  %v678_v14 = vmul.f32 0.5, %v2010_v3 }
 0x139   :  { %v560_v18 = vpop.f32.mrf.mxu0 }
 0x13a   :  { %v822_v59 = vpack.c.bf16 %v806_v41, %v806_v41  ;;  %v759_v26 = vmul.f32 %v743_v28, %v2016_v45  ;;  %v2025_v61 = vunpack.c.l.bf16 %v648_v31  ;;  %v596_v24 = vpack.c.bf16 %v560_v18, %v560_v18 }
 0x13c   :  { %v838_v54 = vunpack.c.l.bf16 %v822_v59  ;;  %v775_v42 = vpack.c.bf16 %v759_v26, %v759_v26  ;;  %v712_v7 = vmul.f32 %v2025_v61, %v2025_v61  ;;  %v616_v13 = vunpack.c.l.bf16 %v596_v24 }
 0x13d   :  { %v680_v26 = vmul.f32 0.5, %v2025_v61 }
 0x13e   :  { %v854_v46 = vadd.f32 %v838_v54, %v2010_v3  ;;  %v791_v32 = vunpack.c.l.bf16 %v775_v42  ;;  %v728_v36 = vpack.c.bf16 %v712_v7, %v712_v7  ;;  %v633_v25 = vadd.f32 %v2007_v20, %v616_v13 }
 0x13f   :  { %v694_v7 = vpack.c.bf16 %v678_v14, %v678_v14 }
 0x140   :  { %v870_v57 = vpack.c.bf16 %v854_v46, %v854_v46  ;;  %v807_v60 = vmul.f32 0.044677734, %v791_v32  ;;  %v744_v12 = vunpack.c.l.bf16 %v728_v36  ;;  %v649_v33 = vpack.c.bf16 %v633_v25, %v633_v25 }
 0x141   :  { %v563_v47 = vpop.f32.mrf.mxu0  ;;  %v695_v32 = vpack.c.bf16 %v679_v40, %v679_v40 }
 0x142   :  { %v886_v62 = vunpack.c.l.bf16 %v870_v57  ;;  %v823_v35 = vpack.c.bf16 %v807_v60, %v807_v60  ;;  %v760_v30 = vmul.f32 %v744_v12, %v2025_v61  ;;  %v2038_v16 = vunpack.c.l.bf16 %v649_v33 }
 0x143   :  { %v597_v37 = vpack.c.bf16 %v563_v47, %v563_v47  ;;  %v696_v57 = vpack.c.bf16 %v680_v26, %v680_v26 }
 0x144   :  { %v839_v51 = vunpack.c.l.bf16 %v823_v35  ;;  %v776_v56 = vpack.c.bf16 %v760_v30, %v760_v30  ;;  %v713_v55 = vmul.f32 %v2038_v16, %v2038_v16  ;;  %v902_v63 = vmul.f32 0.796875, %v886_v62 }
 0x145   :  { %v617_v8 = vunpack.c.l.bf16 %v597_v37 }
 0x146   :  { %v855_v6 = vadd.f32 %v839_v51, %v2016_v45  ;;  %v792_v17 = vunpack.c.l.bf16 %v776_v56  ;;  %v729_v58 = vpack.c.bf16 %v713_v55, %v713_v55  ;;  %v918_v1 = vpack.c.bf16 %v902_v63, %v902_v63 }
 0x147   :  { %v634_v21 = vadd.f32 %v2007_v20, %v617_v8  ;;  %v1030_v63 = vunpack.c.l.bf16 %v694_v7 }
 0x148   :  { %v871_v15 = vpack.c.bf16 %v855_v6, %v855_v6  ;;  %v745_v22 = vunpack.c.l.bf16 %v729_v58  ;;  %v934_v0 = vunpack.c.l.bf16 %v918_v1  ;;  %v808_v27 = vmul.f32 0.044677734, %v792_v17 }
 0x149   :  { %v650_v34 = vpack.c.bf16 %v634_v21, %v634_v21  ;;  %v565_v49 = vpop.f32.mrf.mxu0  ;;  %v2066_v58 = vunpack.c.l.bf16 %v696_v57 }
 0x14a   :  { %v887_v11 = vunpack.c.l.bf16 %v871_v15  ;;  %v761_v10 = vmul.f32 %v745_v22, %v2038_v16  ;;  %v598_v43 = vpack.c.bf16 %v565_v49, %v565_v49  ;;  %1327 = vtanh.f32 %v934_v0 }
 0x14b   :  { %v2048_v53 = vunpack.c.l.bf16 %v650_v34  ;;  %v824_v4 = vpack.c.bf16 %v808_v27, %v808_v27  ;;  %v2069_v0 = vmul.f32 0.5, %v2038_v16 }
 0x14c   :  { %v777_v19 = vpack.c.bf16 %v761_v10, %v761_v10  ;;  %v618_v5 = vunpack.c.l.bf16 %v598_v43  ;;  %v903_v29 = vmul.f32 0.796875, %v887_v11 }
 0x14d   :  { %v714_v38 = vmul.f32 %v2048_v53, %v2048_v53  ;;  %v840_v31 = vunpack.c.l.bf16 %v824_v4 }
 0x14e   :  { %v793_v48 = vunpack.c.l.bf16 %v777_v19  ;;  %v635_v9 = vadd.f32 %v2007_v20, %v618_v5  ;;  %v919_v23 = vpack.c.bf16 %v903_v29, %v903_v29 }
 0x14f   :  { %v730_v50 = vpack.c.bf16 %v714_v38, %v714_v38  ;;  %v856_v36 = vadd.f32 %v840_v31, %v2025_v61  ;;  %v1031_v61 = vunpack.c.l.bf16 %v695_v32 }
 0x150   :  { %v651_v52 = vpack.c.bf16 %v635_v9, %v635_v9  ;;  %v935_v41 = vunpack.c.l.bf16 %v919_v23  ;;  %v1328_v28 = vpop.eup %1327  ;;  %v809_v18 = vmul.f32 0.044677734, %v793_v48 }
 0x151   :  { %v568_v59 = vpop.f32.mrf.mxu0  ;;  %v746_v24 = vunpack.c.l.bf16 %v730_v50  ;;  %v966_v13 = vpack.c.bf16 %v1328_v28, %v1328_v28  ;;  %v872_v51 = vpack.c.bf16 %v856_v36, %v856_v36 }
 0x152   :  { %v2056_v44 = vunpack.c.l.bf16 %v651_v52  ;;  %v599_v54 = vpack.c.bf16 %v568_v59, %v568_v59  ;;  %1329 = vtanh.f32 %v935_v41  ;;  %v825_v25 = vpack.c.bf16 %v809_v18, %v809_v18 }
 0x153   :  { %v982_v39 = vunpack.c.l.bf16 %v966_v13  ;;  %v762_v60 = vmul.f32 %v746_v24, %v2048_v53  ;;  %v888_v10 = vunpack.c.l.bf16 %v872_v51 }
 0x154   :  { %v715_v3 = vmul.f32 %v2056_v44, %v2056_v44  ;;  %v619_v46 = vunpack.c.l.bf16 %v599_v54  ;;  %v841_v56 = vunpack.c.l.bf16 %v825_v25 }
 0x155   :  { %v998_v62 = vadd.f32 1.0, %v982_v39  ;;  %v778_v8 = vpack.c.bf16 %v762_v60, %v762_v60  ;;  %v2081_v59 = vmul.f32 0.796875, %v888_v10 }
 0x156   :  { %v731_v12 = vpack.c.bf16 %v715_v3, %v715_v3  ;;  %v636_v33 = vadd.f32 %v2007_v20, %v619_v46  ;;  %v857_v43 = vadd.f32 %v841_v56, %v2038_v16 }
 0x157   :  { %v578_v42 = vpop.f32.mrf.mxu3  ;;  %v1014_v22 = vpack.c.bf16 %v998_v62, %v998_v62  ;;  %v794_v29 = vunpack.c.l.bf16 %v778_v8 }
 0x158   :  { %v603_v45 = vpack.c.bf16 %v578_v42, %v578_v42  ;;  %v747_v35 = vunpack.c.l.bf16 %v731_v12  ;;  %v652_v30 = vpack.c.bf16 %v636_v33, %v636_v33  ;;  %v1330_v2 = vpop.eup %1329  ;;  %v873_v28 = vpack.c.bf16 %v857_v43, %v857_v43 }
 0x159   :  { %v570_v55 = vpop.f32.mrf.mxu0  ;;  %v967_v15 = vpack.c.bf16 %v1330_v2, %v1330_v2  ;;  %v1046_v50 = vunpack.c.l.bf16 %v1014_v22  ;;  %v810_v26 = vmul.f32 0.044677734, %v794_v29  ;;  %v920_v22 = vpack.c.bf16 %v2081_v59, %v2081_v59 }
 0x15a   :  { %v623_v47 = vunpack.c.l.bf16 %v603_v45  ;;  %v2064_v6 = vunpack.c.l.bf16 %v652_v30  ;;  %v600_v1 = vpack.c.bf16 %v570_v55, %v570_v55  ;;  %v763_v27 = vmul.f32 %v747_v35, %v2056_v44 }
 0x15b   :  { %v983_v5 = vunpack.c.l.bf16 %v967_v15  ;;  %v1062_v45 = vmul.f32 %v1046_v50, %v1030_v63  ;;  %v826_v62 = vpack.c.bf16 %v810_v26, %v810_v26 }
 0x15c   :  { %v640_v37 = vadd.f32 %v2007_v20, %v623_v47  ;;  %v716_v34 = vmul.f32 %v2064_v6, %v2064_v6  ;;  %v620_v19 = vunpack.c.l.bf16 %v600_v1  ;;  %v779_v14 = vpack.c.bf16 %v763_v27, %v763_v27 }
 0x15d   :  { %v999_v23 = vadd.f32 1.0, %v983_v5  ;;  %v889_v47 = vunpack.c.l.bf16 %v873_v28  ;;  %v842_v27 = vunpack.c.l.bf16 %v826_v62 }
 0x15e   :  { %v656_v17 = vpack.c.bf16 %v640_v37, %v640_v37  ;;  %v732_v4 = vpack.c.bf16 %v716_v34, %v716_v34  ;;  %v637_v9 = vadd.f32 %v2007_v20, %v620_v19  ;;  %v795_v32 = vunpack.c.l.bf16 %v779_v14 }
 0x15f   :  { %v580_v21 = vpop.f32.mrf.mxu3  ;;  %v1015_v18 = vpack.c.bf16 %v999_v23, %v999_v23  ;;  %v905_v10 = vmul.f32 0.796875, %v889_v47 }
 0x160   :  { %v2074_v49 = vunpack.c.l.bf16 %v656_v17  ;;  %v604_v11 = vpack.c.bf16 %v580_v21, %v580_v21  ;;  %v748_v52 = vunpack.c.l.bf16 %v732_v4  ;;  %v653_v16 = vpack.c.bf16 %v637_v9, %v637_v9 }
 0x161   :  { %v573_v31 = vpop.f32.mrf.mxu0  ;;  %v1047_v46 = vunpack.c.l.bf16 %v1015_v18  ;;  %v811_v55 = vmul.f32 0.044677734, %v795_v32  ;;  %v697_v17 = vpack.c.bf16 %v2069_v0, %v2069_v0 }
 0x162   :  { %v720_v38 = vmul.f32 %v2074_v49, %v2074_v49  ;;  %v624_v48 = vunpack.c.l.bf16 %v604_v11  ;;  %v764_v24 = vmul.f32 %v748_v52, %v2064_v6  ;;  %v2084_v7 = vunpack.c.l.bf16 %v653_v16 }
 0x163   :  { %v601_v13 = vpack.c.bf16 %v573_v31, %v573_v31  ;;  %v1063_v33 = vmul.f32 %v1047_v46, %v1031_v61 }
 0x164   :  { %v736_v40 = vpack.c.bf16 %v720_v38, %v720_v38  ;;  %v641_v41 = vadd.f32 %v2007_v20, %v624_v48  ;;  %v780_v36 = vpack.c.bf16 %v764_v24, %v764_v24  ;;  %v717_v57 = vmul.f32 %v2084_v7, %v2084_v7 }
 0x165   :  { %v621_v60 = vunpack.c.l.bf16 %v601_v13  ;;  %v1078_v56 = vpack.c.bf16 %v1063_v33, %v1062_v45  ;;  %v827_v38 = vpack.c.bf16 %v811_v55, %v811_v55 }
 0x166   :  { %v752_v54 = vunpack.c.l.bf16 %v736_v40  ;;  %v657_v42 = vpack.c.bf16 %v641_v41, %v641_v41  ;;  %v796_v35 = vunpack.c.l.bf16 %v780_v36  ;;  %v733_v37 = vpack.c.bf16 %v717_v57, %v717_v57 }
 0x167   :  { %v583_v3 = vpop.f32.mrf.mxu3  ;;  %v638_v2 = vadd.f32 %v2007_v20, %v621_v60  ;;  %1269 = vmatmul.msk.bf16.vlgmr.msra.gmra.mxu1 %vm1113_vm4, %v1078_v56  ;;  %v858_v41 = vadd.f32 %v842_v27, %v2048_v53 }
 0x168   :  { %v768_v25 = vmul.f32 %v752_v54, %v2074_v49  ;;  %v2087_v39 = vunpack.c.l.bf16 %v657_v42  ;;  %v605_v12 = vpack.c.bf16 %v583_v3, %v583_v3  ;;  %v749_v1 = vunpack.c.l.bf16 %v733_v37 }
 0x169   :  { %v654_v21 = vpack.c.bf16 %v638_v2, %v638_v2  ;;  %v575_v15 = vpop.f32.mrf.mxu0  ;;  %v812_v34 = vmul.f32 0.044677734, %v796_v35  ;;  %v843_v54 = vunpack.c.l.bf16 %v827_v38  ;;  %v921_v3 = vpack.c.bf16 %v905_v10, %v905_v10 }
 0x16a   :  { %v721_v30 = vmul.f32 %v2087_v39, %v2087_v39  ;;  %v625_v51 = vunpack.c.l.bf16 %v605_v12  ;;  %v784_v63 = vpack.c.bf16 %v768_v25, %v768_v25  ;;  %v765_v43 = vmul.f32 %v749_v1, %v2084_v7 }
 0x16b   :  { %v2101_v19 = vunpack.c.l.bf16 %v654_v21  ;;  %v602_v29 = vpack.c.bf16 %v575_v15, %v575_v15  ;;  %v828_v28 = vpack.c.bf16 %v812_v34, %v812_v34  ;;  %v874_v25 = vpack.c.bf16 %v858_v41, %v858_v41 }
 0x16c   :  { %v737_v8 = vpack.c.bf16 %v721_v30, %v721_v30  ;;  %v642_v61 = vadd.f32 %v2007_v20, %v625_v51  ;;  %v800_v48 = vunpack.c.l.bf16 %v784_v63  ;;  %v781_v50 = vpack.c.bf16 %v765_v43, %v765_v43 }
 0x16d   :  { %v718_v14 = vmul.f32 %v2101_v19, %v2101_v19  ;;  %v622_v40 = vunpack.c.l.bf16 %v602_v29  ;;  %v844_v57 = vunpack.c.l.bf16 %v828_v28  ;;  %v936_v12 = vunpack.c.l.bf16 %v920_v22 }
 0x16e   :  { %v753_v11 = vunpack.c.l.bf16 %v737_v8  ;;  %v658_v5 = vpack.c.bf16 %v642_v61, %v642_v61  ;;  %v797_v18 = vunpack.c.l.bf16 %v781_v50  ;;  %v816_v42 = vmul.f32 0.044677734, %v800_v48 }
 0x16f   :  { %v585_v4 = vpop.f32.mrf.mxu3  ;;  %v734_v59 = vpack.c.bf16 %v718_v14, %v718_v14  ;;  %v639_v24 = vadd.f32 %v2007_v20, %v622_v40  ;;  %v859_v37 = vadd.f32 %v843_v54, %v2056_v44  ;;  %v937_v56 = vunpack.c.l.bf16 %v921_v3 }
 0x170   :  { %v769_v9 = vmul.f32 %v753_v11, %v2087_v39  ;;  %v606_v23 = vpack.c.bf16 %v585_v4, %v585_v4  ;;  %v2106_v52 = vunpack.c.l.bf16 %v658_v5  ;;  %v813_v46 = vmul.f32 0.044677734, %v797_v18 }
 0x171   :  { %v750_v45 = vunpack.c.l.bf16 %v734_v59  ;;  %v655_v36 = vpack.c.bf16 %v639_v24, %v639_v24  ;;  %v832_v55 = vpack.c.bf16 %v816_v42, %v816_v42  ;;  %v860_v21 = vadd.f32 %v844_v57, %v2064_v6 }
 0x172   :  { %v785_v16 = vpack.c.bf16 %v769_v9, %v769_v9  ;;  %v626_v31 = vunpack.c.l.bf16 %v606_v23  ;;  %v722_v26 = vmul.f32 %v2106_v52, %v2106_v52  ;;  %v829_v63 = vpack.c.bf16 %v813_v46, %v813_v46 }
 0x173   :  { %v766_v47 = vmul.f32 %v750_v45, %v2101_v19  ;;  %v2114_v35 = vunpack.c.l.bf16 %v655_v36  ;;  %1331 = vtanh.f32 %v936_v12  ;;  %v2129_v5 = vunpack.c.l.bf16 %v697_v17 }
 0x174   :  { %v643_v13 = vadd.f32 %v2007_v20, %v626_v31  ;;  %v738_v32 = vpack.c.bf16 %v722_v26, %v722_v26  ;;  %v801_v33 = vunpack.c.l.bf16 %v785_v16  ;;  %1333 = vtanh.f32 %v937_v56 }
 0x175   :  { %v782_v8 = vpack.c.bf16 %v766_v47, %v766_v47  ;;  %v719_v1 = vmul.f32 %v2114_v35, %v2114_v35  ;;  %v875_v29 = vpack.c.bf16 %v859_v37, %v859_v37  ;;  %v845_v4 = vunpack.c.l.bf16 %v829_v63 }
 0x176   :  { %v659_v60 = vpack.c.bf16 %v643_v13, %v643_v13  ;;  %v754_v62 = vunpack.c.l.bf16 %v738_v32  ;;  %v817_v22 = vmul.f32 0.044677734, %v801_v33  ;;  %v890_v9 = vunpack.c.l.bf16 %v874_v25 }
 0x177   :  { %v588_v30 = vpop.f32.mrf.mxu3  ;;  %v798_v27 = vunpack.c.l.bf16 %v782_v8  ;;  %v735_v11 = vpack.c.bf16 %v719_v1, %v719_v1  ;;  %v848_v23 = vunpack.c.l.bf16 %v832_v55  ;;  %v876_v40 = vpack.c.bf16 %v860_v21, %v860_v21 }
 0x178   :  { %v2117_v2 = vunpack.c.l.bf16 %v659_v60  ;;  %v607_v51 = vpack.c.bf16 %v588_v30, %v588_v30  ;;  %v770_v34 = vmul.f32 %v754_v62, %v2106_v52  ;;  %v833_v41 = vpack.c.bf16 %v817_v22, %v817_v22 }
 0x179   :  { %v814_v38 = vmul.f32 0.044677734, %v798_v27  ;;  %v751_v48 = vunpack.c.l.bf16 %v735_v11  ;;  %v1332_v18 = vpop.eup %1331  ;;  %v891_v24 = vunpack.c.l.bf16 %v875_v29  ;;  %v861_v54 = vadd.f32 %v845_v4, %v2084_v7 }
 0x17a   :  { %v723_v61 = vmul.f32 %v2117_v2, %v2117_v2  ;;  %v627_v15 = vunpack.c.l.bf16 %v607_v51  ;;  %v786_v28 = vpack.c.bf16 %v770_v34, %v770_v34  ;;  %v968_v13 = vpack.c.bf16 %v1332_v18, %v1332_v18  ;;  %v1334_v3 = vpop.eup %1333 }
 0x17b   :  { %v767_v16 = vmul.f32 %v751_v48, %v2114_v35  ;;  %v830_v59 = vpack.c.bf16 %v814_v38, %v814_v38  ;;  %v2137_v46 = vadd.f32 %v848_v23, %v2074_v49  ;;  %v892_v25 = vunpack.c.l.bf16 %v876_v40 }
 0x17c   :  { %v739_v10 = vpack.c.bf16 %v723_v61, %v723_v61  ;;  %v644_v43 = vadd.f32 %v2007_v20, %v627_v15  ;;  %v849_v57 = vunpack.c.l.bf16 %v833_v41  ;;  %v969_v12 = vpack.c.bf16 %v1334_v3, %v1334_v3 }
 0x17d   :  { %v783_v42 = vpack.c.bf16 %v767_v16, %v767_v16  ;;  %v846_v33 = vunpack.c.l.bf16 %v830_v59  ;;  %v802_v47 = vunpack.c.l.bf16 %v786_v28  ;;  %v984_v62 = vunpack.c.l.bf16 %v968_v13 }
 0x17e   :  { %v755_v50 = vunpack.c.l.bf16 %v739_v10  ;;  %v660_v14 = vpack.c.bf16 %v644_v43, %v644_v43  ;;  %v877_v37 = vpack.c.bf16 %v861_v54, %v861_v54  ;;  %v985_v56 = vunpack.c.l.bf16 %v969_v12 }
 0x17f   :  { %v590_v31 = vpop.f32.mrf.mxu3  ;;  %v799_v60 = vunpack.c.l.bf16 %v783_v42  ;;  %v906_v55 = vmul.f32 0.796875, %v890_v9  ;;  %v1000_v1 = vadd.f32 1.0, %v984_v62  ;;  %v865_v61 = vadd.f32 %v849_v57, %v2087_v39 }
 0x180   :  { %v771_v0 = vmul.f32 %v755_v50, %v2117_v2  ;;  %v2133_v17 = vunpack.c.l.bf16 %v660_v14  ;;  %v608_v26 = vpack.c.bf16 %v590_v31, %v590_v31  ;;  %v1001_v22 = vadd.f32 1.0, %v985_v56 }
 0x181   :  { %v815_v51 = vmul.f32 0.044677734, %v799_v60  ;;  %v907_v27 = vmul.f32 0.796875, %v891_v24  ;;  %v862_v34 = vadd.f32 %v846_v33, %v2101_v19  ;;  %v818_v11 = vmul.f32 0.044677734, %v802_v47 }
 0x182   :  { %v787_v45 = vpack.c.bf16 %v771_v0, %v771_v0  ;;  %v724_v32 = vmul.f32 %v2133_v17, %v2133_v17  ;;  %v628_v36 = vunpack.c.l.bf16 %v608_v26  ;;  %v1016_v10 = vpack.c.bf16 %v1000_v1, %v1000_v1 }
 0x183   :  { %v831_v15 = vpack.c.bf16 %v815_v51, %v815_v51  ;;  %v1017_v4 = vpack.c.bf16 %v1001_v22, %v1001_v22  ;;  %v922_v38 = vpack.c.bf16 %v906_v55, %v906_v55  ;;  %v923_v41 = vpack.c.bf16 %v907_v27, %v907_v27 }
 0x184   :  { %v645_v30 = vadd.f32 %v2007_v20, %v628_v36  ;;  %v803_v63 = vunpack.c.l.bf16 %v787_v45  ;;  %v740_v8 = vpack.c.bf16 %v724_v32, %v724_v32  ;;  %v893_v20 = vunpack.c.l.bf16 %v877_v37 }
 0x185   :  { %v847_v29 = vunpack.c.l.bf16 %v831_v15  ;;  %v1048_v23 = vunpack.c.l.bf16 %v1016_v10  ;;  %v1049_v40 = vunpack.c.l.bf16 %v1017_v4  ;;  %v938_v28 = vunpack.c.l.bf16 %v922_v38 }
 0x186   :  { %v661_v21 = vpack.c.bf16 %v645_v30, %v645_v30  ;;  %v819_v48 = vmul.f32 0.044677734, %v803_v63  ;;  %v756_v9 = vunpack.c.l.bf16 %v740_v8  ;;  %v878_v16 = vpack.c.bf16 %v862_v34, %v862_v34 }
 0x187   :  { %v863_v14 = vadd.f32 %v847_v29, %v2114_v35  ;;  %v834_v31 = vpack.c.bf16 %v818_v11, %v818_v11  ;;  %v1064_v18 = vmul.f32 %v1048_v23, %v2066_v58  ;;  %v1065_v26 = vmul.f32 %v1049_v40, %v2129_v5 }
 0x188   :  { %v2144_v43 = vunpack.c.l.bf16 %v661_v21  ;;  %v939_v24 = vunpack.c.l.bf16 %v923_v41  ;;  %1335 = vtanh.f32 %v938_v28  ;;  %v835_v54 = vpack.c.bf16 %v819_v48, %v819_v48 }
 0x189   :  { %v879_v0 = vpack.c.bf16 %v863_v14, %v863_v14  ;;  %v772_v3 = vmul.f32 %v756_v9, %v2133_v17  ;;  %v1079_v45 = vpack.c.bf16 %v1065_v26, %v1064_v18  ;;  %v880_v32 = vpack.c.bf16 %v2137_v46, %v2137_v46 }
 0x18a   :  { %v725_v50 = vmul.f32 %v2144_v43, %v2144_v43  ;;  %1337 = vtanh.f32 %v939_v24  ;;  %v881_v36 = vpack.c.bf16 %v865_v61, %v865_v61  ;;  %v894_v58 = vunpack.c.l.bf16 %v878_v16 }
 0x18b   :  { %v895_v13 = vunpack.c.l.bf16 %v879_v0  ;;  %v850_v60 = vunpack.c.l.bf16 %v834_v31  ;;  %1270 = vmatmul.msk.bf16.gmra.mxu1 %vm1113_vm4, %v1079_v45  ;;  %v908_v5 = vmul.f32 0.796875, %v892_v25  ;;  %v909_v12 = vmul.f32 0.796875, %v893_v20 }
 0x18c   :  { %v741_v59 = vpack.c.bf16 %v725_v50, %v725_v50  ;;  %v851_v33 = vunpack.c.l.bf16 %v835_v54  ;;  %v682_v62 = vmul.f32 0.5, %v2048_v53  ;;  %v788_v51 = vpack.c.bf16 %v772_v3, %v772_v3 }
 0x18d   :  { %v911_v37 = vmul.f32 0.796875, %v895_v13  ;;  %v924_v56 = vpack.c.bf16 %v908_v5, %v908_v5  ;;  %v925_v55 = vpack.c.bf16 %v909_v12, %v909_v12  ;;  %v896_v63 = vunpack.c.l.bf16 %v880_v32 }
 0x18e   :  { %v757_v42 = vunpack.c.l.bf16 %v741_v59  ;;  %v1336_v30 = vpop.eup %1335  ;;  %v897_v46 = vunpack.c.l.bf16 %v881_v36  ;;  %v683_v8 = vmul.f32 0.5, %v2056_v44  ;;  %v866_v61 = vadd.f32 %v850_v60, %v2106_v52 }
 0x18f   :  { %v970_v1 = vpack.c.bf16 %v1336_v30, %v1336_v30  ;;  %v940_v15 = vunpack.c.l.bf16 %v924_v56  ;;  %v941_v25 = vunpack.c.l.bf16 %v925_v55  ;;  %v910_v22 = vmul.f32 0.796875, %v894_v58 }
 0x190   :  { %v773_v57 = vmul.f32 %v757_v42, %v2144_v43  ;;  %v1338_v21 = vpop.eup %1337  ;;  %v867_v27 = vadd.f32 %v851_v33, %v2117_v2  ;;  %v804_v10 = vunpack.c.l.bf16 %v788_v51  ;;  %v927_v29 = vpack.c.bf16 %v911_v37, %v911_v37 }
 0x191   :  { %v971_v53 = vpack.c.bf16 %v1338_v21, %v1338_v21  ;;  %v986_v11 = vunpack.c.l.bf16 %v970_v1  ;;  %1339 = vtanh.f32 %v940_v15  ;;  %v926_v20 = vpack.c.bf16 %v910_v22, %v910_v22 }
 0x192   :  { %v789_v47 = vpack.c.bf16 %v773_v57, %v773_v57  ;;  %v698_v4 = vpack.c.bf16 %v682_v62, %v682_v62  ;;  %v699_v38 = vpack.c.bf16 %v683_v8, %v683_v8  ;;  %v882_v9 = vpack.c.bf16 %v866_v61, %v866_v61 }
 0x193   :  { %v987_v48 = vunpack.c.l.bf16 %v971_v53  ;;  %v1002_v44 = vadd.f32 1.0, %v986_v11  ;;  %1341 = vtanh.f32 %v941_v25  ;;  %v942_v23 = vunpack.c.l.bf16 %v926_v20 }
 0x194   :  { %v805_v34 = vunpack.c.l.bf16 %v789_v47  ;;  %v943_v50 = vunpack.c.l.bf16 %v927_v29  ;;  %v883_v14 = vpack.c.bf16 %v867_v27, %v867_v27  ;;  %v820_v16 = vmul.f32 0.044677734, %v804_v10 }
 0x195   :  { %v1003_v41 = vadd.f32 1.0, %v987_v48  ;;  %v1018_v28 = vpack.c.bf16 %v1002_v44, %v1002_v44  ;;  %1343 = vtanh.f32 %v942_v23  ;;  %v912_v31 = vmul.f32 0.796875, %v896_v63 }
 0x196   :  { %v821_v40 = vmul.f32 0.044677734, %v805_v34  ;;  %v913_v18 = vmul.f32 0.796875, %v897_v46  ;;  %v1034_v0 = vunpack.c.l.bf16 %v698_v4  ;;  %1345 = vtanh.f32 %v943_v50 }
 0x197   :  { %v1019_v59 = vpack.c.bf16 %v1003_v41, %v1003_v41  ;;  %v1050_v26 = vunpack.c.l.bf16 %v1018_v28  ;;  %v1340_v24 = vpop.eup %1339  ;;  %v1035_v54 = vunpack.c.l.bf16 %v699_v38  ;;  %v684_v42 = vmul.f32 0.5, %v2064_v6 }
 0x198   :  { %v928_v13 = vpack.c.bf16 %v912_v31, %v912_v31  ;;  %v929_v3 = vpack.c.bf16 %v913_v18, %v913_v18  ;;  %v898_v45 = vunpack.c.l.bf16 %v882_v9  ;;  %v837_v32 = vpack.c.bf16 %v821_v40, %v821_v40 }
 0x199   :  { %v1051_v36 = vunpack.c.l.bf16 %v1019_v59  ;;  %v972_v57 = vpack.c.bf16 %v1340_v24, %v1340_v24  ;;  %v1342_v58 = vpop.eup %1341  ;;  %v899_v60 = vunpack.c.l.bf16 %v883_v14  ;;  %v836_v5 = vpack.c.bf16 %v820_v16, %v820_v16 }
 0x19a   :  { %v944_v12 = vunpack.c.l.bf16 %v928_v13  ;;  %v945_v33 = vunpack.c.l.bf16 %v929_v3  ;;  %v1066_v47 = vmul.f32 %v1050_v26, %v1034_v0  ;;  %v973_v30 = vpack.c.bf16 %v1342_v58, %v1342_v58 }
 0x19b   :  { %v1067_v62 = vmul.f32 %v1051_v36, %v1035_v54  ;;  %v988_v37 = vunpack.c.l.bf16 %v972_v57  ;;  %v1344_v51 = vpop.eup %1343  ;;  %v685_v56 = vmul.f32 0.5, %v2084_v7  ;;  %v700_v55 = vpack.c.bf16 %v684_v42, %v684_v42 }
 0x19c   :  { %v686_v6 = vmul.f32 0.5, %v2101_v19  ;;  %1347 = vtanh.f32 %v944_v12  ;;  %v1346_v63 = vpop.eup %1345  ;;  %v853_v46 = vunpack.c.l.bf16 %v837_v32  ;;  %v989_v1 = vunpack.c.l.bf16 %v973_v30 }
 0x19d   :  { %v1080_v8 = vpack.c.bf16 %v1067_v62, %v1066_v47  ;;  %v1004_v21 = vadd.f32 1.0, %v988_v37  ;;  %v687_v61 = vmul.f32 0.5, %v2114_v35  ;;  %v974_v15 = vpack.c.bf16 %v1344_v51, %v1344_v51 }
 0x19e   :  { %v975_v25 = vpack.c.bf16 %v1346_v63, %v1346_v63  ;;  %1349 = vtanh.f32 %v945_v33  ;;  %v852_v22 = vunpack.c.l.bf16 %v836_v5  ;;  %v1005_v27 = vadd.f32 1.0, %v989_v1 }
 0x19f   :  { %1271 = vmatmul.msk.bf16.gmra.mxu1 %vm1113_vm4, %v1080_v8  ;;  %v914_v34 = vmul.f32 0.796875, %v898_v45  ;;  %v915_v7 = vmul.f32 0.796875, %v899_v60  ;;  %v701_v53 = vpack.c.bf16 %v685_v56, %v685_v56  ;;  %v990_v11 = vunpack.c.l.bf16 %v974_v15 }
 0x1a0   :  { %v991_v19 = vunpack.c.l.bf16 %v975_v25  ;;  %v869_v10 = vadd.f32 %v853_v46, %v2144_v43  ;;  %v1020_v20 = vpack.c.bf16 %v1004_v21, %v1004_v21  ;;  %v1021_v29 = vpack.c.bf16 %v1005_v27, %v1005_v27 }
 0x1a1   :  { %v931_v4 = vpack.c.bf16 %v915_v7, %v915_v7  ;;  %v702_v48 = vpack.c.bf16 %v686_v6, %v686_v6  ;;  %v703_v35 = vpack.c.bf16 %v687_v61, %v687_v61  ;;  %v1006_v44 = vadd.f32 1.0, %v990_v11 }
 0x1a2   :  { %v1348_v38 = vpop.eup %1347  ;;  %v1007_v9 = vadd.f32 1.0, %v991_v19  ;;  %v868_v23 = vadd.f32 %v852_v22, %v2133_v17  ;;  %v1036_v50 = vunpack.c.l.bf16 %v700_v55  ;;  %v1053_v14 = vunpack.c.l.bf16 %v1021_v29 }
 0x1a3   :  { %v930_v40 = vpack.c.bf16 %v914_v34, %v914_v34  ;;  %v1037_v28 = vunpack.c.l.bf16 %v701_v53  ;;  %v1022_v16 = vpack.c.bf16 %v1006_v44, %v1006_v44  ;;  %v976_v18 = vpack.c.bf16 %v1348_v38, %v1348_v38 }
 0x1a4   :  { %v1350_v41 = vpop.eup %1349  ;;  %v1023_v31 = vpack.c.bf16 %v1007_v9, %v1007_v9  ;;  %v885_v59 = vpack.c.bf16 %v869_v10, %v869_v10  ;;  %v1052_v0 = vunpack.c.l.bf16 %v1020_v20  ;;  %v947_v24 = vunpack.c.l.bf16 %v931_v4 }
 0x1a5   :  { %v977_v26 = vpack.c.bf16 %v1350_v41, %v1350_v41  ;;  %v1038_v54 = vunpack.c.l.bf16 %v702_v48  ;;  %v1039_v42 = vunpack.c.l.bf16 %v703_v35  ;;  %v1054_v13 = vunpack.c.l.bf16 %v1022_v16 }
 0x1a6   :  { %v1055_v3 = vunpack.c.l.bf16 %v1023_v31  ;;  %v884_v45 = vpack.c.bf16 %v868_v23, %v868_v23  ;;  %v1069_v32 = vmul.f32 %v1053_v14, %v1037_v28  ;;  %v946_v57 = vunpack.c.l.bf16 %v930_v40 }
 0x1a7   :  { %v993_v36 = vunpack.c.l.bf16 %v977_v26  ;;  %v1070_v58 = vmul.f32 %v1054_v13, %v1038_v54  ;;  %v992_v5 = vunpack.c.l.bf16 %v976_v18  ;;  %v901_v12 = vunpack.c.l.bf16 %v885_v59 }
 0x1a8   :  { %v1071_v60 = vmul.f32 %v1055_v3, %v1039_v42  ;;  %v1068_v33 = vmul.f32 %v1052_v0, %v1036_v50  ;;  %1351 = vtanh.f32 %v947_v24  ;;  %v900_v30 = vunpack.c.l.bf16 %v884_v45 }
 0x1a9   :  { %v1009_v62 = vadd.f32 1.0, %v993_v36  ;;  %1353 = vtanh.f32 %v946_v57  ;;  %v689_v51 = vmul.f32 0.5, %v2087_v39  ;;  %v1008_v56 = vadd.f32 1.0, %v992_v5 }
 0x1aa   :  { %v1082_v47 = vpack.c.bf16 %v1071_v60, %v1070_v58  ;;  %v1081_v37 = vpack.c.bf16 %v1069_v32, %v1068_v33  ;;  %v917_v55 = vmul.f32 0.796875, %v901_v12  ;;  %v688_v6 = vmul.f32 0.5, %v2074_v49 }
 0x1ab   :  { %v1025_v63 = vpack.c.bf16 %v1009_v62, %v1009_v62  ;;  %v916_v8 = vmul.f32 0.796875, %v900_v30  ;;  %v705_v1 = vpack.c.bf16 %v689_v51, %v689_v51  ;;  %v1024_v21 = vpack.c.bf16 %v1008_v56, %v1008_v56  ;;  %v1359_v56 = vld [vmem:[%s2266_s0] sm:$0xff] }
 0x1ac   :  { %1273 = vmatmul.msk.bf16.vlgmr.msra.gmra.mxu2 %vm1113_vm4, %v1082_v47  ;;  %v933_v15 = vpack.c.bf16 %v917_v55, %v917_v55  ;;  %v704_v25 = vpack.c.bf16 %v688_v6, %v688_v6  ;;  %v691_v35 = vmul.f32 0.5, %v2117_v2  ;;  %v690_v9 = vmul.f32 0.5, %v2106_v52 }
 0x1ad   :  { %v1057_v22 = vunpack.c.l.bf16 %v1025_v63  ;;  %v932_v34 = vpack.c.bf16 %v916_v8, %v916_v8  ;;  %v1041_v7 = vunpack.c.l.bf16 %v705_v1  ;;  %v1056_v53 = vunpack.c.l.bf16 %v1024_v21 }
 0x1ae   :  { %v1352_v46 = vpop.eup %1351  ;;  %v949_v11 = vunpack.c.l.bf16 %v933_v15  ;;  %v1040_v19 = vunpack.c.l.bf16 %v704_v25  ;;  %v707_v14 = vpack.c.bf16 %v691_v35, %v691_v35  ;;  %v706_v28 = vpack.c.bf16 %v690_v9, %v690_v9  ;;  %v1366_v9 = vld [vmem:[%s2266_s0 + $0x40] sm:$0xff] }
 0x1af   :  { %1272 = vmatmul.msk.bf16.gmra.mxu1 %vm1113_vm4, %v1081_v37  ;;  %v1354_v61 = vpop.eup %1353  ;;  %v979_v27 = vpack.c.bf16 %v1352_v46, %v1352_v46  ;;  %v1073_v10 = vmul.f32 %v1057_v22, %v1041_v7  ;;  %v948_v20 = vunpack.c.l.bf16 %v932_v34  ;;  %v693_v52 = vmul.f32 0.5, %v2144_v43  ;;  %v2181_v43 = vld [vmem:[%s2272_s6] ss:$0 sm:$0xff]  ;;  %v1360_v46 = vld [vmem:[%s2266_s0 + $0x8] sm:$0xff] }
 0x1b0   :  { %v978_v39 = vpack.c.bf16 %v1354_v61, %v1354_v61  ;;  %v1072_v29 = vmul.f32 %v1056_v53, %v1040_v19  ;;  %1355 = vtanh.f32 %v949_v11  ;;  %v1043_v18 = vunpack.c.l.bf16 %v707_v14  ;;  %v1361_v61 = vld [vmem:[%s2266_s0 + $0x10] sm:$0xff] }
 0x1b1   :  { %v995_v49 = vunpack.c.l.bf16 %v979_v27  ;;  %1357 = vtanh.f32 %v948_v20  ;;  %v1042_v26 = vunpack.c.l.bf16 %v706_v28  ;;  %v692_v32 = vmul.f32 0.5, %v2133_v17  ;;  %v1362_v27 = vld [vmem:[%s2266_s0 + $0x18] sm:$0xff] }
 0x1b2   :  { %v994_v4 = vunpack.c.l.bf16 %v978_v39  ;;  %v1083_v38 = vpack.c.bf16 %v1073_v10, %v1072_v29  ;;  %v709_v57 = vpack.c.bf16 %v693_v52, %v693_v52  ;;  %v1363_v39 = vld [vmem:[%s2266_s0 + $0x20] sm:$0xff] }
 0x1b3   :  { %v1011_v48 = vadd.f32 1.0, %v995_v49  ;;  %v708_v60 = vpack.c.bf16 %v692_v32, %v692_v32  ;;  %v1364_v49 = vld [vmem:[%s2266_s0 + $0x28] sm:$0xff] }
 0x1b4   :  { %v1010_v44 = vadd.f32 1.0, %v994_v4  ;;  %v1045_v12 = vunpack.c.l.bf16 %v709_v57 }
 0x1b5   :  { %v1027_v23 = vpack.c.bf16 %v1011_v48, %v1011_v48  ;;  %v1044_v47 = vunpack.c.l.bf16 %v708_v60 }
 0x1b6   :  { %v1356_v50 = vpop.eup %1355  ;;  %v1026_v40 = vpack.c.bf16 %v1010_v44, %v1010_v44 }
 0x1b7   :  { %v1358_v41 = vpop.eup %1357  ;;  %v1059_v16 = vunpack.c.l.bf16 %v1027_v23  ;;  %v981_v31 = vpack.c.bf16 %v1356_v50, %v1356_v50 }
 0x1b8   :  { %v1058_v59 = vunpack.c.l.bf16 %v1026_v40  ;;  %v980_v0 = vpack.c.bf16 %v1358_v41, %v1358_v41  ;;  %v1367_v40 = vld [vmem:[%s2266_s0 + $0x38] sm:$0xff] }
 0x1b9   :  { %v1075_v24 = vmul.f32 %v1059_v16, %v1043_v18  ;;  %v997_v54 = vunpack.c.l.bf16 %v981_v31  ;;  %v1368_v31 = vld [vmem:[%s2266_s0 + $0x48] sm:$0xff] }
 0x1ba   :  { %v1074_v42 = vmul.f32 %v1058_v59, %v1042_v26  ;;  %v996_v13 = vunpack.c.l.bf16 %v980_v0  ;;  %v1369_v26 = vld [vmem:[%s2266_s0 + $0x50] sm:$0xff] }
 0x1bb   :  { %v1013_v3 = vadd.f32 1.0, %v997_v54 }
 0x1bc   :  { %1274 = vmatmul.msk.bf16.gmra.mxu2 %vm1113_vm4, %v1083_v38  ;;  %v1084_v2 = vpack.c.bf16 %v1075_v24, %v1074_v42  ;;  %v1012_v45 = vadd.f32 1.0, %v996_v13  ;;  %v1365_v38 = vld [vmem:[%s2266_s0 + $0x30] sm:$0xff]  ;;  %v1370_v13 = vld [vmem:[%s2266_s0 + $0x58] sm:$0xff] }
 0x1bd   :  { %v1029_v36 = vpack.c.bf16 %v1013_v3, %v1013_v3 }
 0x1be   :  { %v1028_v58 = vpack.c.bf16 %v1012_v45, %v1012_v45  ;;  %v1371_v45 = vld [vmem:[%s2266_s0 + $0x60] sm:$0xff] }
 0x1bf   :  { %v1061_v5 = vunpack.c.l.bf16 %v1029_v36 }
 0x1c0   :  { %v1060_v33 = vunpack.c.l.bf16 %v1028_v58  ;;  %v1372_v58 = vld [vmem:[%s2266_s0 + $0x68] sm:$0xff] }
 0x1c1   :  { %v1077_v62 = vmul.f32 %v1061_v5, %v1045_v12 }
 0x1c2   :  { %v1076_v30 = vmul.f32 %v1060_v33, %v1044_v47  ;;  %v1373_v33 = vld [vmem:[%s2266_s0 + $0x70] sm:$0xff] }
 0x1c4   :  { %v1085_v37 = vpack.c.bf16 %v1077_v62, %v1076_v30 }
 0x1cc   :  { %1275 = vmatmul.msk.bf16.gmra.mxu2 %vm1113_vm4, %v1084_v2 }
 0x1dc   :  { %1276 = vmatmul.msk.bf16.gmra.mxu2 %vm1113_vm4, %v1085_v37  ;;  %v1374_v37 = vld [vmem:[%s2266_s0 + $0x78] sm:$0xff] }
 0x1e4   :  { %v1147_v51 = vpop.f32.mrf.mxu1 }
 0x1e5   :  { %v1148_v17 = vadd.f32 %v2181_v43, %v1147_v51 }
 0x1e7   :  { %v1187_v55 = vadd.f32 %v1359_v56, %v1148_v17 }
 0x1e9   :  { %1203 = vst.msk [vmem:[#allocation2] sm:$0xff] %vm61_vm0, %v1187_v55 }
 0x1ec   :  { %v1149_v6 = vpop.f32.mrf.mxu1 }
 0x1ed   :  { %v1150_v63 = vadd.f32 %v2181_v43, %v1149_v6 }
 0x1ef   :  { %v1188_v8 = vadd.f32 %v1360_v46, %v1150_v63 }
 0x1f1   :  { %1204 = vst.msk [vmem:[#allocation2 + $0x8] sm:$0xff] %vm61_vm0, %v1188_v8 }
 0x208   :  { %v1152_v1 = vpop.f32.mrf.mxu1 }
 0x209   :  { %v1153_v21 = vadd.f32 %v2181_v43, %v1152_v1 }
 0x20b   :  { %v1189_v15 = vadd.f32 %v1361_v61, %v1153_v21 }
 0x20d   :  { %1205 = vst.msk [vmem:[#allocation2 + $0x10] sm:$0xff] %vm61_vm0, %v1189_v15 }
 0x210   :  { %v1154_v25 = vpop.f32.mrf.mxu1 }
 0x211   :  { %v1155_v22 = vadd.f32 %v2181_v43, %v1154_v25 }
 0x213   :  { %v1190_v34 = vadd.f32 %v1362_v27, %v1155_v22 }
 0x215   :  { %1206 = vst.msk [vmem:[#allocation2 + $0x18] sm:$0xff] %vm61_vm0, %v1190_v34 }
 0x21c   :  { %v1157_v7 = vpop.f32.mrf.mxu1 }
 0x21d   :  { %v1158_v53 = vadd.f32 %v2181_v43, %v1157_v7 }
 0x21f   :  { %v1191_v11 = vadd.f32 %v1363_v39, %v1158_v53 }
 0x221   :  { %1207 = vst.msk [vmem:[#allocation2 + $0x20] sm:$0xff] %vm61_vm0, %v1191_v11 }
 0x224   :  { %v1159_v19 = vpop.f32.mrf.mxu1 }
 0x225   :  { %v1160_v10 = vadd.f32 %v2181_v43, %v1159_v19 }
 0x227   :  { %v1192_v20 = vadd.f32 %v1364_v49, %v1160_v10 }
 0x229   :  { %1208 = vst.msk [vmem:[#allocation2 + $0x28] sm:$0xff] %vm61_vm0, %v1192_v20 }
 0x22c   :  { %v1162_v29 = vpop.f32.mrf.mxu1 }
 0x22d   :  { %v1163_v4 = vadd.f32 %v2181_v43, %v1162_v29 }
 0x22f   :  { %v1193_v48 = vadd.f32 %v1365_v38, %v1163_v4  ;;  %v1167_v35 = vpop.f32.mrf.mxu2 }
 0x230   :  { %v1168_v44 = vadd.f32 %v2181_v43, %v1167_v35 }
 0x231   :  { %1209 = vst.msk [vmem:[#allocation2 + $0x30] sm:$0xff] %vm61_vm0, %v1193_v48 }
 0x232   :  { %v1195_v23 = vadd.f32 %v1366_v9, %v1168_v44 }
 0x234   :  { %v1164_v50 = vpop.f32.mrf.mxu1  ;;  %1211 = vst.msk [vmem:[#allocation2 + $0x40] sm:$0xff] %vm61_vm0, %v1195_v23 }
 0x235   :  { %v1165_v14 = vadd.f32 %v2181_v43, %v1164_v50 }
 0x237   :  { %v1194_v41 = vadd.f32 %v1367_v40, %v1165_v14  ;;  %v1169_v28 = vpop.f32.mrf.mxu2 }
 0x238   :  { %v1170_v16 = vadd.f32 %v2181_v43, %v1169_v28 }
 0x239   :  { %1210 = vst.msk [vmem:[#allocation2 + $0x38] sm:$0xff] %vm61_vm0, %v1194_v41 }
 0x23a   :  { %v1196_v18 = vadd.f32 %v1368_v31, %v1170_v16 }
 0x23c   :  { %1212 = vst.msk [vmem:[#allocation2 + $0x48] sm:$0xff] %vm61_vm0, %v1196_v18 }
 0x23f   :  { %v1172_v59 = vpop.f32.mrf.mxu2 }
 0x240   :  { %v1173_v0 = vadd.f32 %v2181_v43, %v1172_v59 }
 0x242   :  { %v1197_v24 = vadd.f32 %v1369_v26, %v1173_v0 }
 0x244   :  { %1213 = vst.msk [vmem:[#allocation2 + $0x50] sm:$0xff] %vm61_vm0, %v1197_v24 }
 0x247   :  { %v1174_v54 = vpop.f32.mrf.mxu2 }
 0x248   :  { %v1175_v42 = vadd.f32 %v2181_v43, %v1174_v54 }
 0x24a   :  { %v1198_v2 = vadd.f32 %v1370_v13, %v1175_v42 }
 0x24c   :  { %1214 = vst.msk [vmem:[#allocation2 + $0x58] sm:$0xff] %vm61_vm0, %v1198_v2 }
 0x24f   :  { %v1177_v3 = vpop.f32.mrf.mxu2 }
 0x250   :  { %v1178_v52 = vadd.f32 %v2181_v43, %v1177_v3 }
 0x252   :  { %v1199_v32 = vadd.f32 %v1371_v45, %v1178_v52 }
 0x254   :  { %1215 = vst.msk [vmem:[#allocation2 + $0x60] sm:$0xff] %vm61_vm0, %v1199_v32 }
 0x257   :  { %v1179_v36 = vpop.f32.mrf.mxu2 }
 0x258   :  { %v1180_v57 = vadd.f32 %v2181_v43, %v1179_v36 }
 0x25a   :  { %v1200_v60 = vadd.f32 %v1372_v58, %v1180_v57 }
 0x25c   :  { %1216 = vst.msk [vmem:[#allocation2 + $0x68] sm:$0xff] %vm61_vm0, %v1200_v60 }
 0x25f   :  { %v1182_v5 = vpop.f32.mrf.mxu2 }
 0x260   :  { %v1183_v12 = vadd.f32 %v2181_v43, %v1182_v5 }
 0x262   :  { %v1201_v47 = vadd.f32 %v1373_v33, %v1183_v12 }
 0x264   :  { %1217 = vst.msk [vmem:[#allocation2 + $0x70] sm:$0xff] %vm61_vm0, %v1201_v47 }
 0x267   :  { %v1184_v62 = vpop.f32.mrf.mxu2 }
 0x268   :  { %v1185_v30 = vadd.f32 %v2181_v43, %v1184_v62 }
 0x26a   :  { %v1202_v51 = vadd.f32 %v1374_v37, %v1185_v30 }
 0x26c   :  { %1218 = vst.msk [vmem:[#allocation2 + $0x78] sm:$0xff] %vm61_vm0, %v1202_v51 }
 0x26d   :  { %1222 = vsyncadd [#allocation3], 1792  ;;  %s1225_s29 = sshll.u32 %s2273_s7, 4  ;;  %s1401_s30 = smov [#allocation2]   ;;  %s1226_s29 = int_to_ptr.hbm [resolvable:$true] %s1225_s29 }
 0x26e   :  { %s1223_s8 = sshll.u32 %s1401_s30, 4  ;;  %s1402_s9 = smov 128   ;;  %s1224_s8 = int_to_ptr.vmem [resolvable:$true] %s1223_s8 }
 0x26f   :  { %s1403_s10 = smov 8  }
 0x270   :  { %1231 = dma.vmem_to_hbm [thread:$0]  %s1224_s8, 256, %s1226_s29, [#allocation3], %s1402_s9, %s1402_s9, %s1403_s10  }
 0x271   :  { %1399 = dma.done.wait [#allocation3], 2048  }
 0x272   :  { %1400 = vsyncadd [#allocation3], 4294965248 }
 0x273   :  { %1236 = vsyncpa [#allocation3], 1 }

</bundles_post_ra>
